<compile_context>
chip_gen: v7x
topology: tpu7x:2x2x1
jax: 0.10.0
libtpu: 0.0.40
codegen_flags: <defaults>
</compile_context>

<pallas_src>
import functools

import jax
import jax.numpy as jnp
from jax.experimental import pallas as pl
from jax.experimental.pallas import tpu as pltpu


PLANES = ('xy', 'xz', 'yz')
PADDING = 0.1
_MXU_DTYPE = jnp.bfloat16   # MXU operand dtype (accumulation stays f32)


# ----------------------------------------------------------------------------
# Small helpers
# ----------------------------------------------------------------------------

def _round_up(x, m):
    return ((x + m - 1) // m) * m


def _pick_tile_h(h):
    """Row-strip height: must divide h; ~16 rows/strip at production reso."""
    if h >= 32 and h % 16 == 0:
        return 16
    if h > 8 and h % 8 == 0:
        return 8
    return h


def _vmem_limit_bytes():
    # Explicit scoped-VMEM limit: min(100 MiB, 90% physical) so the same code is
    # valid on v5e/v6e (128 MiB physical) and v7x (64 MiB physical).
    try:
        cap = getattr(pltpu.get_tpu_info(), "vmem_capacity_bytes", None)
        if cap:
            return int(min(100 * 1024 * 1024, (cap * 9) // 10))
    except Exception:
        pass
    return 64 * 1024 * 1024


# ----------------------------------------------------------------------------
# Fused conv3x3 -> ReLU -> conv3x3 -> ReLU  (row-strip tiled, scratch im2col)
# ----------------------------------------------------------------------------

def _double_conv_kernel(x_ref, w1_ref, b1_ref, w2_ref, b2_ref, o_ref,
                        xpad_ref, pm1_ref, xph_ref, pm2_ref):
    # x_ref  : (1, H, W, Cin)    full plane, resident across the strip axis
    # o_ref  : (1, th, W, Cout)  output row strip
    # xpad_ref: (H+4, W+2, Cin)  f32 zero-padded copy of the plane (per plane)
    # pm1_ref : (th+2, W, 9*Cin) bf16 im2col patches for conv1 (strip + halo)
    # xph_ref : (th+2, W+2, Cout) f32 zero-padded relu(conv1) rows of the strip
    # pm2_ref : (th, W, 9*Cout)  bf16 im2col patches for conv2
    H = xpad_ref.shape[0] - 4
    W = xpad_ref.shape[1] - 2
    Cin = xpad_ref.shape[2]
    th = o_ref.shape[1]
    Cout = o_ref.shape[3]

    s = pl.program_id(1)
    n_strips = pl.num_programs(1)

    # New plane: refresh the padded copy once (halo rows/cols stay zero, interior
    # is overwritten).  No concatenates, no wrapper jnp.pad HBM pass.
    @pl.when(s == 0)
    def _():
        xpad_ref[...] = jnp.zeros_like(xpad_ref)
        xph_ref[...] = jnp.zeros_like(xph_ref)
        xpad_ref[2:H + 2, 1:W + 1, :] = x_ref[0].astype(xpad_ref.dtype)

    row0 = pl.multiple_of(s * th, th)

    # ---- conv1 on rows [s*th-1, s*th+th+1): patch blocks via direct slice
    #      stores into persistent VMEM scratch.
    # TODO(synk): generate the kw (width) shifts with pltpu.roll (XLU slot) once
    #             sublane rolls of 3-D tiles are validated on all generations.
    for kh in range(3):
        for kw in range(3):
            j = kh * 3 + kw
            pm1_ref[:, :, j * Cin:(j + 1) * Cin] = (
                xpad_ref[pl.ds(row0 + kh, th + 2), kw:kw + W, :]
                .astype(pm1_ref.dtype))
    h = jnp.dot(pm1_ref[...].reshape((th + 2) * W, 9 * Cin), w1_ref[...],
                preferred_element_type=jnp.float32) + b1_ref[...]
    h = jnp.maximum(h, 0.0)

    # W-zero-padded copy of relu(conv1) rows for this strip.
    xph_ref[:, 1:W + 1, :] = h.reshape(th + 2, W, Cout).astype(xph_ref.dtype)

    # conv2's zero padding in H: halo rows that fall outside the image.
    @pl.when(s == 0)
    def _():
        xph_ref[0:1, :, :] = jnp.zeros((1, W + 2, Cout), xph_ref.dtype)

    @pl.when(s == n_strips - 1)
    def _():
        xph_ref[th + 1:th + 2, :, :] = jnp.zeros((1, W + 2, Cout), xph_ref.dtype)

    # ---- conv2 on the strip's th rows (static slices of the padded scratch).
    for kh in range(3):
        for kw in range(3):
            j = kh * 3 + kw
            pm2_ref[:, :, j * Cout:(j + 1) * Cout] = (
                xph_ref[kh:kh + th, kw:kw + W, :].astype(pm2_ref.dtype))
    y = jnp.dot(pm2_ref[...].reshape(th * W, 9 * Cout), w2_ref[...],
                preferred_element_type=jnp.float32) + b2_ref[...]
    y = jnp.maximum(y, 0.0)
    o_ref[0] = y.reshape(th, W, Cout).astype(o_ref.dtype)


def double_conv3x3_relu(x, w1, b1, w2, b2):
    """relu(conv3x3(relu(conv3x3(x)))), fused; grid = (plane-stack, row strip)."""
    B3, H, W, Cin = x.shape
    Cout = w1.shape[3]
    th = _pick_tile_h(H)
    assert H % th == 0 and H >= 3 and W >= 3
    w1m = w1.reshape(9 * Cin, Cout).astype(_MXU_DTYPE)
    w2m = w2.reshape(9 * Cout, Cout).astype(_MXU_DTYPE)
    b1m = b1.reshape(1, Cout).astype(jnp.float32)
    b2m = b2.reshape(1, Cout).astype(jnp.float32)
    return pl.pallas_call(
        _double_conv_kernel,
        out_shape=jax.ShapeDtypeStruct((B3, H, W, Cout), x.dtype),
        grid=(B3, H // th),
        in_specs=[
            # full plane resident across the strip axis (block index constant in s)
            pl.BlockSpec((1, H, W, Cin), lambda i, s: (i, 0, 0, 0)),
            pl.BlockSpec((9 * Cin, Cout), lambda i, s: (0, 0)),
            pl.BlockSpec((1, Cout), lambda i, s: (0, 0)),
            pl.BlockSpec((9 * Cout, Cout), lambda i, s: (0, 0)),
            pl.BlockSpec((1, Cout), lambda i, s: (0, 0)),
        ],
        out_specs=pl.BlockSpec((1, th, W, Cout), lambda i, s: (i, s, 0, 0)),
        scratch_shapes=[
            pltpu.VMEM((H + 4, W + 2, Cin), jnp.float32),     # xpad
            pltpu.VMEM((th + 2, W, 9 * Cin), _MXU_DTYPE),     # pm1
            pltpu.VMEM((th + 2, W + 2, Cout), jnp.float32),   # xph
            pltpu.VMEM((th, W, 9 * Cout), _MXU_DTYPE),        # pm2
        ],
        compiler_params=pltpu.CompilerParams(
            dimension_semantics=("parallel", "arbitrary"),
            vmem_limit_bytes=_vmem_limit_bytes()),
    )(x, w1m, b1m, w2m, b2m)


# ----------------------------------------------------------------------------
# Skip branch: [maxpool2x2 ->] conv1x1 -> residual add   (strip tiled)
# ----------------------------------------------------------------------------

def _skip_conv1x1_add_kernel(base_ref, skip_ref, w_ref, b_ref, o_ref, *, pool):
    th, W, Cout = base_ref.shape[1], base_ref.shape[2], base_ref.shape[3]
    Cin = skip_ref.shape[3]
    if pool:
        # TODO(synk): H-first then W pairing via a small scratch would halve the
        #             sublane-strided read volume (modest win).
        a = skip_ref[:, pl.ds(0, th, 2), pl.ds(0, W, 2), :]
        b = skip_ref[:, pl.ds(0, th, 2), pl.ds(1, W, 2), :]
        c = skip_ref[:, pl.ds(1, th, 2), pl.ds(0, W, 2), :]
        d = skip_ref[:, pl.ds(1, th, 2), pl.ds(1, W, 2), :]
        s = jnp.maximum(jnp.maximum(a, b), jnp.maximum(c, d))[0]   # (th, W, Cin)
    else:
        s = skip_ref[0]
    y = jnp.dot(s.astype(_MXU_DTYPE).reshape(th * W, Cin), w_ref[...],
                preferred_element_type=jnp.float32) + b_ref[...]
    out = base_ref[0].astype(jnp.float32) + y.reshape(th, W, Cout)
    o_ref[0] = out.astype(o_ref.dtype)


def skip_conv1x1_add(base, skip, w, b, *, pool):
    """base + conv1x1(maxpool2x2(skip) if pool else skip), fused, strip tiled."""
    B3, H, W, Cout = base.shape
    Cin = skip.shape[3]
    sf = 2 if pool else 1
    assert skip.shape[1] == sf * H and skip.shape[2] == sf * W
    th = _pick_tile_h(H)
    assert H % th == 0
    wm = w.reshape(w.shape[2], w.shape[3]).astype(_MXU_DTYPE)   # (Cin, Cout)
    bm = b.reshape(1, Cout).astype(jnp.float32)
    kern = functools.partial(_skip_conv1x1_add_kernel, pool=pool)
    return pl.pallas_call(
        kern,
        out_shape=jax.ShapeDtypeStruct((B3, H, W, Cout), base.dtype),
        grid=(B3, H // th),
        in_specs=[
            pl.BlockSpec((1, th, W, Cout), lambda i, s: (i, s, 0, 0)),
            pl.BlockSpec((1, sf * th, sf * W, Cin), lambda i, s: (i, s, 0, 0)),
            pl.BlockSpec((Cin, Cout), lambda i, s: (0, 0)),
            pl.BlockSpec((1, Cout), lambda i, s: (0, 0)),
        ],
        out_specs=pl.BlockSpec((1, th, W, Cout), lambda i, s: (i, s, 0, 0)),
        compiler_params=pltpu.CompilerParams(
            dimension_semantics=("parallel", "parallel"),
            vmem_limit_bytes=_vmem_limit_bytes()),
    )(base, skip, wm, bm)


# ----------------------------------------------------------------------------
# 2x2 max pool  (strip tiled)
# ----------------------------------------------------------------------------

def _maxpool2x2_kernel(x_ref, o_ref):
    tp, Wo = o_ref.shape[1], o_ref.shape[2]
    a = x_ref[:, pl.ds(0, tp, 2), pl.ds(0, Wo, 2), :]
    b = x_ref[:, pl.ds(0, tp, 2), pl.ds(1, Wo, 2), :]
    c = x_ref[:, pl.ds(1, tp, 2), pl.ds(0, Wo, 2), :]
    d = x_ref[:, pl.ds(1, tp, 2), pl.ds(1, Wo, 2), :]
    o_ref[...] = jnp.maximum(jnp.maximum(a, b), jnp.maximum(c, d))


def maxpool2x2_nhwc(x):
    B3, H, W, C = x.shape
    assert H % 2 == 0 and W % 2 == 0
    Ho, Wo = H // 2, W // 2
    tp = _pick_tile_h(Ho)
    assert Ho % tp == 0
    return pl.pallas_call(
        _maxpool2x2_kernel,
        out_shape=jax.ShapeDtypeStruct((B3, Ho, Wo, C), x.dtype),
        grid=(B3, Ho // tp),
        in_specs=[pl.BlockSpec((1, 2 * tp, W, C), lambda i, s: (i, s, 0, 0))],
        out_specs=pl.BlockSpec((1, tp, Wo, C), lambda i, s: (i, s, 0, 0)),
        compiler_params=pltpu.CompilerParams(
            dimension_semantics=("parallel", "parallel")),
    )(x)


# ----------------------------------------------------------------------------
# Fused point MLP: fc_comm (Linear -> ReLU -> Linear) [+ fc_c(c_last) residual]
# ----------------------------------------------------------------------------

def _point_mlp_kernel(*refs, has_c_last, m_total, needs_mask):
    if has_c_last:
        c_ref, cl_ref, w1_ref, b1_ref, w2_ref, b2_ref, wc_ref, bc_ref, o_ref = refs
    else:
        c_ref, w1_ref, b1_ref, w2_ref, b2_ref, o_ref = refs
        cl_ref = wc_ref = bc_ref = None
    c = c_ref[...]
    valid = None
    if needs_mask:
        tile_m = c.shape[0]
        rows = (pl.program_id(0) * tile_m
                + jax.lax.broadcasted_iota(jnp.int32, (tile_m, 1), 0))
        valid = rows < m_total
        c = jnp.where(valid, c, 0.0)
    h = jnp.dot(c.astype(_MXU_DTYPE), w1_ref[...],
                preferred_element_type=jnp.float32) + b1_ref[...]
    h = jnp.maximum(h, 0.0)
    o = jnp.dot(h.astype(_MXU_DTYPE), w2_ref[...],
                preferred_element_type=jnp.float32) + b2_ref[...]
    if has_c_last:
        cl = cl_ref[...]
        if needs_mask:
            cl = jnp.where(valid, cl, 0.0)
        o = o + jnp.dot(cl.astype(_MXU_DTYPE), wc_ref[...],
                        preferred_element_type=jnp.float32) + bc_ref[...]
    o_ref[...] = o.astype(o_ref.dtype)


def point_mlp_apply(c2d, params, cl2d=None):
    """fc_comm(c) [+ fc_c(c_last)] fused, tiled over M = B*N rows (no wrapper pad)."""
    M, C = c2d.shape
    Dout = params['fc2_w'].shape[1]
    tile_m = max(8, min(512, _round_up(M, 8)))
    grid_m = pl.cdiv(M, tile_m)
    needs_mask = (M % tile_m) != 0
    has_cl = cl2d is not None

    args = [c2d]
    in_specs = [pl.BlockSpec((tile_m, C), lambda i: (i, 0))]
    if has_cl:
        Cl = cl2d.shape[1]
        args.append(cl2d)
        in_specs.append(pl.BlockSpec((tile_m, Cl), lambda i: (i, 0)))

    w1 = params['fc1_w'].astype(_MXU_DTYPE)
    b1 = params['fc1_b'].reshape(1, -1).astype(jnp.float32)
    w2 = params['fc2_w'].astype(_MXU_DTYPE)
    b2 = params['fc2_b'].reshape(1, -1).astype(jnp.float32)
    args += [w1, b1, w2, b2]
    in_specs += [
        pl.BlockSpec(w1.shape, lambda i: (0, 0)),
        pl.BlockSpec(b1.shape, lambda i: (0, 0)),
        pl.BlockSpec(w2.shape, lambda i: (0, 0)),
        pl.BlockSpec(b2.shape, lambda i: (0, 0)),
    ]
    if has_cl:
        wc = params['fcc_w'].astype(_MXU_DTYPE)
        bc = params['fcc_b'].reshape(1, -1).astype(jnp.float32)
        args += [wc, bc]
        in_specs += [
            pl.BlockSpec(wc.shape, lambda i: (0, 0)),
            pl.BlockSpec(bc.shape, lambda i: (0, 0)),
        ]

    kern = functools.partial(_point_mlp_kernel, has_c_last=has_cl,
                             m_total=M, needs_mask=needs_mask)
    return pl.pallas_call(
        kern,
        out_shape=jax.ShapeDtypeStruct((M, Dout), c2d.dtype),
        grid=(grid_m,),
        in_specs=in_specs,
        out_specs=pl.BlockSpec((tile_m, Dout), lambda i: (i, 0)),
        compiler_params=pltpu.CompilerParams(
            dimension_semantics=("parallel",)),
    )(*args)


# ----------------------------------------------------------------------------
# Plain-JAX glue (coordinate handling, bilinear sampling, scatter-mean)
# ----------------------------------------------------------------------------

def normalize_coordinate(p, padding=PADDING, plane='xz'):
    if plane == 'xz':
        xy = p[:, :, jnp.array([0, 2])]
    elif plane == 'xy':
        xy = p[:, :, jnp.array([0, 1])]
    else:  # 'yz'
        xy = p[:, :, jnp.array([1, 2])]
    # NOTE: 10e-4 == 1e-3, kept to match the reference ConvONet code exactly.
    xy_new = xy / (1.0 + padding + 10e-4)
    xy_new = xy_new + 0.5
    xy_new = jnp.where(xy_new >= 1.0, 1.0 - 10e-4, xy_new)
    xy_new = jnp.where(xy_new < 0.0, 0.0, xy_new)
    return xy_new


def coordinate2index(xy, reso):
    xi = (xy * reso).astype(jnp.int32)
    return xi[:, :, 0] + reso * xi[:, :, 1]          # (B, N)


def _bilinear_sample(fea_nhwc, xy):
    # F.grid_sample(mode='bilinear', padding_mode='border', align_corners=True)
    # TODO(synk): data-dependent gather; kept in plain JAX (not Pallas).
    G, H, W, C = fea_nhwc.shape
    gx = 2.0 * xy[..., 0] - 1.0
    gy = 2.0 * xy[..., 1] - 1.0
    ix = jnp.clip((gx + 1.0) * 0.5 * (W - 1), 0.0, W - 1)
    iy = jnp.clip((gy + 1.0) * 0.5 * (H - 1), 0.0, H - 1)
    ix0 = jnp.floor(ix)
    iy0 = jnp.floor(iy)
    wx1 = ix - ix0
    wy1 = iy - iy0
    wx0 = 1.0 - wx1
    wy0 = 1.0 - wy1
    ix0i = jnp.clip(ix0.astype(jnp.int32), 0, W - 1)
    ix1i = jnp.clip(ix0i + 1, 0, W - 1)
    iy0i = jnp.clip(iy0.astype(jnp.int32), 0, H - 1)
    iy1i = jnp.clip(iy0i + 1, 0, H - 1)
    flat = fea_nhwc.reshape(G, H * W, C)

    def gather(iyi, ixi):
        idx = iyi * W + ixi                           # (G, N)
        return jnp.take_along_axis(flat, idx[:, :, None], axis=1)  # (G, N, C)

    v00 = gather(iy0i, ix0i)
    v01 = gather(iy0i, ix1i)
    v10 = gather(iy1i, ix0i)
    v11 = gather(iy1i, ix1i)
    return (v00 * (wy0 * wx0)[..., None] + v01 * (wy0 * wx1)[..., None]
            + v10 * (wy1 * wx0)[..., None] + v11 * (wy1 * wx1)[..., None])


def sample_planes_sum(p, ys, plane_sel, padding=PADDING):
    """Sum of bilinear plane samples for the requested planes (vectorized)."""
    B3, H, W, C = ys.shape
    B = B3 // len(PLANES)
    ys5 = ys.reshape(len(PLANES), B, H, W, C)
    if len(plane_sel) == len(PLANES):
        names = PLANES
        feats = ys5
    else:
        names = tuple(plane_sel)
        feats = ys5[jnp.array([PLANES.index(k) for k in names])]
    P = len(names)
    xy_all = jnp.stack([normalize_coordinate(p, padding, k) for k in names], 0)
    c = _bilinear_sample(feats.reshape(P * B, H, W, C),
                         xy_all.reshape(P * B, -1, 2))
    return c.reshape(P, B, -1, C).sum(axis=0)         # (B, N, C)


def generate_plane_features_stacked(p, c_feat, reso, plane_names, padding=PADDING):
    """scatter_mean of point features onto reso x reso planes, stacked (P*B,...)."""
    # TODO(synk): data-dependent scatter; kept in plain JAX (not Pallas).
    B, N, C = c_feat.shape
    P = len(plane_names)
    index = jnp.stack(
        [coordinate2index(normalize_coordinate(p, padding, k), reso)
         for k in plane_names], 0).reshape(P * B, N)
    feats = jnp.broadcast_to(c_feat[None], (P, B, N, C)).reshape(P * B, N, C)
    M = reso * reso

    def per_batch(s, idx):
        sums = jnp.zeros((M, C), s.dtype).at[idx].add(s)
        cnt = jnp.zeros((M,), s.dtype).at[idx].add(1.0)
        mean = sums / jnp.maximum(cnt, 1.0)[:, None]
        return mean.reshape(reso, reso, C)            # [iy, ix, c]

    return jax.vmap(per_batch)(feats, index)          # (P*B, reso, reso, C)


# ----------------------------------------------------------------------------
# DownConv forward
# ----------------------------------------------------------------------------

def down_conv_forward_stacked(params, p, xs, plane_type, downsample, pooling,
                              xs_after_conv=None, c_last=None):
    """Stacked NHWC forward.  xs: (3B, H, W, Cin) stacked in PLANES order.

    Chain consecutive DownConv blocks on this function so the NCHW<->NHWC
    transposes and plane (un)stacking happen only once at the module boundary.
    """
    B3, H, W, Cin = xs.shape
    assert B3 % len(PLANES) == 0
    B = B3 // len(PLANES)

    # conv1 -> ReLU -> conv2 -> ReLU (fused, scratch im2col, row-strip grid)
    ys = double_conv3x3_relu(xs, params['conv1_w'], params['conv1_b'],
                             params['conv2_w'], params['conv2_b'])

    # optional skip branch: [maxpool ->] conv1x1 -> residual add (fused)
    if xs_after_conv is not None:
        ys = skip_conv1x1_add(ys, xs_after_conv, params['conv1x1_w'],
                              params['conv1x1_b'],
                              pool=(downsample in (2, 3)))

    xs_after_conv_out = ys
    reso = H

    plane_sel = [k for k in PLANES if k in plane_type]
    if not plane_sel:
        raise ValueError("plane_type must contain at least one of %s" % (PLANES,))

    # point features: bilinear sample of requested planes, summed
    c = sample_planes_sum(p, ys, plane_sel)           # (B, N, Cout)
    Bc, N, Cc = c.shape
    c2d = c.reshape(Bc * N, Cc)
    cl2d = None if c_last is None else c_last.reshape(Bc * N, c_last.shape[-1])
    c2d = point_mlp_apply(c2d, params, cl2d)          # fc_comm (+ fc_c) fused
    c = c2d.reshape(Bc, N, -1)

    # scatter-mean point features back onto the planes
    scat = generate_plane_features_stacked(p, c, reso, plane_sel)
    if len(plane_sel) == len(PLANES):
        xs_new = scat                                  # already stacked, no concat
    else:
        parts = []
        for i, k in enumerate(PLANES):
            if k in plane_type:
                j = plane_sel.index(k)
                parts.append(scat[j * B:(j + 1) * B])
            else:
                parts.append(ys[i * B:(i + 1) * B])
        xs_new = jnp.concatenate(parts, axis=0)

    before_pool = xs_new
    xs_out = maxpool2x2_nhwc(xs_new) if pooling else xs_new
    return xs_out, before_pool, xs_after_conv_out, c


def _to_nhwc(t):
    return jnp.transpose(t, (0, 2, 3, 1))


def _to_nchw(t):
    return jnp.transpose(t, (0, 3, 1, 2))


def down_conv_forward(params, p, x, plane_type, downsample, pooling,
                      x_after_conv=None, c_last=None):
    """PyTorch-compatible boundary wrapper: dict of NCHW planes in / out."""
    B = x['xy'].shape[0]
    xs = jnp.concatenate([_to_nhwc(x[k]) for k in PLANES], axis=0)
    xs_after = None
    if x_after_conv is not None:
        xs_after = jnp.concatenate([_to_nhwc(x_after_conv[k]) for k in PLANES],
                                   axis=0)

    xs_out, before_pool_s, xs_after_out, c = down_conv_forward_stacked(
        params, p, xs, plane_type, downsample, pooling, xs_after, c_last)

    def unstack(t):
        return {k: _to_nchw(t[i * B:(i + 1) * B]) for i, k in enumerate(PLANES)}

    return unstack(xs_out), unstack(before_pool_s), unstack(xs_after_out), c


# ----------------------------------------------------------------------------
# Deterministic parameter init + demo run
# ----------------------------------------------------------------------------

def init_params(key, in_channels, out_channels):
    ks = jax.random.split(key, 12)

    def rnd(k, shape, scale=0.1):
        return (scale * jax.random.normal(k, shape)).astype(jnp.float32)

    return {
        'conv1_w': rnd(ks[0], (3, 3, in_channels, out_channels)),
        'conv1_b': rnd(ks[1], (out_channels,)),
        'conv2_w': rnd(ks[2], (3, 3, out_channels, out_channels)),
        'conv2_b': rnd(ks[3], (out_channels,)),
        'conv1x1_w': rnd(ks[4], (1, 1, in_channels, out_channels)),
        'conv1x1_b': rnd(ks[5], (out_channels,)),
        'fc1_w': rnd(ks[6], (out_channels, 2 * out_channels)),
        'fc1_b': rnd(ks[7], (2 * out_channels,)),
        'fc2_w': rnd(ks[8], (2 * out_channels, out_channels)),
        'fc2_b': rnd(ks[9], (out_channels,)),
        'fcc_w': rnd(ks[10], (in_channels, out_channels)),
        'fcc_b': rnd(ks[11], (out_channels,)),
    }


if __name__ == "__main__":
    B, Cin, Cout, H, W, Npts = 2, 4, 8, 16, 16, 8
    key = jax.random.PRNGKey(0)
    k_par, k_p, k_xy, k_xz, k_yz, k_ay, k_az, k_ax, k_cl = jax.random.split(key, 9)

    params = init_params(k_par, Cin, Cout)

    p = jax.random.uniform(k_p, (B, Npts, 3), jnp.float32, -0.5, 0.5)
    x = {
        'xy': jax.random.normal(k_xy, (B, Cin, H, W), jnp.float32),
        'xz': jax.random.normal(k_xz, (B, Cin, H, W), jnp.float32),
        'yz': jax.random.normal(k_yz, (B, Cin, H, W), jnp.float32),
    }
    x_after_conv = {
        'xy': jax.random.normal(k_ay, (B, Cin, H, W), jnp.float32),
        'xz': jax.random.normal(k_az, (B, Cin, H, W), jnp.float32),
        'yz': jax.random.normal(k_ax, (B, Cin, H, W), jnp.float32),
    }
    c_last = jax.random.normal(k_cl, (B, Npts, Cin), jnp.float32)

    plane_type = ['xz', 'xy', 'yz']
    out = down_conv_forward(params, p, x, plane_type,
                            downsample=1, pooling=True,
                            x_after_conv=x_after_conv, c_last=c_last)
    out = jax.block_until_ready(out)

    x_out, before_pool, x_after_conv_out, c_out = out
    assert x_out['xy'].shape == (B, Cout, H // 2, W // 2)
    assert before_pool['xz'].shape == (B, Cout, H, W)
    assert x_after_conv_out['yz'].shape == (B, Cout, H, W)
    assert c_out.shape == (B, Npts, Cout)
    print("KERNEL_OK")
</pallas_src>

<mosaic_0001>
module attributes {stable_mosaic.version = 11 : i64} {
  func.func @_double_conv_kernel(%arg0: i32, %arg1: i32, %arg2: memref<1x16x16x4xf32, #tpu.memory_space<vmem>>, %arg3: memref<36x8xbf16, #tpu.memory_space<vmem>>, %arg4: memref<1x8xf32, #tpu.memory_space<vmem>>, %arg5: memref<72x8xbf16, #tpu.memory_space<vmem>>, %arg6: memref<1x8xf32, #tpu.memory_space<vmem>>, %arg7: memref<1x8x16x8xf32, #tpu.memory_space<vmem>>, %arg8: memref<20x18x4xf32, #tpu.memory_space<vmem>>, %arg9: memref<10x16x36xbf16, #tpu.memory_space<vmem>>, %arg10: memref<10x18x8xf32, #tpu.memory_space<vmem>>, %arg11: memref<8x16x72xbf16, #tpu.memory_space<vmem>>) attributes {dimension_semantics = [#tpu.dimension_semantics<parallel>, #tpu.dimension_semantics<arbitrary>], iteration_bounds = array<i64: 6, 2>, scalar_prefetch = 0 : i64, scratch_operands = 4 : i64, tpu.core_type = #tpu.core_type<tc>, window_params = [{transform_indices = @transform_0, window_bounds = array<i64: 1, 16, 16, 4>}, {pipeline_mode = #tpu.pipeline_mode<synchronous>, transform_indices = @transform_1, window_bounds = array<i64: 36, 8>}, {pipeline_mode = #tpu.pipeline_mode<synchronous>, transform_indices = @transform_2, window_bounds = array<i64: 1, 8>}, {pipeline_mode = #tpu.pipeline_mode<synchronous>, transform_indices = @transform_3, window_bounds = array<i64: 72, 8>}, {pipeline_mode = #tpu.pipeline_mode<synchronous>, transform_indices = @transform_4, window_bounds = array<i64: 1, 8>}, {transform_indices = @transform_5, window_bounds = array<i64: 1, 8, 16, 8>}]} {
    %c0_i32 = arith.constant 0 : i32
    %0 = arith.cmpi eq, %arg1, %c0_i32 : i32
    %1 = arith.extui %0 : i1 to i32
    %c0_i32_0 = arith.constant 0 : i32
    %2 = arith.cmpi ne, %1, %c0_i32_0 : i32
    scf.if %2 {
      %cst_120 = arith.constant 0.000000e+00 : f32
      %107 = vector.broadcast %cst_120 : f32 to vector<20x18x4xf32>
      %c0_121 = arith.constant 0 : index
      %c0_122 = arith.constant 0 : index
      %c0_123 = arith.constant 0 : index
      %108 = vector.load %arg8[%c0_121, %c0_122, %c0_123] : memref<20x18x4xf32, #tpu.memory_space<vmem>>, vector<20x18x4xf32>
      tpu.vector_store %arg8[%c0_121, %c0_122, %c0_123], %107 {strides = array<i32>} : memref<20x18x4xf32, #tpu.memory_space<vmem>>, vector<20x18x4xf32>,
      %cst_124 = arith.constant 0.000000e+00 : f32
      %109 = vector.broadcast %cst_124 : f32 to vector<10x18x8xf32>
      %c0_125 = arith.constant 0 : index
      %c0_126 = arith.constant 0 : index
      %c0_127 = arith.constant 0 : index
      %110 = vector.load %arg10[%c0_125, %c0_126, %c0_127] : memref<10x18x8xf32, #tpu.memory_space<vmem>>, vector<10x18x8xf32>
      tpu.vector_store %arg10[%c0_125, %c0_126, %c0_127], %109 {strides = array<i32>} : memref<10x18x8xf32, #tpu.memory_space<vmem>>, vector<10x18x8xf32>,
      %c0_128 = arith.constant 0 : index
      %c0_129 = arith.constant 0 : index
      %c0_130 = arith.constant 0 : index
      %c0_131 = arith.constant 0 : index
      %111 = vector.load %arg2[%c0_128, %c0_129, %c0_130, %c0_131] : memref<1x16x16x4xf32, #tpu.memory_space<vmem>>, vector<1x16x16x4xf32>
      %112 = vector.shape_cast %111 : vector<1x16x16x4xf32> to vector<16x16x4xf32>
      %c2_132 = arith.constant 2 : index
      %c1_133 = arith.constant 1 : index
      %c0_134 = arith.constant 0 : index
      %113 = vector.load %arg8[%c2_132, %c1_133, %c0_134] : memref<20x18x4xf32, #tpu.memory_space<vmem>>, vector<16x16x4xf32>
      tpu.vector_store %arg8[%c2_132, %c1_133, %c0_134], %112 {strides = array<i32>} : memref<20x18x4xf32, #tpu.memory_space<vmem>>, vector<16x16x4xf32>,
    } else {
    }
    %c8_i32 = arith.constant 8 : i32
    %3 = arith.muli %arg1, %c8_i32 : i32
    %4 = tpu.assume_multiple %3, 8 : i32
    %c0_i32_1 = arith.constant 0 : i32
    %5 = arith.addi %4, %c0_i32_1 : i32
    %6 = arith.index_cast %5 : i32 to index
    %c0 = arith.constant 0 : index
    %c0_2 = arith.constant 0 : index
    %7 = vector.load %arg8[%6, %c0, %c0_2] : memref<20x18x4xf32, #tpu.memory_space<vmem>>, vector<10x16x4xf32>
    %8 = arith.truncf %7 : vector<10x16x4xf32> to vector<10x16x4xbf16>
    %c0_3 = arith.constant 0 : index
    %c0_4 = arith.constant 0 : index
    %c0_5 = arith.constant 0 : index
    %9 = vector.load %arg9[%c0_3, %c0_4, %c0_5] : memref<10x16x36xbf16, #tpu.memory_space<vmem>>, vector<10x16x4xbf16>
    tpu.vector_store %arg9[%c0_3, %c0_4, %c0_5], %8 {strides = array<i32>} : memref<10x16x36xbf16, #tpu.memory_space<vmem>>, vector<10x16x4xbf16>,
    %c0_i32_6 = arith.constant 0 : i32
    %10 = arith.addi %4, %c0_i32_6 : i32
    %11 = arith.index_cast %10 : i32 to index
    %c1 = arith.constant 1 : index
    %c0_7 = arith.constant 0 : index
    %12 = vector.load %arg8[%11, %c1, %c0_7] : memref<20x18x4xf32, #tpu.memory_space<vmem>>, vector<10x16x4xf32>
    %13 = arith.truncf %12 : vector<10x16x4xf32> to vector<10x16x4xbf16>
    %c0_8 = arith.constant 0 : index
    %c0_9 = arith.constant 0 : index
    %c4 = arith.constant 4 : index
    %14 = vector.load %arg9[%c0_8, %c0_9, %c4] : memref<10x16x36xbf16, #tpu.memory_space<vmem>>, vector<10x16x4xbf16>
    tpu.vector_store %arg9[%c0_8, %c0_9, %c4], %13 {strides = array<i32>} : memref<10x16x36xbf16, #tpu.memory_space<vmem>>, vector<10x16x4xbf16>,
    %c0_i32_10 = arith.constant 0 : i32
    %15 = arith.addi %4, %c0_i32_10 : i32
    %16 = arith.index_cast %15 : i32 to index
    %c2 = arith.constant 2 : index
    %c0_11 = arith.constant 0 : index
    %17 = vector.load %arg8[%16, %c2, %c0_11] : memref<20x18x4xf32, #tpu.memory_space<vmem>>, vector<10x16x4xf32>
    %18 = arith.truncf %17 : vector<10x16x4xf32> to vector<10x16x4xbf16>
    %c0_12 = arith.constant 0 : index
    %c0_13 = arith.constant 0 : index
    %c8 = arith.constant 8 : index
    %19 = vector.load %arg9[%c0_12, %c0_13, %c8] : memref<10x16x36xbf16, #tpu.memory_space<vmem>>, vector<10x16x4xbf16>
    tpu.vector_store %arg9[%c0_12, %c0_13, %c8], %18 {strides = array<i32>} : memref<10x16x36xbf16, #tpu.memory_space<vmem>>, vector<10x16x4xbf16>,
    %c1_i32 = arith.constant 1 : i32
    %20 = arith.addi %4, %c1_i32 : i32
    %21 = arith.index_cast %20 : i32 to index
    %c0_14 = arith.constant 0 : index
    %c0_15 = arith.constant 0 : index
    %22 = vector.load %arg8[%21, %c0_14, %c0_15] : memref<20x18x4xf32, #tpu.memory_space<vmem>>, vector<10x16x4xf32>
    %23 = arith.truncf %22 : vector<10x16x4xf32> to vector<10x16x4xbf16>
    %c0_16 = arith.constant 0 : index
    %c0_17 = arith.constant 0 : index
    %c12 = arith.constant 12 : index
    %24 = vector.load %arg9[%c0_16, %c0_17, %c12] : memref<10x16x36xbf16, #tpu.memory_space<vmem>>, vector<10x16x4xbf16>
    tpu.vector_store %arg9[%c0_16, %c0_17, %c12], %23 {strides = array<i32>} : memref<10x16x36xbf16, #tpu.memory_space<vmem>>, vector<10x16x4xbf16>,
    %c1_i32_18 = arith.constant 1 : i32
    %25 = arith.addi %4, %c1_i32_18 : i32
    %26 = arith.index_cast %25 : i32 to index
    %c1_19 = arith.constant 1 : index
    %c0_20 = arith.constant 0 : index
    %27 = vector.load %arg8[%26, %c1_19, %c0_20] : memref<20x18x4xf32, #tpu.memory_space<vmem>>, vector<10x16x4xf32>
    %28 = arith.truncf %27 : vector<10x16x4xf32> to vector<10x16x4xbf16>
    %c0_21 = arith.constant 0 : index
    %c0_22 = arith.constant 0 : index
    %c16 = arith.constant 16 : index
    %29 = vector.load %arg9[%c0_21, %c0_22, %c16] : memref<10x16x36xbf16, #tpu.memory_space<vmem>>, vector<10x16x4xbf16>
    tpu.vector_store %arg9[%c0_21, %c0_22, %c16], %28 {strides = array<i32>} : memref<10x16x36xbf16, #tpu.memory_space<vmem>>, vector<10x16x4xbf16>,
    %c1_i32_23 = arith.constant 1 : i32
    %30 = arith.addi %4, %c1_i32_23 : i32
    %31 = arith.index_cast %30 : i32 to index
    %c2_24 = arith.constant 2 : index
    %c0_25 = arith.constant 0 : index
    %32 = vector.load %arg8[%31, %c2_24, %c0_25] : memref<20x18x4xf32, #tpu.memory_space<vmem>>, vector<10x16x4xf32>
    %33 = arith.truncf %32 : vector<10x16x4xf32> to vector<10x16x4xbf16>
    %c0_26 = arith.constant 0 : index
    %c0_27 = arith.constant 0 : index
    %c20 = arith.constant 20 : index
    %34 = vector.load %arg9[%c0_26, %c0_27, %c20] : memref<10x16x36xbf16, #tpu.memory_space<vmem>>, vector<10x16x4xbf16>
    tpu.vector_store %arg9[%c0_26, %c0_27, %c20], %33 {strides = array<i32>} : memref<10x16x36xbf16, #tpu.memory_space<vmem>>, vector<10x16x4xbf16>,
    %c2_i32 = arith.constant 2 : i32
    %35 = arith.addi %4, %c2_i32 : i32
    %36 = arith.index_cast %35 : i32 to index
    %c0_28 = arith.constant 0 : index
    %c0_29 = arith.constant 0 : index
    %37 = vector.load %arg8[%36, %c0_28, %c0_29] : memref<20x18x4xf32, #tpu.memory_space<vmem>>, vector<10x16x4xf32>
    %38 = arith.truncf %37 : vector<10x16x4xf32> to vector<10x16x4xbf16>
    %c0_30 = arith.constant 0 : index
    %c0_31 = arith.constant 0 : index
    %c24 = arith.constant 24 : index
    %39 = vector.load %arg9[%c0_30, %c0_31, %c24] : memref<10x16x36xbf16, #tpu.memory_space<vmem>>, vector<10x16x4xbf16>
    tpu.vector_store %arg9[%c0_30, %c0_31, %c24], %38 {strides = array<i32>} : memref<10x16x36xbf16, #tpu.memory_space<vmem>>, vector<10x16x4xbf16>,
    %c2_i32_32 = arith.constant 2 : i32
    %40 = arith.addi %4, %c2_i32_32 : i32
    %41 = arith.index_cast %40 : i32 to index
    %c1_33 = arith.constant 1 : index
    %c0_34 = arith.constant 0 : index
    %42 = vector.load %arg8[%41, %c1_33, %c0_34] : memref<20x18x4xf32, #tpu.memory_space<vmem>>, vector<10x16x4xf32>
    %43 = arith.truncf %42 : vector<10x16x4xf32> to vector<10x16x4xbf16>
    %c0_35 = arith.constant 0 : index
    %c0_36 = arith.constant 0 : index
    %c28 = arith.constant 28 : index
    %44 = vector.load %arg9[%c0_35, %c0_36, %c28] : memref<10x16x36xbf16, #tpu.memory_space<vmem>>, vector<10x16x4xbf16>
    tpu.vector_store %arg9[%c0_35, %c0_36, %c28], %43 {strides = array<i32>} : memref<10x16x36xbf16, #tpu.memory_space<vmem>>, vector<10x16x4xbf16>,
    %c2_i32_37 = arith.constant 2 : i32
    %45 = arith.addi %4, %c2_i32_37 : i32
    %46 = arith.index_cast %45 : i32 to index
    %c2_38 = arith.constant 2 : index
    %c0_39 = arith.constant 0 : index
    %47 = vector.load %arg8[%46, %c2_38, %c0_39] : memref<20x18x4xf32, #tpu.memory_space<vmem>>, vector<10x16x4xf32>
    %48 = arith.truncf %47 : vector<10x16x4xf32> to vector<10x16x4xbf16>
    %c0_40 = arith.constant 0 : index
    %c0_41 = arith.constant 0 : index
    %c32 = arith.constant 32 : index
    %49 = vector.load %arg9[%c0_40, %c0_41, %c32] : memref<10x16x36xbf16, #tpu.memory_space<vmem>>, vector<10x16x4xbf16>
    tpu.vector_store %arg9[%c0_40, %c0_41, %c32], %48 {strides = array<i32>} : memref<10x16x36xbf16, #tpu.memory_space<vmem>>, vector<10x16x4xbf16>,
    %c0_42 = arith.constant 0 : index
    %c0_43 = arith.constant 0 : index
    %c0_44 = arith.constant 0 : index
    %50 = vector.load %arg9[%c0_42, %c0_43, %c0_44] : memref<10x16x36xbf16, #tpu.memory_space<vmem>>, vector<10x16x36xbf16>
    %51 = vector.shape_cast %50 : vector<10x16x36xbf16> to vector<160x36xbf16>
    %c0_45 = arith.constant 0 : index
    %c0_46 = arith.constant 0 : index
    %52 = vector.load %arg3[%c0_45, %c0_46] : memref<36x8xbf16, #tpu.memory_space<vmem>>, vector<36x8xbf16>
    %cst = arith.constant dense<0.000000e+00> : vector<160x8xf32>
    %53 = tpu.matmul %51, %52, %cst {dimension_numbers = #tpu.dot_dimension_numbers<[1], [0], [0], [1], [0, 0, 1, 1], [], []>} : vector<160x36xbf16>, vector<36x8xbf16>, vector<160x8xf32> -> vector<160x8xf32>
    %c0_47 = arith.constant 0 : index
    %c0_48 = arith.constant 0 : index
    %54 = vector.load %arg4[%c0_47, %c0_48] : memref<1x8xf32, #tpu.memory_space<vmem>>, vector<1x8xf32>
    %55 = vector.broadcast %54 : vector<1x8xf32> to vector<160x8xf32>
    %56 = arith.addf %53, %55 : vector<160x8xf32>
    %cst_49 = arith.constant 0.000000e+00 : f32
    %57 = vector.broadcast %cst_49 : f32 to vector<160x8xf32>
    %58 = arith.maximumf %56, %57 : vector<160x8xf32>
    %59 = vector.shape_cast %58 : vector<160x8xf32> to vector<10x16x8xf32>
    %c0_50 = arith.constant 0 : index
    %c1_51 = arith.constant 1 : index
    %c0_52 = arith.constant 0 : index
    %60 = vector.load %arg10[%c0_50, %c1_51, %c0_52] : memref<10x18x8xf32, #tpu.memory_space<vmem>>, vector<10x16x8xf32>
    tpu.vector_store %arg10[%c0_50, %c1_51, %c0_52], %59 {strides = array<i32>} : memref<10x18x8xf32, #tpu.memory_space<vmem>>, vector<10x16x8xf32>,
    %c0_i32_53 = arith.constant 0 : i32
    %61 = arith.cmpi eq, %arg1, %c0_i32_53 : i32
    %62 = arith.extui %61 : i1 to i32
    %c0_i32_54 = arith.constant 0 : i32
    %63 = arith.cmpi ne, %62, %c0_i32_54 : i32
    scf.if %63 {
      %cst_120 = arith.constant 0.000000e+00 : f32
      %107 = vector.broadcast %cst_120 : f32 to vector<1x18x8xf32>
      %c0_121 = arith.constant 0 : index
      %c0_122 = arith.constant 0 : index
      %c0_123 = arith.constant 0 : index
      %108 = vector.load %arg10[%c0_121, %c0_122, %c0_123] : memref<10x18x8xf32, #tpu.memory_space<vmem>>, vector<1x18x8xf32>
      tpu.vector_store %arg10[%c0_121, %c0_122, %c0_123], %107 {strides = array<i32>} : memref<10x18x8xf32, #tpu.memory_space<vmem>>, vector<1x18x8xf32>,
    } else {
    }
    %c1_i32_55 = arith.constant 1 : i32
    %64 = arith.cmpi eq, %arg1, %c1_i32_55 : i32
    %65 = arith.extui %64 : i1 to i32
    %c0_i32_56 = arith.constant 0 : i32
    %66 = arith.cmpi ne, %65, %c0_i32_56 : i32
    scf.if %66 {
      %cst_120 = arith.constant 0.000000e+00 : f32
      %107 = vector.broadcast %cst_120 : f32 to vector<1x18x8xf32>
      %c9 = arith.constant 9 : index
      %c0_121 = arith.constant 0 : index
      %c0_122 = arith.constant 0 : index
      %108 = vector.load %arg10[%c9, %c0_121, %c0_122] : memref<10x18x8xf32, #tpu.memory_space<vmem>>, vector<1x18x8xf32>
      tpu.vector_store %arg10[%c9, %c0_121, %c0_122], %107 {strides = array<i32>} : memref<10x18x8xf32, #tpu.memory_space<vmem>>, vector<1x18x8xf32>,
    } else {
    }
    %c0_57 = arith.constant 0 : index
    %c0_58 = arith.constant 0 : index
    %c0_59 = arith.constant 0 : index
    %67 = vector.load %arg10[%c0_57, %c0_58, %c0_59] : memref<10x18x8xf32, #tpu.memory_space<vmem>>, vector<8x16x8xf32>
    %68 = arith.truncf %67 : vector<8x16x8xf32> to vector<8x16x8xbf16>
    %c0_60 = arith.constant 0 : index
    %c0_61 = arith.constant 0 : index
    %c0_62 = arith.constant 0 : index
    %69 = vector.load %arg11[%c0_60, %c0_61, %c0_62] : memref<8x16x72xbf16, #tpu.memory_space<vmem>>, vector<8x16x8xbf16>
    tpu.vector_store %arg11[%c0_60, %c0_61, %c0_62], %68 {strides = array<i32>} : memref<8x16x72xbf16, #tpu.memory_space<vmem>>, vector<8x16x8xbf16>,
    %c0_63 = arith.constant 0 : index
    %c1_64 = arith.constant 1 : index
    %c0_65 = arith.constant 0 : index
    %70 = vector.load %arg10[%c0_63, %c1_64, %c0_65] : memref<10x18x8xf32, #tpu.memory_space<vmem>>, vector<8x16x8xf32>
    %71 = arith.truncf %70 : vector<8x16x8xf32> to vector<8x16x8xbf16>
    %c0_66 = arith.constant 0 : index
    %c0_67 = arith.constant 0 : index
    %c8_68 = arith.constant 8 : index
    %72 = vector.load %arg11[%c0_66, %c0_67, %c8_68] : memref<8x16x72xbf16, #tpu.memory_space<vmem>>, vector<8x16x8xbf16>
    tpu.vector_store %arg11[%c0_66, %c0_67, %c8_68], %71 {strides = array<i32>} : memref<8x16x72xbf16, #tpu.memory_space<vmem>>, vector<8x16x8xbf16>,
    %c0_69 = arith.constant 0 : index
    %c2_70 = arith.constant 2 : index
    %c0_71 = arith.constant 0 : index
    %73 = vector.load %arg10[%c0_69, %c2_70, %c0_71] : memref<10x18x8xf32, #tpu.memory_space<vmem>>, vector<8x16x8xf32>
    %74 = arith.truncf %73 : vector<8x16x8xf32> to vector<8x16x8xbf16>
    %c0_72 = arith.constant 0 : index
    %c0_73 = arith.constant 0 : index
    %c16_74 = arith.constant 16 : index
    %75 = vector.load %arg11[%c0_72, %c0_73, %c16_74] : memref<8x16x72xbf16, #tpu.memory_space<vmem>>, vector<8x16x8xbf16>
    tpu.vector_store %arg11[%c0_72, %c0_73, %c16_74], %74 {strides = array<i32>} : memref<8x16x72xbf16, #tpu.memory_space<vmem>>, vector<8x16x8xbf16>,
    %c1_75 = arith.constant 1 : index
    %c0_76 = arith.constant 0 : index
    %c0_77 = arith.constant 0 : index
    %76 = vector.load %arg10[%c1_75, %c0_76, %c0_77] : memref<10x18x8xf32, #tpu.memory_space<vmem>>, vector<8x16x8xf32>
    %77 = arith.truncf %76 : vector<8x16x8xf32> to vector<8x16x8xbf16>
    %c0_78 = arith.constant 0 : index
    %c0_79 = arith.constant 0 : index
    %c24_80 = arith.constant 24 : index
    %78 = vector.load %arg11[%c0_78, %c0_79, %c24_80] : memref<8x16x72xbf16, #tpu.memory_space<vmem>>, vector<8x16x8xbf16>
    tpu.vector_store %arg11[%c0_78, %c0_79, %c24_80], %77 {strides = array<i32>} : memref<8x16x72xbf16, #tpu.memory_space<vmem>>, vector<8x16x8xbf16>,
    %c1_81 = arith.constant 1 : index
    %c1_82 = arith.constant 1 : index
    %c0_83 = arith.constant 0 : index
    %79 = vector.load %arg10[%c1_81, %c1_82, %c0_83] : memref<10x18x8xf32, #tpu.memory_space<vmem>>, vector<8x16x8xf32>
    %80 = arith.truncf %79 : vector<8x16x8xf32> to vector<8x16x8xbf16>
    %c0_84 = arith.constant 0 : index
    %c0_85 = arith.constant 0 : index
    %c32_86 = arith.constant 32 : index
    %81 = vector.load %arg11[%c0_84, %c0_85, %c32_86] : memref<8x16x72xbf16, #tpu.memory_space<vmem>>, vector<8x16x8xbf16>
    tpu.vector_store %arg11[%c0_84, %c0_85, %c32_86], %80 {strides = array<i32>} : memref<8x16x72xbf16, #tpu.memory_space<vmem>>, vector<8x16x8xbf16>,
    %c1_87 = arith.constant 1 : index
    %c2_88 = arith.constant 2 : index
    %c0_89 = arith.constant 0 : index
    %82 = vector.load %arg10[%c1_87, %c2_88, %c0_89] : memref<10x18x8xf32, #tpu.memory_space<vmem>>, vector<8x16x8xf32>
    %83 = arith.truncf %82 : vector<8x16x8xf32> to vector<8x16x8xbf16>
    %c0_90 = arith.constant 0 : index
    %c0_91 = arith.constant 0 : index
    %c40 = arith.constant 40 : index
    %84 = vector.load %arg11[%c0_90, %c0_91, %c40] : memref<8x16x72xbf16, #tpu.memory_space<vmem>>, vector<8x16x8xbf16>
    tpu.vector_store %arg11[%c0_90, %c0_91, %c40], %83 {strides = array<i32>} : memref<8x16x72xbf16, #tpu.memory_space<vmem>>, vector<8x16x8xbf16>,
    %c2_92 = arith.constant 2 : index
    %c0_93 = arith.constant 0 : index
    %c0_94 = arith.constant 0 : index
    %85 = vector.load %arg10[%c2_92, %c0_93, %c0_94] : memref<10x18x8xf32, #tpu.memory_space<vmem>>, vector<8x16x8xf32>
    %86 = arith.truncf %85 : vector<8x16x8xf32> to vector<8x16x8xbf16>
    %c0_95 = arith.constant 0 : index
    %c0_96 = arith.constant 0 : index
    %c48 = arith.constant 48 : index
    %87 = vector.load %arg11[%c0_95, %c0_96, %c48] : memref<8x16x72xbf16, #tpu.memory_space<vmem>>, vector<8x16x8xbf16>
    tpu.vector_store %arg11[%c0_95, %c0_96, %c48], %86 {strides = array<i32>} : memref<8x16x72xbf16, #tpu.memory_space<vmem>>, vector<8x16x8xbf16>,
    %c2_97 = arith.constant 2 : index
    %c1_98 = arith.constant 1 : index
    %c0_99 = arith.constant 0 : index
    %88 = vector.load %arg10[%c2_97, %c1_98, %c0_99] : memref<10x18x8xf32, #tpu.memory_space<vmem>>, vector<8x16x8xf32>
    %89 = arith.truncf %88 : vector<8x16x8xf32> to vector<8x16x8xbf16>
    %c0_100 = arith.constant 0 : index
    %c0_101 = arith.constant 0 : index
    %c56 = arith.constant 56 : index
    %90 = vector.load %arg11[%c0_100, %c0_101, %c56] : memref<8x16x72xbf16, #tpu.memory_space<vmem>>, vector<8x16x8xbf16>
    tpu.vector_store %arg11[%c0_100, %c0_101, %c56], %89 {strides = array<i32>} : memref<8x16x72xbf16, #tpu.memory_space<vmem>>, vector<8x16x8xbf16>,
    %c2_102 = arith.constant 2 : index
    %c2_103 = arith.constant 2 : index
    %c0_104 = arith.constant 0 : index
    %91 = vector.load %arg10[%c2_102, %c2_103, %c0_104] : memref<10x18x8xf32, #tpu.memory_space<vmem>>, vector<8x16x8xf32>
    %92 = arith.truncf %91 : vector<8x16x8xf32> to vector<8x16x8xbf16>
    %c0_105 = arith.constant 0 : index
    %c0_106 = arith.constant 0 : index
    %c64 = arith.constant 64 : index
    %93 = vector.load %arg11[%c0_105, %c0_106, %c64] : memref<8x16x72xbf16, #tpu.memory_space<vmem>>, vector<8x16x8xbf16>
    tpu.vector_store %arg11[%c0_105, %c0_106, %c64], %92 {strides = array<i32>} : memref<8x16x72xbf16, #tpu.memory_space<vmem>>, vector<8x16x8xbf16>,
    %c0_107 = arith.constant 0 : index
    %c0_108 = arith.constant 0 : index
    %c0_109 = arith.constant 0 : index
    %94 = vector.load %arg11[%c0_107, %c0_108, %c0_109] : memref<8x16x72xbf16, #tpu.memory_space<vmem>>, vector<8x16x72xbf16>
    %95 = vector.shape_cast %94 : vector<8x16x72xbf16> to vector<128x72xbf16>
    %c0_110 = arith.constant 0 : index
    %c0_111 = arith.constant 0 : index
    %96 = vector.load %arg5[%c0_110, %c0_111] : memref<72x8xbf16, #tpu.memory_space<vmem>>, vector<72x8xbf16>
    %cst_112 = arith.constant dense<0.000000e+00> : vector<128x8xf32>
    %97 = tpu.matmul %95, %96, %cst_112 {dimension_numbers = #tpu.dot_dimension_numbers<[1], [0], [0], [1], [0, 0, 1, 1], [], []>} : vector<128x72xbf16>, vector<72x8xbf16>, vector<128x8xf32> -> vector<128x8xf32>
    %c0_113 = arith.constant 0 : index
    %c0_114 = arith.constant 0 : index
    %98 = vector.load %arg6[%c0_113, %c0_114] : memref<1x8xf32, #tpu.memory_space<vmem>>, vector<1x8xf32>
    %99 = vector.broadcast %98 : vector<1x8xf32> to vector<128x8xf32>
    %100 = arith.addf %97, %99 : vector<128x8xf32>
    %cst_115 = arith.constant 0.000000e+00 : f32
    %101 = vector.broadcast %cst_115 : f32 to vector<128x8xf32>
    %102 = arith.maximumf %100, %101 : vector<128x8xf32>
    %103 = vector.shape_cast %102 : vector<128x8xf32> to vector<8x16x8xf32>
    %c0_116 = arith.constant 0 : index
    %c0_117 = arith.constant 0 : index
    %c0_118 = arith.constant 0 : index
    %c0_119 = arith.constant 0 : index
    %104 = vector.load %arg7[%c0_116, %c0_117, %c0_118, %c0_119] : memref<1x8x16x8xf32, #tpu.memory_space<vmem>>, vector<1x8x16x8xf32>
    %105 = vector.shape_cast %104 : vector<1x8x16x8xf32> to vector<8x16x8xf32>
    %106 = vector.shape_cast %103 : vector<8x16x8xf32> to vector<1x8x16x8xf32>
    tpu.vector_store %arg7[%c0_116, %c0_117, %c0_118, %c0_119], %106 {strides = array<i32>} : memref<1x8x16x8xf32, #tpu.memory_space<vmem>>, vector<1x8x16x8xf32>,
    return
  }
  func.func @transform_0(%arg0: i32, %arg1: i32) -> (i32, i32, i32, i32) {
    %c0_i32 = arith.constant 0 : i32
    %c0_i32_0 = arith.constant 0 : i32
    %c0_i32_1 = arith.constant 0 : i32
    %c0_i32_2 = arith.constant 0 : i32
    return %arg0, %c0_i32, %c0_i32_0, %c0_i32_1 : i32, i32, i32, i32
  }
  func.func @transform_1(%arg0: i32, %arg1: i32) -> (i32, i32) {
    %c0_i32 = arith.constant 0 : i32
    %c0_i32_0 = arith.constant 0 : i32
    %c0_i32_1 = arith.constant 0 : i32
    return %c0_i32, %c0_i32_0 : i32, i32
  }
  func.func @transform_2(%arg0: i32, %arg1: i32) -> (i32, i32) {
    %c0_i32 = arith.constant 0 : i32
    %c0_i32_0 = arith.constant 0 : i32
    %c0_i32_1 = arith.constant 0 : i32
    return %c0_i32, %c0_i32_0 : i32, i32
  }
  func.func @transform_3(%arg0: i32, %arg1: i32) -> (i32, i32) {
    %c0_i32 = arith.constant 0 : i32
    %c0_i32_0 = arith.constant 0 : i32
    %c0_i32_1 = arith.constant 0 : i32
    return %c0_i32, %c0_i32_0 : i32, i32
  }
  func.func @transform_4(%arg0: i32, %arg1: i32) -> (i32, i32) {
    %c0_i32 = arith.constant 0 : i32
    %c0_i32_0 = arith.constant 0 : i32
    %c0_i32_1 = arith.constant 0 : i32
    return %c0_i32, %c0_i32_0 : i32, i32
  }
  func.func @transform_5(%arg0: i32, %arg1: i32) -> (i32, i32, i32, i32) {
    %c0_i32 = arith.constant 0 : i32
    %c0_i32_0 = arith.constant 0 : i32
    %c0_i32_1 = arith.constant 0 : i32
    return %arg0, %arg1, %c0_i32, %c0_i32_0 : i32, i32, i32, i32
  }
}

</mosaic_0001>

<bundles_post_ra>
// kernel: tpu_custom_call.1
= control target key start
LH: loop header
LB: loop body
LE: loop exit
PB: predicated region body
PF: predicated region fallthrough
CT: control target
= control target key end

     0   :  { %s4242_s0 = inlined_call_operand.hbm [shape: f32[6,16,16,4], index: 0, kind: input, shape index: {}]   ;;  %s4243_s1 = inlined_call_operand.hbm [shape: bf16[36,8], index: 1, kind: input, shape index: {}]   ;;  %s4244_s2 = inlined_call_operand.hbm [shape: f32[1,8], index: 2, kind: input, shape index: {}]   ;;  %s4245_s3 = inlined_call_operand.hbm [shape: bf16[72,8], index: 3, kind: input, shape index: {}]   ;;  %s4246_s4 = inlined_call_operand.hbm [shape: f32[1,8], index: 4, kind: input, shape index: {}]   ;;  %s4247_s5 = inlined_call_operand.hbm [shape: f32[6,16,16,8], index: 5, kind: output, shape index: {}]  }
   0x1   :  { %4260 = sst [smem:[#allocation25_spill]] %s4243_s1 }
   0x2   :  { %4261 = sst [smem:[#allocation26_spill]] %s4244_s2 }
   0x3   :  { %4262 = sst [smem:[#allocation27_spill]] %s4247_s5 }
   0x4   :  { %10 = vsyncpa [#allocation7], 0 }
   0x5   :  { %12 = vsyncpa [#allocation7 + $0x1], 0 }
   0x6   :  { %13 = vsyncpa [#allocation10], 0 }
   0x7   :  { %14 = vsyncpa [#allocation13], 0 }
   0x8   :  { %15 = vsyncpa [#allocation8], 0 }
   0x9   :  { %17 = vsyncpa [#allocation8 + $0x1], 0  ;;  %s3096_s18 = smov 0   ;;  %s3098_s19 = smov 0  }
   0xa   :  { %s3100_s20 = smov 0   ;;  %s3102_s21 = smov 0  }
   0xb   :  { %s3104_s22 = smov 0   ;;  %s3106_s23 = smov 0  }
   0xc   :  { %s3108_s24 = smov 0   ;;  %s3110_s25 = smov 0  }
   0xd   :  { %s3112_s26 = smov 0   ;;  %s3114_s27 = smov 0  }
   0xe   :  { %s3116_s28 = smov 0  }
   0xf LB: > { %4263 = sst [smem:[#allocation20_spill]] %s2998_s18  ;;  %s2331_s29 = sadd.s32 4294967295, %s3038_s28   ;;  %s3038_s28 = sphi %s3116_s28, %s23_s28   ;;  %s3034_s27 = sphi %s3114_s27, %s4302_s27   ;;  %s3030_s26 = sphi %s3112_s26, %s4301_s26   ;;  %s3026_s25 = sphi %s3110_s25, %s4300_s25   ;;  %s3022_s24 = sphi %s3108_s24, %s4299_s24   ;;  %s3018_s23 = sphi %s3106_s23, %s4298_s23   ;;  %s3014_s22 = sphi %s3104_s22, %s4297_s22   ;;  %s3010_s21 = sphi %s3102_s21, %s4296_s21   ;;  %s3006_s20 = sphi %s3100_s20, %s4295_s20   ;;  %s3002_s19 = sphi %s3098_s19, %s4294_s19   ;;  %s2998_s18 = sphi %s3096_s18, %s4293_s18  }
  0x10   : > { %4264 = sst [smem:[#allocation21_spill]] %s3022_s24  ;;  %s2332_s30 = sadd.s32 4294967294, %s3038_s28  }
  0x11   : > { %4265 = sst [smem:[#allocation22_spill]] %s3026_s25  ;;  %p55_p0 = scmp.ne.s32.totalorder %s3014_s22, %s3010_s21 }
  0x12   : > { %p3152_p1 = scmp.eq.s32.totalorder %s2331_s29, 0  ;;  %p164_p2 = scmp.ne.s32.totalorder %s3006_s20, %s3002_s19 }
  0x13   : > { %p165_p3 = scmp.eq.s32.totalorder %s2331_s29, 11  ;;  %p170_p5 = scmp.ne.s32.totalorder %s3002_s19, %s2998_s18 }
  0x14   : > { %s4266_s6 = scalar_select %p3152_p1, 1, 0 }
  0x15   : > { %p3160_p4 = por %p3152_p1, %p55_p0  ;;  %p3166_p6 = por %p165_p3, %p164_p2 }
  0x16   : > { %p171_p7 = scmp.eq.s32.totalorder %s2332_s30, 11  ;;  %p2333_p8 = scmp.ge.s32.totalorder %s3038_s28, 1 }
  0x17   : > { %s4267_s7 = scalar_select %p3160_p4, 1, 0 }
  0x18   : > { %s4268_s8 = scalar_select %p3166_p6, 1, 0 }
  0x19   : > { %p178_p9 = scmp.lt.s32.totalorder %s3038_s28, 13  ;;  %p3172_p10 = por %p171_p7, %p170_p5 }
  0x1a   : > { %4269 = sst [smem:[#allocation23_spill]] %s4268_s8  ;;  %s3040_s11 = smov [#allocation9]  }
  0x1b   : > { %s4270_s9 = scalar_select %p3172_p10, 1, 0 }
  0x1c   : > { %p3176_p11 = pnand %p2333_p8, %p178_p9  ;;  %s190_s12 = sshll.u32 %s3040_s11, 4  ;;  %s191_s12 = int_to_ptr.vmem [resolvable:$true] %s190_s12 }
  0x1d   : > { %4271 = sst [smem:[#allocation24_spill]] %s4270_s9  ;;  %s3041_s14 = smov [#allocation12]  }
  0x1e   : > { %s4272_s10 = scalar_select %p3176_p11, 1, 0 }
  0x1f   : > { %p2615_p12 = pneg %p3176_p11  ;;  %s214_s15 = sshll.u32 %s3041_s14, 4  ;;  %s3188_s15 = int_to_ptr.vmem [resolvable:$true] %s214_s15 }
  0x20   : > { %s4274_s1 = sld [smem:[#allocation25_spill]] }
  0x21   : > { %p3184_p13 = pnand %p2615_p12, %p3152_p1 }
  0x23   : > { %p3198_p2 = pneg %p3184_p13 }
  0x26   : > { %s2766_s21 = scalar_lea.hbm %s4274_s1, 320 }
  0x27   : > { %p2767_p0 = scmp.ne.s32.totalorder %s4274_s1, %s2766_s21  ;;  %p2773_p7 = scmp.lt.u32.totalorder %s2766_s21, %s4274_s1 }
  0x29   : > { %p2769_p3 = pnand %p3198_p2, %p2767_p0 }
  0x2b   : > { %p2770_p5 = pneg %p2769_p3 }
  0x2d   : > { %p2775_p8 = pnand %p2773_p7, %p2770_p5 }
  0x2f   : > { %2778 = shalt.err (!%p2775_p8)
}
  0x30   : > { %s2779_s16 = scalar_lea.vmem %s191_s12, 320  ;;  %p2787_p6 = scmp.lt.s32.totalorder %s191_s12, %s191_s12 }
  0x31   : > { %p2780_p9 = scmp.ne.s32.totalorder %s191_s12, %s2779_s16  ;;  %p2788_p1 = scmp.lt.s32.totalorder %s2779_s16, %s2779_s16 }
  0x33   : > { %p2782_p12 = pnand %p2780_p9, %p3198_p2  ;;  %p2789_p4 = por %p2788_p1, %p2787_p6 }
  0x35   : > { %p2783_p10 = pneg %p2782_p12 }
  0x37   : > { %p2790_p11 = pnand %p2789_p4, %p2783_p10 }
  0x39   : > { %2793 = shalt.err (!%p2790_p11)
}
  0x3a   : > { %s3042_s17 = smov 64   ;;  %s3043_s29 = smov 4  }
  0x3b   : > { %2618 = dma.hbm_to_vmem [thread:$0]  (!%p3184_p13), %s4274_s1, 320, %s191_s12, [#allocation10], %s3042_s17, %s3042_s17, %s3043_s29  }
  0x3c   : > { %s2794_s18 = scalar_lea.hbm %s4245_s3, 576 }
  0x3d   : > { %p2795_p0 = scmp.ne.s32.totalorder %s4245_s3, %s2794_s18  ;;  %p2801_p6 = scmp.lt.u32.totalorder %s2794_s18, %s4245_s3 }
  0x3f   : > { %p2797_p1 = pnand %p2795_p0, %p3198_p2 }
  0x41   : > { %p2798_p4 = pneg %p2797_p1 }
  0x43   : > { %p2803_p10 = pnand %p2801_p6, %p2798_p4 }
  0x45   : > { %2806 = shalt.err (!%p2803_p10)
}
  0x46   : > { %s2807_s12 = scalar_lea.vmem %s3188_s15, 576  ;;  %p2815_p7 = scmp.lt.s32.totalorder %s3188_s15, %s3188_s15 }
  0x47   : > { %p2808_p11 = scmp.ne.s32.totalorder %s3188_s15, %s2807_s12  ;;  %p2816_p8 = scmp.lt.s32.totalorder %s2807_s12, %s2807_s12 }
  0x49   : > { %p2810_p3 = pnand %p2808_p11, %p3198_p2  ;;  %p2817_p9 = por %p2816_p8, %p2815_p7 }
  0x4b   : > { %p2811_p5 = pneg %p2810_p3 }
  0x4d   : > { %p2818_p12 = pnand %p2817_p9, %p2811_p5 }
  0x4f   : > { %2821 = shalt.err (!%p2818_p12)
}
  0x50   : > { %2624 = dma.hbm_to_vmem [thread:$0]  (!%p3184_p13), %s4245_s3, 576, %s3188_s15, [#allocation13], %s3042_s17, %s3042_s17, %s3043_s29  }
  0x51   : > { %s3044_s25 = smov [#allocation11]   ;;  %s3045_s9 = smov [#allocation14]  }
  0x52   : > { %s204_s8 = sshll.u32 %s3044_s25, 4  ;;  %s228_s21 = sshll.u32 %s3045_s9, 4  ;;  %s205_s8 = int_to_ptr.vmem [resolvable:$true] %s204_s8  ;;  %s229_s21 = int_to_ptr.vmem [resolvable:$true] %s228_s21 }
  0x53   : > { %s4276_s2 = sld [smem:[#allocation26_spill]] }
  0x59   : > { %s2822_s16 = scalar_lea.hbm %s4276_s2, 16 }
  0x5a   : > { %p2823_p0 = scmp.ne.s32.totalorder %s4276_s2, %s2822_s16  ;;  %p2829_p6 = scmp.lt.u32.totalorder %s2822_s16, %s4276_s2 }
  0x5c   : > { %p2825_p1 = pnand %p2823_p0, %p3198_p2 }
  0x5e   : > { %p2826_p4 = pneg %p2825_p1 }
  0x60   : > { %p2831_p10 = pnand %p2829_p6, %p2826_p4 }
  0x62   : > { %2834 = shalt.err (!%p2831_p10)
}
  0x63   : > { %s2835_s15 = scalar_lea.vmem %s205_s8, 16  ;;  %s2842_s17 = scalar_lea.vmem %s205_s8, 32 }
  0x64   : > { %p2836_p11 = scmp.ne.s32.totalorder %s205_s8, %s2835_s15  ;;  %p2843_p7 = scmp.lt.s32.totalorder %s205_s8, %s205_s8 }
  0x65   : > { %p2844_p8 = scmp.lt.s32.totalorder %s2842_s17, %s2835_s15 }
  0x66   : > { %p2838_p3 = pnand %p2836_p11, %p3198_p2 }
  0x67   : > { %p2845_p9 = por %p2844_p8, %p2843_p7 }
  0x68   : > { %p2839_p5 = pneg %p2838_p3 }
  0x6a   : > { %p2846_p12 = pnand %p2845_p9, %p2839_p5 }
  0x6c   : > { %2849 = shalt.err (!%p2846_p12)
}
  0x6d   : > { %2621 = dma.hbm_to_vmem [thread:$0]  (!%p3184_p13), %s4276_s2, 16, %s205_s8, [#allocation10]  }
  0x6e   : > { %s2850_s25 = scalar_lea.hbm %s4246_s4, 16 }
  0x6f   : > { %p2851_p0 = scmp.ne.s32.totalorder %s4246_s4, %s2850_s25  ;;  %p2857_p6 = scmp.lt.u32.totalorder %s2850_s25, %s4246_s4 }
  0x71   : > { %p2853_p1 = pnand %p2851_p0, %p3198_p2 }
  0x73   : > { %p2854_p4 = pneg %p2853_p1 }
  0x75   : > { %p2859_p10 = pnand %p2857_p6, %p2854_p4 }
  0x77   : > { %2862 = shalt.err (!%p2859_p10)
}
  0x78   : > { %s2863_s12 = scalar_lea.vmem %s229_s21, 16  ;;  %s2870_s8 = scalar_lea.vmem %s229_s21, 32 }
  0x79   : > { %p2864_p11 = scmp.ne.s32.totalorder %s229_s21, %s2863_s12  ;;  %p2871_p7 = scmp.lt.s32.totalorder %s229_s21, %s229_s21 }
  0x7a   : > { %p2872_p8 = scmp.lt.s32.totalorder %s2870_s8, %s2863_s12 }
  0x7b   : > { %p2866_p3 = pnand %p2864_p11, %p3198_p2 }
  0x7c   : > { %p2873_p9 = por %p2872_p8, %p2871_p7 }
  0x7d   : > { %p2867_p5 = pneg %p2866_p3 }
  0x7f   : > { %p2874_p12 = pnand %p2873_p9, %p2867_p5 }
  0x81   : > { %2877 = shalt.err (!%p2874_p12)
}
  0x82   : > { %2627 = dma.hbm_to_vmem [thread:$0]  (!%p3184_p13), %s4246_s4, 16, %s229_s21, [#allocation13]  }
  0x83   : > { %s32_s11 = sadd.s32 1, %s3030_s26  ;;  %s35_s13 = sadd.s32 1, %s3034_s27 }
  0x84   : > { %p33_p2 = scmp.ge.s32.totalorder %s32_s11, 2  ;;  %s42_s17 = sadd.s32 1, %s3018_s23 }
  0x85   : > { %p49_p0 = scmp.ne.s32.totalorder %s3018_s23, %s3014_s22  ;;  %p50_p1 = scmp.eq.s32.totalorder %s3038_s28, 0 }
  0x86   : > { %s4304_s11 = smov (%p33_p2, %s32_s11), 0  ;;  %s4306_s13 = smov (!%p33_p2, %s35_s13), %s3034_s27 }
  0x87   : > { %s150_s1 = ssub.s32 %s3030_s26, %s4304_s11  ;;  %p37_p4 = scmp.ge.s32.totalorder %s4306_s13, 6 }
  0x88   : > { %s154_s29 = sadd.s32 1, %s3006_s20  ;;  %p3285_p6 = por %p50_p1, %p49_p0 }
  0x89   : > { %p2640_p13 = scmp.lt.s32.totalorder %s3038_s28, 12  ;;  %s4308_s13 = smov (%p37_p4, %s4306_s13), 0 }
  0x8a   : > { %s239_s24 = sand.u32 1, %s3018_s23   ;;  %s2513_s18 = sshll.u32 %s3034_s27, 12 }
  0x8b   : > { %s39_s25 = ssub.s32 %s3034_s27, %s4308_s13  ;;  %s2339_s30 = sshll.u32 %s239_s24, 8 }
  0x8c   : > { %p40_p10 = scmp.eq.s32.totalorder %s39_s25, 0  ;;  %s151_s9 = sor.u32 %s150_s1, %s39_s25 }
  0x8d   : > { %p152_p11 = scmp.eq.s32.totalorder %s151_s9, 0  ;;  %s3305_s5 = scalar_lea.hbm %s4242_s0, %s2513_s18 }
  0x8e   : > { %s3297_s14 = scalar_select %p40_p10, %s3018_s23, %s42_s17  }
  0x8f   : > { %s3300_s16 = scalar_select %p152_p11, %s3006_s20, %s154_s29  }
  0x90   : > { %s243_s15 = scalar_lea.vmem [#allocation6], %s2339_s30  ;;  %p3311_p3 = pnand %p2640_p13, %p3285_p6 }
  0x91   : > { %s250_s2 = sshll.u32 %s243_s15, 4  ;;  %s3317_s17 = scalar_lea.sflag [#allocation7], %s239_s24  ;;  %s3315_s2 = int_to_ptr.vmem [resolvable:$true] %s250_s2 }
  0x92   : > { %s2878_s29 = scalar_lea.hbm %s3305_s5, 4096  ;;  %p2880_p7 = pneg %p3311_p3 }
  0x93   : > { %p2879_p5 = scmp.ne.s32.totalorder %s3305_s5, %s2878_s29  ;;  %s2883_s25 = scalar_lea.hbm %s4242_s0, 24576 }
  0x94   : > { %p2884_p12 = scmp.lt.u32.totalorder %s3305_s5, %s4242_s0  ;;  %p2885_p2 = scmp.lt.u32.totalorder %s2883_s25, %s2878_s29 }
  0x95   : > { %p2881_p8 = pnand %p2880_p7, %p2879_p5  ;;  %p2887_p1 = scmp.lt.u32.totalorder %s2878_s29, %s3305_s5 }
  0x96   : > { %p2886_p0 = por %p2885_p2, %p2884_p12 }
  0x97   : > { %p2882_p9 = pneg %p2881_p8 }
  0x98   : > { %p2888_p4 = por %p2887_p1, %p2886_p0 }
  0x9a   : > { %p2889_p6 = pnand %p2888_p4, %p2882_p9 }
  0x9c   : > { %2892 = shalt.err (!%p2889_p6)
}
  0x9d   : > { %s2893_s24 = scalar_lea.vmem %s3315_s2, 4096  ;;  %s3046_s12 = smov [#allocation6]  }
  0x9e   : > { %p2894_p13 = scmp.ne.s32.totalorder %s3315_s2, %s2893_s24  ;;  %s2898_s8 = sshll.u32 %s3046_s12, 4  ;;  %s2899_s8 = int_to_ptr.vmem [resolvable:$false] %s2898_s8 }
  0x9f   : > { %s2900_s15 = scalar_lea.vmem %s2899_s8, 8192  ;;  %p2901_p5 = scmp.lt.s32.totalorder %s3315_s2, %s2899_s8 }
  0xa0   : > { %p2896_p10 = pnand %p2894_p13, %p2880_p7  ;;  %p2902_p8 = scmp.lt.s32.totalorder %s2900_s15, %s2893_s24 }
  0xa2   : > { %p2897_p11 = pneg %p2896_p10  ;;  %p2903_p12 = por %p2902_p8, %p2901_p5 }
  0xa4   : > { %p2904_p2 = pnand %p2903_p12, %p2897_p11 }
  0xa6   : > { %2907 = shalt.err (!%p2904_p2)
}
  0xa7   : > { %s3047_s29 = smov 128   ;;  %s3048_s21 = smov 8  }
  0xa8   : > { %2631 = dma.hbm_to_vmem [thread:$0]  (!%p3311_p3), %s3305_s5, 4096, %s3315_s2, %s3317_s17, %s3047_s29, %s3047_s29, %s3048_s21  }
  0xa9   : > { %p4279_p7 = scmp.ne.s32.totalorder %s4272_s10, 0 }
  0xaa   : > { %s264_s18 = sand.u32 (!%p4279_p7), 1, %s3014_s22   ;;  %p4280_p9 = scmp.ne.s32.totalorder (!%p4279_p7), %s4267_s7, 0 }
  0xab   : > { %262 = sbr.rel (%p4279_p7) target bundleno = 1265 (0x4f1), region = 40  ;;  %s2343_s25 = sshll.u32 (!%p4279_p7), %s264_s18, 8 }
  0xac   : > { %s265_s9 = scalar_lea.sflag (!%p4279_p7), [#allocation7], %s264_s18  ;;  %s3348_s30 = scalar_lea.vmem (!%p4279_p7), [#allocation6], %s2343_s25 }
  0xb2   : > { %2981 = dma.done.wait (%p4280_p9), %s265_s9, 4096  }
  0xb3   : > { %2983 = vsyncadd (%p4280_p9), %s265_s9, 4294963200  ;;  %p4281_p0 = scmp.ne.s32.totalorder %s4266_s6, 0 }
  0xb5   : > { %2985 = dma.done.wait (%p4281_p0), [#allocation10], 336  }
  0xb6   : > { %2987 = vsyncadd (%p4281_p0), [#allocation10], 4294966960 }
  0xb7   : > { %2989 = dma.done.wait (%p4281_p0), [#allocation13], 592  }
  0xb8   : > { %2991 = vsyncadd (%p4281_p0), [#allocation13], 4294966704  ;;  %s308_s2 = sand.u32 1, %s3002_s19   ;;  %s4282_s7 = sld [smem:[#allocation21_spill]] }
  0xb9   : > { %s2348_s10 = sshll.u32 %s308_s2, 7 }
  0xba   : > { %s3365_s5 = scalar_lea.vmem [#allocation15], %s2348_s10 }
  0xbe   : > { %p2349_p3 = scmp.ne.s32.totalorder %s4282_s7, 0 }
  0xbf   : > { %vm317_vm0 = vcmask (!%p2349_p3), 31744   ;;  %vm320_vm1 = vcmask (!%p2349_p3), 25600   ;;  %vm379_vm2 = vcmask (!%p2349_p3), 64512   ;;  %v3371_v0 = vld [vmem:[%s3348_s30] sm:$0xff] (!%p2349_p3)  ;;  %v3374_v1 = vld [vmem:[%s3348_s30 + $0x8] sm:$0xff] (!%p2349_p3)  ;;  %v3049_v2 = vmov (!%p2349_p3), 0.0  }
  0xc0   : > { %316 = sbr.rel (%p2349_p3) target bundleno = 253 (0xfd), region = 64  ;;  %325 = vst.msk [vmem:[#allocation2 + $0x30] sm:$0xff] (!%p2349_p3), %vm317_vm0, %v3049_v2  ;;  %318 = vst.msk [vmem:[#allocation2] sm:$0xff] (!%p2349_p3), %vm317_vm0, %v3049_v2  ;;  %vm382_vm3 = vcmask (!%p2349_p3), 58368   ;;  %v413_v3 = vld [vmem:[%s3348_s30 + $0x10] sm:$0xff] (!%p2349_p3)  ;;  %v414_v4 = vld [vmem:[%s3348_s30 + $0x18] sm:$0xff] (!%p2349_p3) }
  0xc1   : > { %319 = vst.msk [vmem:[#allocation2 + $0x8] sm:$0xff] (!%p2349_p3), %vm317_vm0, %v3049_v2  ;;  %322 = vst.msk [vmem:[#allocation2 + $0x18] sm:$0xff] (!%p2349_p3), %vm317_vm0, %v3049_v2  ;;  %v415_v5 = vld [vmem:[%s3348_s30 + $0x20] sm:$0xff] (!%p2349_p3)  ;;  %v416_v6 = vld [vmem:[%s3348_s30 + $0x28] sm:$0xff] (!%p2349_p3) }
  0xc2   : > { %323 = vst.msk [vmem:[#allocation2 + $0x20] sm:$0xff] (!%p2349_p3), %vm317_vm0, %v3049_v2  ;;  %326 = vst.msk [vmem:[#allocation2 + $0x38] sm:$0xff] (!%p2349_p3), %vm317_vm0, %v3049_v2  ;;  %v417_v7 = vld [vmem:[%s3348_s30 + $0x30] sm:$0xff] (!%p2349_p3)  ;;  %v418_v8 = vld [vmem:[%s3348_s30 + $0x38] sm:$0xff] (!%p2349_p3) }
  0xc3   : > { %328 = vst.msk [vmem:[#allocation2 + $0x48] sm:$0xff] (!%p2349_p3), %vm317_vm0, %v3049_v2  ;;  %329 = vst.msk [vmem:[#allocation2 + $0x50] sm:$0xff] (!%p2349_p3), %vm317_vm0, %v3049_v2  ;;  %v419_v9 = vld [vmem:[%s3348_s30 + $0x40] sm:$0xff] (!%p2349_p3)  ;;  %v420_v10 = vld [vmem:[%s3348_s30 + $0x48] sm:$0xff] (!%p2349_p3) }
  0xc4   : > { %331 = vst.msk [vmem:[#allocation2 + $0x60] sm:$0xff] (!%p2349_p3), %vm317_vm0, %v3049_v2  ;;  %332 = vst.msk [vmem:[#allocation2 + $0x68] sm:$0xff] (!%p2349_p3), %vm317_vm0, %v3049_v2  ;;  %v421_v11 = vld [vmem:[%s3348_s30 + $0x50] sm:$0xff] (!%p2349_p3)  ;;  %v422_v12 = vld [vmem:[%s3348_s30 + $0x58] sm:$0xff] (!%p2349_p3) }
  0xc5   : > { %334 = vst.msk [vmem:[#allocation2 + $0x78] sm:$0xff] (!%p2349_p3), %vm317_vm0, %v3049_v2  ;;  %335 = vst.msk [vmem:[#allocation2 + $0x80] sm:$0xff] (!%p2349_p3), %vm317_vm0, %v3049_v2  ;;  %v423_v13 = vld [vmem:[%s3348_s30 + $0x60] sm:$0xff] (!%p2349_p3)  ;;  %v424_v14 = vld [vmem:[%s3348_s30 + $0x68] sm:$0xff] (!%p2349_p3) }
  0xc6   : > { %337 = vst.msk [vmem:[#allocation2 + $0x90] sm:$0xff] (!%p2349_p3), %vm317_vm0, %v3049_v2  ;;  %338 = vst.msk [vmem:[#allocation2 + $0x98] sm:$0xff] (!%p2349_p3), %vm317_vm0, %v3049_v2  ;;  %v425_v15 = vld [vmem:[%s3348_s30 + $0x70] sm:$0xff] (!%p2349_p3)  ;;  %v426_v16 = vld [vmem:[%s3348_s30 + $0x78] sm:$0xff] (!%p2349_p3) }
  0xc7   : > { %340 = vst.msk [vmem:[#allocation2 + $0xa8] sm:$0xff] %vm317_vm0, %v3049_v2  ;;  %341 = vst.msk [vmem:[#allocation2 + $0xb0] sm:$0xff] %vm317_vm0, %v3049_v2  ;;  %v427_v17 = vld [vmem:[%s3348_s30 + $0x80] sm:$0xff]  ;;  %v428_v18 = vld [vmem:[%s3348_s30 + $0x88] sm:$0xff] }
  0xc8   : > { %343 = vst.msk [vmem:[#allocation2 + $0xc0] sm:$0xff] %vm317_vm0, %v3049_v2  ;;  %344 = vst.msk [vmem:[#allocation2 + $0xc8] sm:$0xff] %vm317_vm0, %v3049_v2  ;;  %v429_v19 = vld [vmem:[%s3348_s30 + $0x90] sm:$0xff]  ;;  %v430_v20 = vld [vmem:[%s3348_s30 + $0x98] sm:$0xff] }
  0xc9   : > { %346 = vst.msk [vmem:[#allocation2 + $0xd8] sm:$0xff] %vm317_vm0, %v3049_v2  ;;  %347 = vst.msk [vmem:[#allocation2 + $0xe0] sm:$0xff] %vm317_vm0, %v3049_v2  ;;  %v431_v21 = vld [vmem:[%s3348_s30 + $0xa0] sm:$0xff]  ;;  %v432_v22 = vld [vmem:[%s3348_s30 + $0xa8] sm:$0xff] }
  0xca   : > { %349 = vst.msk [vmem:[#allocation2 + $0xf0] sm:$0xff] %vm317_vm0, %v3049_v2  ;;  %350 = vst.msk [vmem:[#allocation2 + $0xf8] sm:$0xff] %vm317_vm0, %v3049_v2  ;;  %v433_v23 = vld [vmem:[%s3348_s30 + $0xb0] sm:$0xff]  ;;  %v434_v24 = vld [vmem:[%s3348_s30 + $0xb8] sm:$0xff] }
  0xcb   : > { %352 = vst.msk [vmem:[#allocation2 + $0x108] sm:$0xff] %vm317_vm0, %v3049_v2  ;;  %353 = vst.msk [vmem:[#allocation2 + $0x110] sm:$0xff] %vm317_vm0, %v3049_v2  ;;  %v435_v25 = vld [vmem:[%s3348_s30 + $0xc0] sm:$0xff]  ;;  %v436_v26 = vld [vmem:[%s3348_s30 + $0xc8] sm:$0xff] }
  0xcc   : > { %355 = vst.msk [vmem:[#allocation2 + $0x120] sm:$0xff] %vm317_vm0, %v3049_v2  ;;  %356 = vst.msk [vmem:[#allocation2 + $0x128] sm:$0xff] %vm317_vm0, %v3049_v2  ;;  %v437_v27 = vld [vmem:[%s3348_s30 + $0xd0] sm:$0xff]  ;;  %v438_v28 = vld [vmem:[%s3348_s30 + $0xd8] sm:$0xff] }
  0xcd   : > { %358 = vst.msk [vmem:[#allocation2 + $0x138] sm:$0xff] %vm317_vm0, %v3049_v2  ;;  %359 = vst.msk [vmem:[#allocation2 + $0x140] sm:$0xff] %vm317_vm0, %v3049_v2  ;;  %v439_v29 = vld [vmem:[%s3348_s30 + $0xe0] sm:$0xff]  ;;  %v440_v30 = vld [vmem:[%s3348_s30 + $0xe8] sm:$0xff] }
  0xce   : > { %361 = vst.msk [vmem:[#allocation2 + $0x150] sm:$0xff] %vm317_vm0, %v3049_v2  ;;  %362 = vst.msk [vmem:[#allocation2 + $0x158] sm:$0xff] %vm317_vm0, %v3049_v2  ;;  %v441_v31 = vld [vmem:[%s3348_s30 + $0xf0] sm:$0xff]  ;;  %v442_v32 = vld [vmem:[%s3348_s30 + $0xf8] sm:$0xff] }
  0xcf   : > { %364 = vst.msk [vmem:[#allocation2 + $0x168] sm:$0xff] %vm317_vm0, %v3049_v2  ;;  %365 = vst.msk [vmem:[#allocation2 + $0x170] sm:$0xff] %vm317_vm0, %v3049_v2 }
  0xd0   : > { %367 = vst.msk [vmem:[#allocation2 + $0x180] sm:$0xff] %vm317_vm0, %v3049_v2  ;;  %368 = vst.msk [vmem:[#allocation2 + $0x188] sm:$0xff] %vm317_vm0, %v3049_v2 }
  0xd1   : > { %370 = vst.msk [vmem:[#allocation2 + $0x198] sm:$0xff] %vm317_vm0, %v3049_v2  ;;  %371 = vst.msk [vmem:[#allocation2 + $0x1a0] sm:$0xff] %vm317_vm0, %v3049_v2 }
  0xd2   : > { %373 = vst.msk [vmem:[#allocation2 + $0x1b0] sm:$0xff] %vm317_vm0, %v3049_v2  ;;  %374 = vst.msk [vmem:[#allocation2 + $0x1b8] sm:$0xff] %vm317_vm0, %v3049_v2 }
  0xd3   : > { %376 = vst.msk [vmem:[#allocation2 + $0x1c8] sm:$0xff] %vm317_vm0, %v3049_v2  ;;  %377 = vst.msk [vmem:[#allocation2 + $0x1d0] sm:$0xff] %vm317_vm0, %v3049_v2 }
  0xd4   : > { %327 = vst.msk [vmem:[#allocation2 + $0x40] sm:$0x3] %vm320_vm1, %v3049_v2  ;;  %321 = vst.msk [vmem:[#allocation2 + $0x10] sm:$0x3] %vm320_vm1, %v3049_v2 }
  0xd5   : > { %324 = vst.msk [vmem:[#allocation2 + $0x28] sm:$0x3] %vm320_vm1, %v3049_v2  ;;  %330 = vst.msk [vmem:[#allocation2 + $0x58] sm:$0x3] %vm320_vm1, %v3049_v2 }
  0xd6   : > { %333 = vst.msk [vmem:[#allocation2 + $0x70] sm:$0x3] %vm320_vm1, %v3049_v2  ;;  %336 = vst.msk [vmem:[#allocation2 + $0x88] sm:$0x3] %vm320_vm1, %v3049_v2 }
  0xd7   : > { %339 = vst.msk [vmem:[#allocation2 + $0xa0] sm:$0x3] %vm320_vm1, %v3049_v2  ;;  %342 = vst.msk [vmem:[#allocation2 + $0xb8] sm:$0x3] %vm320_vm1, %v3049_v2 }
  0xd8   : > { %345 = vst.msk [vmem:[#allocation2 + $0xd0] sm:$0x3] %vm320_vm1, %v3049_v2  ;;  %348 = vst.msk [vmem:[#allocation2 + $0xe8] sm:$0x3] %vm320_vm1, %v3049_v2 }
  0xd9   : > { %351 = vst.msk [vmem:[#allocation2 + $0x100] sm:$0x3] %vm320_vm1, %v3049_v2  ;;  %354 = vst.msk [vmem:[#allocation2 + $0x118] sm:$0x3] %vm320_vm1, %v3049_v2 }
  0xda   : > { %357 = vst.msk [vmem:[#allocation2 + $0x130] sm:$0x3] %vm320_vm1, %v3049_v2  ;;  %360 = vst.msk [vmem:[#allocation2 + $0x148] sm:$0x3] %vm320_vm1, %v3049_v2 }
  0xdb   : > { %363 = vst.msk [vmem:[#allocation2 + $0x160] sm:$0x3] %vm320_vm1, %v3049_v2  ;;  %366 = vst.msk [vmem:[#allocation2 + $0x178] sm:$0x3] %vm320_vm1, %v3049_v2 }
  0xdc   : > { %369 = vst.msk [vmem:[#allocation2 + $0x190] sm:$0x3] %vm320_vm1, %v3049_v2  ;;  %372 = vst.msk [vmem:[#allocation2 + $0x1a8] sm:$0x3] %vm320_vm1, %v3049_v2 }
  0xdd   : > { %375 = vst.msk [vmem:[#allocation2 + $0x1c0] sm:$0x3] %vm320_vm1, %v3049_v2  ;;  %378 = vst.msk [vmem:[#allocation2 + $0x1d8] sm:$0x3] %vm320_vm1, %v3049_v2 }
  0xde   : > { %380 = vst.msk [vmem:[#allocation4] sm:$0xff] %vm379_vm2, %v3049_v2  ;;  %381 = vst.msk [vmem:[#allocation4 + $0x8] sm:$0xff] %vm379_vm2, %v3049_v2 }
  0xdf   : > { %384 = vst.msk [vmem:[#allocation4 + $0x18] sm:$0xff] %vm379_vm2, %v3049_v2  ;;  %385 = vst.msk [vmem:[#allocation4 + $0x20] sm:$0xff] %vm379_vm2, %v3049_v2 }
  0xe0   : > { %387 = vst.msk [vmem:[#allocation4 + $0x30] sm:$0xff] %vm379_vm2, %v3049_v2  ;;  %388 = vst.msk [vmem:[#allocation4 + $0x38] sm:$0xff] %vm379_vm2, %v3049_v2 }
  0xe1   : > { %390 = vst.msk [vmem:[#allocation4 + $0x48] sm:$0xff] %vm379_vm2, %v3049_v2  ;;  %391 = vst.msk [vmem:[#allocation4 + $0x50] sm:$0xff] %vm379_vm2, %v3049_v2 }
  0xe2   : > { %393 = vst.msk [vmem:[#allocation4 + $0x60] sm:$0xff] %vm379_vm2, %v3049_v2  ;;  %394 = vst.msk [vmem:[#allocation4 + $0x68] sm:$0xff] %vm379_vm2, %v3049_v2 }
  0xe3   : > { %396 = vst.msk [vmem:[#allocation4 + $0x78] sm:$0xff] %vm379_vm2, %v3049_v2  ;;  %397 = vst.msk [vmem:[#allocation4 + $0x80] sm:$0xff] %vm379_vm2, %v3049_v2 }
  0xe4   : > { %399 = vst.msk [vmem:[#allocation4 + $0x90] sm:$0xff] %vm379_vm2, %v3049_v2  ;;  %400 = vst.msk [vmem:[#allocation4 + $0x98] sm:$0xff] %vm379_vm2, %v3049_v2 }
  0xe5   : > { %402 = vst.msk [vmem:[#allocation4 + $0xa8] sm:$0xff] %vm379_vm2, %v3049_v2  ;;  %403 = vst.msk [vmem:[#allocation4 + $0xb0] sm:$0xff] %vm379_vm2, %v3049_v2 }
  0xe6   : > { %405 = vst.msk [vmem:[#allocation4 + $0xc0] sm:$0xff] %vm379_vm2, %v3049_v2  ;;  %406 = vst.msk [vmem:[#allocation4 + $0xc8] sm:$0xff] %vm379_vm2, %v3049_v2 }
  0xe7   : > { %408 = vst.msk [vmem:[#allocation4 + $0xd8] sm:$0xff] %vm379_vm2, %v3049_v2  ;;  %409 = vst.msk [vmem:[#allocation4 + $0xe0] sm:$0xff] %vm379_vm2, %v3049_v2 }
  0xe8   : > { %383 = vst.msk [vmem:[#allocation4 + $0x10] sm:$0x3] %vm382_vm3, %v3049_v2  ;;  %386 = vst.msk [vmem:[#allocation4 + $0x28] sm:$0x3] %vm382_vm3, %v3049_v2 }
  0xe9   : > { %389 = vst.msk [vmem:[#allocation4 + $0x40] sm:$0x3] %vm382_vm3, %v3049_v2  ;;  %392 = vst.msk [vmem:[#allocation4 + $0x58] sm:$0x3] %vm382_vm3, %v3049_v2 }
  0xea   : > { %395 = vst.msk [vmem:[#allocation4 + $0x70] sm:$0x3] %vm382_vm3, %v3049_v2  ;;  %398 = vst.msk [vmem:[#allocation4 + $0x88] sm:$0x3] %vm382_vm3, %v3049_v2 }
  0xeb   : > { %401 = vst.msk [vmem:[#allocation4 + $0xa0] sm:$0x3] %vm382_vm3, %v3049_v2  ;;  %404 = vst.msk [vmem:[#allocation4 + $0xb8] sm:$0x3] %vm382_vm3, %v3049_v2 }
  0xec   : > { %407 = vst.msk [vmem:[#allocation4 + $0xd0] sm:$0x3] %vm382_vm3, %v3049_v2  ;;  %410 = vst.msk [vmem:[#allocation4 + $0xe8] sm:$0x3] %vm382_vm3, %v3049_v2 }
  0xed   : > { %444 = vst.msk [vmem:[#allocation2 + $0x31] sm:$0xff] %vm317_vm0, %v3371_v0  ;;  %445 = vst.msk [vmem:[#allocation2 + $0x39] sm:$0xff] %vm317_vm0, %v3374_v1 }
  0xee   : > { %446 = vst.msk [vmem:[#allocation2 + $0x49] sm:$0xff] %vm317_vm0, %v413_v3  ;;  %447 = vst.msk [vmem:[#allocation2 + $0x51] sm:$0xff] %vm317_vm0, %v414_v4 }
  0xef   : > { %448 = vst.msk [vmem:[#allocation2 + $0x61] sm:$0xff] %vm317_vm0, %v415_v5  ;;  %449 = vst.msk [vmem:[#allocation2 + $0x69] sm:$0xff] %vm317_vm0, %v416_v6 }
  0xf0   : > { %450 = vst.msk [vmem:[#allocation2 + $0x79] sm:$0xff] %vm317_vm0, %v417_v7  ;;  %451 = vst.msk [vmem:[#allocation2 + $0x81] sm:$0xff] %vm317_vm0, %v418_v8 }
  0xf1   : > { %452 = vst.msk [vmem:[#allocation2 + $0x91] sm:$0xff] %vm317_vm0, %v419_v9  ;;  %453 = vst.msk [vmem:[#allocation2 + $0x99] sm:$0xff] %vm317_vm0, %v420_v10 }
  0xf2   : > { %454 = vst.msk [vmem:[#allocation2 + $0xa9] sm:$0xff] %vm317_vm0, %v421_v11  ;;  %455 = vst.msk [vmem:[#allocation2 + $0xb1] sm:$0xff] %vm317_vm0, %v422_v12 }
  0xf3   : > { %456 = vst.msk [vmem:[#allocation2 + $0xc1] sm:$0xff] %vm317_vm0, %v423_v13  ;;  %457 = vst.msk [vmem:[#allocation2 + $0xc9] sm:$0xff] %vm317_vm0, %v424_v14 }
  0xf4   : > { %458 = vst.msk [vmem:[#allocation2 + $0xd9] sm:$0xff] %vm317_vm0, %v425_v15  ;;  %459 = vst.msk [vmem:[#allocation2 + $0xe1] sm:$0xff] %vm317_vm0, %v426_v16 }
  0xf5   : > { %460 = vst.msk [vmem:[#allocation2 + $0xf1] sm:$0xff] %vm317_vm0, %v427_v17  ;;  %461 = vst.msk [vmem:[#allocation2 + $0xf9] sm:$0xff] %vm317_vm0, %v428_v18 }
  0xf6   : > { %462 = vst.msk [vmem:[#allocation2 + $0x109] sm:$0xff] %vm317_vm0, %v429_v19  ;;  %463 = vst.msk [vmem:[#allocation2 + $0x111] sm:$0xff] %vm317_vm0, %v430_v20 }
  0xf7   : > { %464 = vst.msk [vmem:[#allocation2 + $0x121] sm:$0xff] %vm317_vm0, %v431_v21  ;;  %465 = vst.msk [vmem:[#allocation2 + $0x129] sm:$0xff] %vm317_vm0, %v432_v22 }
  0xf8   : > { %466 = vst.msk [vmem:[#allocation2 + $0x139] sm:$0xff] %vm317_vm0, %v433_v23  ;;  %467 = vst.msk [vmem:[#allocation2 + $0x141] sm:$0xff] %vm317_vm0, %v434_v24 }
  0xf9   : > { %468 = vst.msk [vmem:[#allocation2 + $0x151] sm:$0xff] %vm317_vm0, %v435_v25  ;;  %469 = vst.msk [vmem:[#allocation2 + $0x159] sm:$0xff] %vm317_vm0, %v436_v26 }
  0xfa   : > { %470 = vst.msk [vmem:[#allocation2 + $0x169] sm:$0xff] %vm317_vm0, %v437_v27  ;;  %471 = vst.msk [vmem:[#allocation2 + $0x171] sm:$0xff] %vm317_vm0, %v438_v28 }
  0xfb   : > { %472 = vst.msk [vmem:[#allocation2 + $0x181] sm:$0xff] %vm317_vm0, %v439_v29  ;;  %473 = vst.msk [vmem:[#allocation2 + $0x189] sm:$0xff] %vm317_vm0, %v440_v30 }
  0xfc   : > { %474 = vst.msk [vmem:[#allocation2 + $0x199] sm:$0xff] %vm317_vm0, %v441_v31  ;;  %475 = vst.msk [vmem:[#allocation2 + $0x1a1] sm:$0xff] %vm317_vm0, %v442_v32 }
  0xfd PF: > { %s4283_s6 = sld [smem:[#allocation21_spill]]  ;;  %s3050_s24 = smov 4   ;;  %vm509_vm4 = vcmask 31744   ;;  %v2758_v19 = vld [vmem:[#allocation9] sm:$0xff]   ;;  %v2759_v20 = vld [vmem:[#allocation9 + $0x8] sm:$0xff]   ;;  %vm1242_vm5 = vcmask 1041408  }
  0xfe   : > { %s3051_s12 = smov 8   ;;  %s3052_s8 = smov 12   ;;  %2541 = vmatprep.subr.bf16.mxu0 %v2758_v19  ;;  %v2760_v22 = vld [vmem:[#allocation9 + $0x10] ss:$0 sps:$4 sm:$0x33]   ;;  %vm590_vm6 = vcmask 64544  }
  0xff   : > { %s3053_s15 = smov 16   ;;  %s3054_s29 = smov 20   ;;  %2542 = vmatpush3.bf16.msra.mxu0 %v2758_v19  ;;  %v1244_v25 = vsel %vm1242_vm5, %v2760_v22, 0  ;;  %vm671_vm7 = vcmask 97344   ;;  %vm755_vm8 = vcmask 130144   ;;  %vm836_vm9 = vcmask 162944  }
 0x100   : > { %s3055_s21 = smov 24   ;;  %2543 = vmatprep.subr.bf16.mxu0 %v2759_v20  ;;  %s3056_s18 = smov 28   ;;  %vm917_vm10 = vcmask 195744   ;;  %vm1001_vm11 = vcmask 228544   ;;  %vm1082_vm12 = vcmask 261344   ;;  %vm1163_vm13 = vcmask 294144  }
 0x101   : > { %s3057_s25 = smov 32   ;;  %vm1211_vm14 = vcmask 293888   ;;  %vm1379_vm15 = vcmask 64512   ;;  %vm1405_vm0 = vcmask (!%p2349_p3), 58368  }
 0x103   : > { %s2351_s1 = smul.u32 192, %s4283_s6  ;;  %2544 = vmatpush3.bf16.msra.mxu0 %v2759_v20 }
 0x104   : > { %2593 = vmatprep.subr.msk.bf16.mxu0 %vm1242_vm5, %v2760_v22 }
 0x105   : > { %s3611_s17 = scalar_lea.vmem [#allocation2], %s2351_s1 }
 0x106   : > { %v520_v33 = vld [vmem:[%s3611_s17 + $0x1] sm:$0xff]  ;;  %v521_v34 = vld [vmem:[%s3611_s17 + $0x9] sm:$0xff]  ;;  %v522_v38 = vld [vmem:[%s3611_s17 + $0x19] sm:$0xff] }
 0x107   : > { %v601_v35 = vld [vmem:[%s3611_s17 + $0x2] sm:$0xff]  ;;  %v540_v36 = vpack.c.bf16 %v521_v34, %v520_v33  ;;  %v602_v37 = vld [vmem:[%s3611_s17 + $0xa] sm:$0xff]  ;;  %v603_v41 = vld [vmem:[%s3611_s17 + $0x1a] sm:$0xff]  ;;  %2546 = vmatpush3.bf16.msra.mxu0 %v1244_v25 }
 0x108   : > { %v523_v39 = vld [vmem:[%s3611_s17 + $0x21] sm:$0xff]  ;;  %v621_v40 = vpack.c.bf16 %v602_v37, %v601_v35  ;;  %v2354_v43 = vld [vmem:[%s3611_s17 + $0x18] sm:$0xff]  ;;  %v2356_v46 = vld [vmem:[%s3611_s17 + $0x30] sm:$0xff] }
 0x109   : > { %v604_v42 = vld [vmem:[%s3611_s17 + $0x22] sm:$0xff]  ;;  %560 = vrot.lane.b32.xlu0 %v540_v36, %s3050_s24  ;;  %v541_v44 = vpack.c.bf16 %v523_v39, %v522_v38  ;;  %v2357_v47 = vld [vmem:[%s3611_s17 + $0x38] sm:$0xff]  ;;  %v2419_v52 = vld [vmem:[%s3611_s17 + $0x50] sm:$0xff] }
 0x10a   : > { %v2355_v45 = vld [vmem:[%s3611_s17 + $0x20] sm:$0xff]  ;;  %641 = vrot.lane.b32.xlu1 %v621_v40, %s3051_s12  ;;  %v622_v48 = vpack.c.bf16 %v604_v42, %v603_v41  ;;  %v706_v50 = vpack.c.bf16 %v2357_v47, %v2356_v46  ;;  %v2418_v51 = vld [vmem:[%s3611_s17 + $0x48] sm:$0xff]  ;;  %v2376_v56 = vld [vmem:[%s3611_s17 + $0x31] sm:$0xff] }
 0x10b   : > { %v705_v49 = vpack.c.bf16 %v2355_v45, %v2354_v43  ;;  %v3629_v53 = vpack.c.bf16 %v2419_v52, %v2418_v51  ;;  %v2360_v54 = vld [vmem:[%s3611_s17 + $0x60] sm:$0xff]  ;;  %v2361_v55 = vld [vmem:[%s3611_s17 + $0x68] sm:$0xff]  ;;  %v2422_v59 = vld [vmem:[%s3611_s17 + $0x78] sm:$0xff] }
 0x10c   : > { %512 = vst.msk [vmem:[#allocation3 + $0x10] sm:$0xff] %vm509_vm4, %v706_v50  ;;  %v3638_v57 = vpack.c.bf16 %v2361_v55, %v2360_v54  ;;  %v2377_v58 = vld [vmem:[%s3611_s17 + $0x39] sm:$0xff]  ;;  %v2364_v62 = vld [vmem:[%s3611_s17 + $0x90] sm:$0xff]  ;;  %v2426_v4 = vld [vmem:[%s3611_s17 + $0xa8] sm:$0xff] }
 0x10d   : > { %511 = vst.msk [vmem:[#allocation3 + $0x8] sm:$0xff] %vm509_vm4, %v705_v49  ;;  %562 = vrot.lane.b32.xlu0 %v541_v44, %s3050_s24  ;;  %513 = vst.msk [vmem:[#allocation3 + $0x18] sm:$0xff] %vm509_vm4, %v3629_v53  ;;  %v2423_v60 = vld [vmem:[%s3611_s17 + $0x80] sm:$0xff]  ;;  %v2365_v63 = vld [vmem:[%s3611_s17 + $0x98] sm:$0xff]  ;;  %v787_v0 = vpack.c.bf16 %v2377_v58, %v2376_v56 }
 0x10e   : > { %643 = vrot.lane.b32.xlu1 %v622_v48, %s3051_s12  ;;  %v3645_v61 = vpack.c.bf16 %v2423_v60, %v2422_v59  ;;  %514 = vst.msk [vmem:[#allocation3 + $0x20] sm:$0xff] %vm509_vm4, %v3638_v57  ;;  %v2396_v1 = vld [vmem:[%s3611_s17 + $0x32] sm:$0xff]  ;;  %v3654_v2 = vpack.c.bf16 %v2365_v63, %v2364_v62  ;;  %v2397_v3 = vld [vmem:[%s3611_s17 + $0x3a] sm:$0xff]  ;;  %v2369_v8 = vld [vmem:[%s3611_s17 + $0xc8] sm:$0xff] }
 0x10f   : > { %v2427_v5 = vld [vmem:[%s3611_s17 + $0xb0] sm:$0xff]  ;;  %v2368_v7 = vld [vmem:[%s3611_s17 + $0xc0] sm:$0xff]  ;;  %v868_v9 = vpack.c.bf16 %v2397_v3, %v2396_v1  ;;  %v480_v12 = vld [vmem:[%s3611_s17 + $0x8] sm:$0xff] }
 0x110   : > { %515 = vst.msk [vmem:[#allocation3 + $0x28] sm:$0xff] %vm509_vm4, %v3645_v61  ;;  %v3661_v6 = vpack.c.bf16 %v2427_v5, %v2426_v4  ;;  %516 = vst.msk [vmem:[#allocation3 + $0x30] sm:$0xff] %vm509_vm4, %v3654_v2  ;;  %v3669_v10 = vpack.c.bf16 %v2369_v8, %v2368_v7  ;;  %v479_v11 = vld [vmem:[%s3611_s17] sm:$0xff]  ;;  %v2430_v14 = vld [vmem:[%s3611_s17 + $0xd8] sm:$0xff] }
 0x111   : > { %725 = vrot.lane.b32.xlu0 %v705_v49, %s3052_s8  ;;  %v499_v13 = vpack.c.bf16 %v480_v12, %v479_v11  ;;  %v2431_v15 = vld [vmem:[%s3611_s17 + $0xe0] sm:$0xff]  ;;  %v2438_v17 = vld [vmem:[%s3611_s17 + $0x49] sm:$0xff]  ;;  %v2439_v18 = vld [vmem:[%s3611_s17 + $0x51] sm:$0xff] }
 0x112   : > { %727 = vrot.lane.b32.xlu1 %v706_v50, %s3052_s8  ;;  %517 = vst.msk [vmem:[#allocation3 + $0x38] sm:$0xff] %vm509_vm4, %v3661_v6  ;;  %518 = vst.msk [vmem:[#allocation3 + $0x40] sm:$0xff] %vm509_vm4, %v3669_v10  ;;  %v3680_v16 = vpack.c.bf16 %v2431_v15, %v2430_v14  ;;  %v1033_v21 = vpack.c.bf16 %v2439_v18, %v2438_v17  ;;  %v2458_v23 = vld [vmem:[%s3611_s17 + $0x4a] sm:$0xff]  ;;  %v2459_v24 = vld [vmem:[%s3611_s17 + $0x52] sm:$0xff] }
 0x113   : > { %510 = vst.msk [vmem:[#allocation3] sm:$0xff] %vm509_vm4, %v499_v13  ;;  %v1114_v26 = vpack.c.bf16 %v2459_v24, %v2458_v23  ;;  %v2380_v27 = vld [vmem:[%s3611_s17 + $0x61] sm:$0xff]  ;;  %v2381_v28 = vld [vmem:[%s3611_s17 + $0x69] sm:$0xff]  ;;  %v2442_v33 = vld [vmem:[%s3611_s17 + $0x79] sm:$0xff] }
 0x114   : > { %519 = vst.msk [vmem:[#allocation3 + $0x48] sm:$0xff] %vm509_vm4, %v3680_v16  ;;  %v789_v29 = vpack.c.bf16 %v2381_v28, %v2380_v27  ;;  %v2400_v30 = vld [vmem:[%s3611_s17 + $0x62] sm:$0xff]  ;;  %v2401_v31 = vld [vmem:[%s3611_s17 + $0x6a] sm:$0xff]  ;;  %v2462_v36 = vld [vmem:[%s3611_s17 + $0x7a] sm:$0xff] }
 0x115   : > { %806 = vrot.lane.b32.xlu0 %v541_v44, %s3053_s15  ;;  %v870_v32 = vpack.c.bf16 %v2401_v31, %v2400_v30  ;;  %v2443_v34 = vld [vmem:[%s3611_s17 + $0x81] sm:$0xff]  ;;  %v2384_v39 = vld [vmem:[%s3611_s17 + $0x91] sm:$0xff]  ;;  %v2385_v40 = vld [vmem:[%s3611_s17 + $0x99] sm:$0xff] }
 0x116   : > { %808 = vrot.lane.b32.xlu1 %v787_v0, %s3053_s15  ;;  %v1035_v35 = vpack.c.bf16 %v2443_v34, %v2442_v33  ;;  %v2463_v37 = vld [vmem:[%s3611_s17 + $0x82] sm:$0xff]  ;;  %v791_v41 = vpack.c.bf16 %v2385_v40, %v2384_v39  ;;  %v2404_v42 = vld [vmem:[%s3611_s17 + $0x92] sm:$0xff]  ;;  %v2405_v43 = vld [vmem:[%s3611_s17 + $0x9a] sm:$0xff] }
 0x117   : > { %v1116_v38 = vpack.c.bf16 %v2463_v37, %v2462_v36  ;;  %v872_v44 = vpack.c.bf16 %v2405_v43, %v2404_v42  ;;  %v2446_v45 = vld [vmem:[%s3611_s17 + $0xa9] sm:$0xff]  ;;  %v2447_v46 = vld [vmem:[%s3611_s17 + $0xb1] sm:$0xff]  ;;  %v2388_v51 = vld [vmem:[%s3611_s17 + $0xc1] sm:$0xff] }
 0x118   : > { %v1037_v47 = vpack.c.bf16 %v2447_v46, %v2446_v45  ;;  %v2467_v49 = vld [vmem:[%s3611_s17 + $0xb2] sm:$0xff]  ;;  %v2389_v52 = vld [vmem:[%s3611_s17 + $0xc9] sm:$0xff]  ;;  %v2451_v59 = vld [vmem:[%s3611_s17 + $0xe1] sm:$0xff] }
 0x119   : > { %887 = vrot.lane.b32.xlu0 %v622_v48, %s3054_s29  ;;  %v2466_v48 = vld [vmem:[%s3611_s17 + $0xaa] sm:$0xff]  ;;  %v2408_v54 = vld [vmem:[%s3611_s17 + $0xc2] sm:$0xff]  ;;  %v2450_v58 = vld [vmem:[%s3611_s17 + $0xd9] sm:$0xff] }
 0x11a   : > { %889 = vrot.lane.b32.xlu1 %v868_v9, %s3054_s29  ;;  %v2409_v55 = vld [vmem:[%s3611_s17 + $0xca] sm:$0xff]  ;;  %v2471_v1 = vld [vmem:[%s3611_s17 + $0xe2] sm:$0xff]  ;;  %v2393_v14 = vld [vmem:[%s3611_s17 + $0xf9] sm:$0xff] }
 0x11b   : > { %v874_v56 = vpack.c.bf16 %v2409_v55, %v2408_v54  ;;  %v2372_v8 = vld [vmem:[%s3611_s17 + $0xf0] sm:$0xff]  ;;  %v2413_v20 = vld [vmem:[%s3611_s17 + $0xfa] sm:$0xff]  ;;  %v2434_v23 = vld [vmem:[%s3611_s17 + $0x108] sm:$0xff] }
 0x11c   : > { %v2392_v13 = vld [vmem:[%s3611_s17 + $0xf1] sm:$0xff]  ;;  %v2454_v28 = vld [vmem:[%s3611_s17 + $0x109] sm:$0xff] }
 0x11d   : > { %971 = vrot.lane.b32.xlu0 %v706_v50, %s3055_s21  ;;  %v1118_v50 = vpack.c.bf16 %v2467_v49, %v2466_v48  ;;  %v795_v17 = vpack.c.bf16 %v2393_v14, %v2392_v13  ;;  %v2412_v19 = vld [vmem:[%s3611_s17 + $0xf2] sm:$0xff]  ;;  %v2474_v34 = vld [vmem:[%s3611_s17 + $0x10a] sm:$0xff] }
 0x11e   : > { %973 = vrot.lane.b32.xlu1 %v3629_v53, %s3055_s21  ;;  %v2435_v24 = vld [vmem:[%s3611_s17 + $0x110] sm:$0xff] }
 0x121   : > { %1052 = vrot.lane.b32.xlu0 %v787_v0, %s3056_s18 }
 0x122   : > { %1054 = vrot.lane.b32.xlu1 %v1033_v21, %s3056_s18 }
 0x125   : > { %1133 = vrot.lane.b32.xlu0 %v868_v9, %s3057_s25 }
 0x126   : > { %564 = vrot.lane.b32.xlu1 %v787_v0, %s3050_s24  ;;  %v2470_v0 = vld [vmem:[%s3611_s17 + $0xda] sm:$0xff] }
 0x127   : > { %v1120_v4 = vpack.c.bf16 %v2471_v1, %v2470_v0 }
 0x129   : > { %1135 = vrot.lane.b32.xlu0 %v1114_v26, %s3057_s25 }
 0x12a   : > { %566 = vrot.lane.b32.xlu1 %v1033_v21, %s3050_s24 }
 0x12d   : > { %645 = vrot.lane.b32.xlu0 %v868_v9, %s3051_s12  ;;  %v2373_v9 = vld [vmem:[%s3611_s17 + $0xf8] sm:$0xff] }
 0x12e   : > { %647 = vrot.lane.b32.xlu1 %v1114_v26, %s3051_s12  ;;  %v714_v11 = vpack.c.bf16 %v2373_v9, %v2372_v8 }
 0x131   : > { %729 = vrot.lane.b32.xlu0 %v3629_v53, %s3052_s8  ;;  %v793_v53 = vpack.c.bf16 %v2389_v52, %v2388_v51 }
 0x132   : > { %731 = vrot.lane.b32.xlu1 %v3638_v57, %s3052_s8 }
 0x135   : > { %810 = vrot.lane.b32.xlu0 %v1033_v21, %s3053_s15 }
 0x136   : > { %812 = vrot.lane.b32.xlu1 %v789_v29, %s3053_s15 }
 0x139   : > { %891 = vrot.lane.b32.xlu0 %v1114_v26, %s3054_s29  ;;  %v960_v26 = vpack.c.bf16 %v2435_v24, %v2434_v23 }
 0x13a   : > { %893 = vrot.lane.b32.xlu1 %v870_v32, %s3054_s29 }
 0x13d   : > { %975 = vrot.lane.b32.xlu0 %v3638_v57, %s3055_s21 }
 0x13e   : > { %977 = vrot.lane.b32.xlu1 %v3645_v61, %s3055_s21 }
 0x141   : > { %1056 = vrot.lane.b32.xlu0 %v789_v29, %s3056_s18 }
 0x142   : > { %1058 = vrot.lane.b32.xlu1 %v1035_v35, %s3056_s18 }
 0x145   : > { %1137 = vrot.lane.b32.xlu0 %v870_v32, %s3057_s25 }
 0x146   : > { %568 = vrot.lane.b32.xlu1 %v789_v29, %s3050_s24  ;;  %v2455_v29 = vld [vmem:[%s3611_s17 + $0x111] sm:$0xff] }
 0x147   : > { %v1041_v31 = vpack.c.bf16 %v2455_v29, %v2454_v28 }
 0x149   : > { %1139 = vrot.lane.b32.xlu0 %v1116_v38, %s3057_s25 }
 0x14a   : > { %570 = vrot.lane.b32.xlu1 %v1035_v35, %s3050_s24 }
 0x14d   : > { %649 = vrot.lane.b32.xlu0 %v870_v32, %s3051_s12 }
 0x14e   : > { %651 = vrot.lane.b32.xlu1 %v1116_v38, %s3051_s12 }
 0x151   : > { %733 = vrot.lane.b32.xlu0 %v3645_v61, %s3052_s8  ;;  %v1039_v61 = vpack.c.bf16 %v2451_v59, %v2450_v58 }
 0x152   : > { %735 = vrot.lane.b32.xlu1 %v3654_v2, %s3052_s8 }
 0x155   : > { %814 = vrot.lane.b32.xlu0 %v1035_v35, %s3053_s15  ;;  %v2475_v35 = vld [vmem:[%s3611_s17 + $0x112] sm:$0xff] }
 0x156   : > { %816 = vrot.lane.b32.xlu1 %v791_v41, %s3053_s15  ;;  %v1122_v37 = vpack.c.bf16 %v2475_v35, %v2474_v34 }
 0x159   : > { %895 = vrot.lane.b32.xlu0 %v1116_v38, %s3054_s29 }
 0x15a   : > { %897 = vrot.lane.b32.xlu1 %v872_v44, %s3054_s29 }
 0x15d   : > { %979 = vrot.lane.b32.xlu0 %v3654_v2, %s3055_s21 }
 0x15e   : > { %981 = vrot.lane.b32.xlu1 %v3661_v6, %s3055_s21 }
 0x161   : > { %1060 = vrot.lane.b32.xlu0 %v791_v41, %s3056_s18 }
 0x162   : > { %1062 = vrot.lane.b32.xlu1 %v1037_v47, %s3056_s18 }
 0x165   : > { %1141 = vrot.lane.b32.xlu0 %v872_v44, %s3057_s25 }
 0x166   : > { %572 = vrot.lane.b32.xlu1 %v791_v41, %s3050_s24 }
 0x169   : > { %1143 = vrot.lane.b32.xlu0 %v1118_v50, %s3057_s25 }
 0x16a   : > { %574 = vrot.lane.b32.xlu1 %v1037_v47, %s3050_s24 }
 0x16d   : > { %653 = vrot.lane.b32.xlu0 %v872_v44, %s3051_s12 }
 0x16e   : > { %655 = vrot.lane.b32.xlu1 %v1118_v50, %s3051_s12 }
 0x171   : > { %737 = vrot.lane.b32.xlu0 %v3661_v6, %s3052_s8 }
 0x172   : > { %739 = vrot.lane.b32.xlu1 %v3669_v10, %s3052_s8 }
 0x175   : > { %818 = vrot.lane.b32.xlu0 %v1037_v47, %s3053_s15 }
 0x176   : > { %820 = vrot.lane.b32.xlu1 %v793_v53, %s3053_s15 }
 0x179   : > { %899 = vrot.lane.b32.xlu0 %v1118_v50, %s3054_s29 }
 0x17a   : > { %901 = vrot.lane.b32.xlu1 %v874_v56, %s3054_s29 }
 0x17b   : > { %v561_v57 = vpop.permute.xlu0 %560 }
 0x17c   : > { %591 = vst.msk [vmem:[#allocation3] sm:$0xff] %vm590_vm6, %v561_v57  ;;  %v642_v60 = vpop.permute.xlu1 %641 }
 0x17d   : > { %672 = vst.msk [vmem:[#allocation3] sm:$0xff] %vm671_vm7, %v642_v60  ;;  %983 = vrot.lane.b32.xlu0 %v3669_v10, %s3055_s21 }
 0x17e   : > { %985 = vrot.lane.b32.xlu1 %v3680_v16, %s3055_s21 }
 0x17f   : > { %v563_v62 = vpop.permute.xlu0 %562 }
 0x180   : > { %592 = vst.msk [vmem:[#allocation3 + $0x8] sm:$0xff] %vm590_vm6, %v563_v62  ;;  %v644_v63 = vpop.permute.xlu1 %643 }
 0x181   : > { %673 = vst.msk [vmem:[#allocation3 + $0x8] sm:$0xff] %vm671_vm7, %v644_v63  ;;  %1064 = vrot.lane.b32.xlu0 %v793_v53, %s3056_s18 }
 0x182   : > { %1066 = vrot.lane.b32.xlu1 %v1039_v61, %s3056_s18 }
 0x183   : > { %v726_v2 = vpop.permute.xlu0 %725 }
 0x184   : > { %756 = vst.msk [vmem:[#allocation3] sm:$0xff] %vm755_vm8, %v726_v2  ;;  %v728_v3 = vpop.permute.xlu1 %727 }
 0x185   : > { %757 = vst.msk [vmem:[#allocation3 + $0x8] sm:$0xff] %vm755_vm8, %v728_v3  ;;  %1145 = vrot.lane.b32.xlu0 %v874_v56, %s3057_s25 }
 0x186   : > { %576 = vrot.lane.b32.xlu1 %v793_v53, %s3050_s24 }
 0x187   : > { %v807_v5 = vpop.permute.xlu0 %806 }
 0x188   : > { %837 = vst.msk [vmem:[#allocation3] sm:$0xff] %vm836_vm9, %v807_v5  ;;  %v809_v6 = vpop.permute.xlu1 %808 }
 0x189   : > { %838 = vst.msk [vmem:[#allocation3 + $0x8] sm:$0xff] %vm836_vm9, %v809_v6  ;;  %1147 = vrot.lane.b32.xlu0 %v1120_v4, %s3057_s25 }
 0x18a   : > { %578 = vrot.lane.b32.xlu1 %v1039_v61, %s3050_s24 }
 0x18b   : > { %v888_v7 = vpop.permute.xlu0 %887 }
 0x18c   : > { %918 = vst.msk [vmem:[#allocation3] sm:$0xff] %vm917_vm10, %v888_v7  ;;  %v890_v10 = vpop.permute.xlu1 %889 }
 0x18d   : > { %919 = vst.msk [vmem:[#allocation3 + $0x8] sm:$0xff] %vm917_vm10, %v890_v10  ;;  %657 = vrot.lane.b32.xlu0 %v874_v56, %s3051_s12 }
 0x18e   : > { %659 = vrot.lane.b32.xlu1 %v1120_v4, %s3051_s12 }
 0x18f   : > { %v972_v12 = vpop.permute.xlu0 %971 }
 0x190   : > { %1002 = vst.msk [vmem:[#allocation3] sm:$0xff] %vm1001_vm11, %v972_v12  ;;  %v974_v15 = vpop.permute.xlu1 %973 }
 0x191   : > { %1003 = vst.msk [vmem:[#allocation3 + $0x8] sm:$0xff] %vm1001_vm11, %v974_v15  ;;  %741 = vrot.lane.b32.xlu0 %v3680_v16, %s3052_s8  ;;  %v876_v16 = vpack.c.bf16 %v2413_v20, %v2412_v19 }
 0x192   : > { %743 = vrot.lane.b32.xlu1 %v714_v11, %s3052_s8 }
 0x193   : > { %v1053_v18 = vpop.permute.xlu0 %1052 }
 0x194   : > { %1083 = vst.msk [vmem:[#allocation3] sm:$0xff] %vm1082_vm12, %v1053_v18  ;;  %v1055_v21 = vpop.permute.xlu1 %1054 }
 0x195   : > { %1084 = vst.msk [vmem:[#allocation3 + $0x8] sm:$0xff] %vm1082_vm12, %v1055_v21  ;;  %822 = vrot.lane.b32.xlu0 %v1039_v61, %s3053_s15 }
 0x196   : > { %824 = vrot.lane.b32.xlu1 %v795_v17, %s3053_s15 }
 0x197   : > { %v1134_v22 = vpop.permute.xlu0 %1133 }
 0x198   : > { %1164 = vst.msk [vmem:[#allocation3] sm:$0xff] %vm1163_vm13, %v1134_v22  ;;  %v565_v25 = vpop.permute.xlu1 %564 }
 0x199   : > { %593 = vst.msk [vmem:[#allocation3 + $0x10] sm:$0xff] %vm590_vm6, %v565_v25  ;;  %903 = vrot.lane.b32.xlu0 %v1120_v4, %s3054_s29 }
 0x19a   : > { %905 = vrot.lane.b32.xlu1 %v876_v16, %s3054_s29 }
 0x19b   : > { %v1136_v27 = vpop.permute.xlu0 %1135 }
 0x19c   : > { %1165 = vst.msk [vmem:[#allocation3 + $0x8] sm:$0xff] %vm1163_vm13, %v1136_v27  ;;  %v567_v30 = vpop.permute.xlu1 %566 }
 0x19d   : > { %594 = vst.msk [vmem:[#allocation3 + $0x18] sm:$0xff] %vm590_vm6, %v567_v30  ;;  %987 = vrot.lane.b32.xlu0 %v714_v11, %s3055_s21 }
 0x19e   : > { %989 = vrot.lane.b32.xlu1 %v960_v26, %s3055_s21 }
 0x19f   : > { %v646_v32 = vpop.permute.xlu0 %645  ;;  %v1174_v33 = vld [vmem:[#allocation3] sm:$0xff] }
 0x1a0   : > { %674 = vst.msk [vmem:[#allocation3 + $0x10] sm:$0xff] %vm671_vm7, %v646_v32  ;;  %v648_v36 = vpop.permute.xlu1 %647  ;;  %2547 = vmatprep.mubr.msk.bf16.mxu0 %vm1211_vm14, %v1174_v33 }
 0x1a1   : > { %675 = vst.msk [vmem:[#allocation3 + $0x18] sm:$0xff] %vm671_vm7, %v648_v36  ;;  %1068 = vrot.lane.b32.xlu0 %v795_v17, %s3056_s18 }
 0x1a2   : > { %1070 = vrot.lane.b32.xlu1 %v1041_v31, %s3056_s18 }
 0x1a3   : > { %v730_v38 = vpop.permute.xlu0 %729  ;;  %v1175_v39 = vld [vmem:[#allocation3 + $0x8] sm:$0xff] }
 0x1a4   : > { %758 = vst.msk [vmem:[#allocation3 + $0x10] sm:$0xff] %vm755_vm8, %v730_v38  ;;  %v732_v40 = vpop.permute.xlu1 %731  ;;  %2548 = vmatmul.mubr.msk.bf16.vlgmr.msra.gmra.mrb[0].mxu0 %vm1211_vm14, %v1175_v39 }
 0x1a5   : > { %759 = vst.msk [vmem:[#allocation3 + $0x18] sm:$0xff] %vm755_vm8, %v732_v40  ;;  %1149 = vrot.lane.b32.xlu0 %v876_v16, %s3057_s25 }
 0x1a6   : > { %1151 = vrot.lane.b32.xlu1 %v1122_v37, %s3057_s25 }
 0x1a7   : > { %v811_v41 = vpop.permute.xlu0 %810 }
 0x1a8   : > { %839 = vst.msk [vmem:[#allocation3 + $0x10] sm:$0xff] %vm836_vm9, %v811_v41  ;;  %v813_v42 = vpop.permute.xlu1 %812 }
 0x1a9   : > { %840 = vst.msk [vmem:[#allocation3 + $0x18] sm:$0xff] %vm836_vm9, %v813_v42 }
 0x1ab   : > { %v892_v43 = vpop.permute.xlu0 %891 }
 0x1ac   : > { %920 = vst.msk [vmem:[#allocation3 + $0x10] sm:$0xff] %vm917_vm10, %v892_v43  ;;  %v894_v44 = vpop.permute.xlu1 %893  ;;  %v3900_v43 = vld [vmem:[#allocation11] ss:$0 sm:$0xff] }
 0x1ad   : > { %921 = vst.msk [vmem:[#allocation3 + $0x18] sm:$0xff] %vm917_vm10, %v894_v44 }
 0x1af   : > { %v976_v45 = vpop.permute.xlu0 %975 }
 0x1b0   : > { %1004 = vst.msk [vmem:[#allocation3 + $0x10] sm:$0xff] %vm1001_vm11, %v976_v45  ;;  %v978_v46 = vpop.permute.xlu1 %977 }
 0x1b1   : > { %1005 = vst.msk [vmem:[#allocation3 + $0x18] sm:$0xff] %vm1001_vm11, %v978_v46 }
 0x1b3   : > { %v1057_v47 = vpop.permute.xlu0 %1056 }
 0x1b4   : > { %1085 = vst.msk [vmem:[#allocation3 + $0x10] sm:$0xff] %vm1082_vm12, %v1057_v47  ;;  %v1059_v48 = vpop.permute.xlu1 %1058 }
 0x1b5   : > { %1086 = vst.msk [vmem:[#allocation3 + $0x18] sm:$0xff] %vm1082_vm12, %v1059_v48 }
 0x1b7   : > { %v1138_v49 = vpop.permute.xlu0 %1137 }
 0x1b8   : > { %1166 = vst.msk [vmem:[#allocation3 + $0x10] sm:$0xff] %vm1163_vm13, %v1138_v49  ;;  %v569_v50 = vpop.permute.xlu1 %568 }
 0x1b9   : > { %595 = vst.msk [vmem:[#allocation3 + $0x20] sm:$0xff] %vm590_vm6, %v569_v50 }
 0x1bb   : > { %v1140_v51 = vpop.permute.xlu0 %1139 }
 0x1bc   : > { %1167 = vst.msk [vmem:[#allocation3 + $0x18] sm:$0xff] %vm1163_vm13, %v1140_v51  ;;  %v571_v52 = vpop.permute.xlu1 %570 }
 0x1bd   : > { %596 = vst.msk [vmem:[#allocation3 + $0x28] sm:$0xff] %vm590_vm6, %v571_v52 }
 0x1bf   : > { %v650_v53 = vpop.permute.xlu0 %649  ;;  %v1176_v54 = vld [vmem:[#allocation3 + $0x10] sm:$0xff] }
 0x1c0   : > { %676 = vst.msk [vmem:[#allocation3 + $0x20] sm:$0xff] %vm671_vm7, %v650_v53  ;;  %v652_v55 = vpop.permute.xlu1 %651  ;;  %2551 = vmatprep.mubr.msk.bf16.mxu0 %vm1211_vm14, %v1176_v54 }
 0x1c1   : > { %677 = vst.msk [vmem:[#allocation3 + $0x28] sm:$0xff] %vm671_vm7, %v652_v55 }
 0x1c3   : > { %v734_v56 = vpop.permute.xlu0 %733  ;;  %v1177_v57 = vld [vmem:[#allocation3 + $0x18] sm:$0xff] }
 0x1c4   : > { %760 = vst.msk [vmem:[#allocation3 + $0x20] sm:$0xff] %vm755_vm8, %v734_v56  ;;  %v736_v58 = vpop.permute.xlu1 %735  ;;  %2552 = vmatmul.mubr.msk.bf16.gmra.mrb[4].mxu0 %vm1211_vm14, %v1177_v57 }
 0x1c5   : > { %761 = vst.msk [vmem:[#allocation3 + $0x28] sm:$0xff] %vm755_vm8, %v736_v58 }
 0x1c7   : > { %v815_v59 = vpop.permute.xlu0 %814 }
 0x1c8   : > { %841 = vst.msk [vmem:[#allocation3 + $0x20] sm:$0xff] %vm836_vm9, %v815_v59  ;;  %v817_v60 = vpop.permute.xlu1 %816 }
 0x1c9   : > { %842 = vst.msk [vmem:[#allocation3 + $0x28] sm:$0xff] %vm836_vm9, %v817_v60 }
 0x1cb   : > { %v896_v61 = vpop.permute.xlu0 %895 }
 0x1cc   : > { %922 = vst.msk [vmem:[#allocation3 + $0x20] sm:$0xff] %vm917_vm10, %v896_v61  ;;  %v898_v62 = vpop.permute.xlu1 %897 }
 0x1cd   : > { %923 = vst.msk [vmem:[#allocation3 + $0x28] sm:$0xff] %vm917_vm10, %v898_v62 }
 0x1cf   : > { %v980_v63 = vpop.permute.xlu0 %979 }
 0x1d0   : > { %1006 = vst.msk [vmem:[#allocation3 + $0x20] sm:$0xff] %vm1001_vm11, %v980_v63  ;;  %v982_v0 = vpop.permute.xlu1 %981 }
 0x1d1   : > { %1007 = vst.msk [vmem:[#allocation3 + $0x28] sm:$0xff] %vm1001_vm11, %v982_v0 }
 0x1d3   : > { %v1061_v1 = vpop.permute.xlu0 %1060 }
 0x1d4   : > { %1087 = vst.msk [vmem:[#allocation3 + $0x20] sm:$0xff] %vm1082_vm12, %v1061_v1  ;;  %v1063_v2 = vpop.permute.xlu1 %1062 }
 0x1d5   : > { %1088 = vst.msk [vmem:[#allocation3 + $0x28] sm:$0xff] %vm1082_vm12, %v1063_v2 }
 0x1d7   : > { %v1142_v3 = vpop.permute.xlu0 %1141 }
 0x1d8   : > { %1168 = vst.msk [vmem:[#allocation3 + $0x20] sm:$0xff] %vm1163_vm13, %v1142_v3  ;;  %v573_v4 = vpop.permute.xlu1 %572 }
 0x1d9   : > { %597 = vst.msk [vmem:[#allocation3 + $0x30] sm:$0xff] %vm590_vm6, %v573_v4 }
 0x1db   : > { %v1144_v5 = vpop.permute.xlu0 %1143 }
 0x1dc   : > { %1169 = vst.msk [vmem:[#allocation3 + $0x28] sm:$0xff] %vm1163_vm13, %v1144_v5  ;;  %v575_v6 = vpop.permute.xlu1 %574 }
 0x1dd   : > { %598 = vst.msk [vmem:[#allocation3 + $0x38] sm:$0xff] %vm590_vm6, %v575_v6 }
 0x1df   : > { %v654_v7 = vpop.permute.xlu0 %653  ;;  %v1178_v8 = vld [vmem:[#allocation3 + $0x20] sm:$0xff] }
 0x1e0   : > { %678 = vst.msk [vmem:[#allocation3 + $0x30] sm:$0xff] %vm671_vm7, %v654_v7  ;;  %v656_v9 = vpop.permute.xlu1 %655  ;;  %2555 = vmatprep.mubr.msk.bf16.mxu0 %vm1211_vm14, %v1178_v8 }
 0x1e1   : > { %679 = vst.msk [vmem:[#allocation3 + $0x38] sm:$0xff] %vm671_vm7, %v656_v9 }
 0x1e3   : > { %v738_v10 = vpop.permute.xlu0 %737  ;;  %v1179_v11 = vld [vmem:[#allocation3 + $0x28] sm:$0xff] }
 0x1e4   : > { %762 = vst.msk [vmem:[#allocation3 + $0x30] sm:$0xff] %vm755_vm8, %v738_v10  ;;  %v740_v12 = vpop.permute.xlu1 %739  ;;  %2556 = vmatmul.mubr.msk.bf16.gmra.mrb[8].mxu0 %vm1211_vm14, %v1179_v11 }
 0x1e5   : > { %763 = vst.msk [vmem:[#allocation3 + $0x38] sm:$0xff] %vm755_vm8, %v740_v12 }
 0x1e7   : > { %v819_v13 = vpop.permute.xlu0 %818 }
 0x1e8   : > { %843 = vst.msk [vmem:[#allocation3 + $0x30] sm:$0xff] %vm836_vm9, %v819_v13  ;;  %v821_v14 = vpop.permute.xlu1 %820 }
 0x1e9   : > { %844 = vst.msk [vmem:[#allocation3 + $0x38] sm:$0xff] %vm836_vm9, %v821_v14 }
 0x1eb   : > { %v900_v15 = vpop.permute.xlu0 %899 }
 0x1ec   : > { %924 = vst.msk [vmem:[#allocation3 + $0x30] sm:$0xff] %vm917_vm10, %v900_v15  ;;  %v902_v17 = vpop.permute.xlu1 %901 }
 0x1ed   : > { %925 = vst.msk [vmem:[#allocation3 + $0x38] sm:$0xff] %vm917_vm10, %v902_v17 }
 0x1ef   : > { %v984_v18 = vpop.permute.xlu0 %983 }
 0x1f0   : > { %1008 = vst.msk [vmem:[#allocation3 + $0x30] sm:$0xff] %vm1001_vm11, %v984_v18  ;;  %v986_v19 = vpop.permute.xlu1 %985 }
 0x1f1   : > { %1009 = vst.msk [vmem:[#allocation3 + $0x38] sm:$0xff] %vm1001_vm11, %v986_v19 }
 0x1f3   : > { %v1065_v20 = vpop.permute.xlu0 %1064 }
 0x1f4   : > { %1089 = vst.msk [vmem:[#allocation3 + $0x30] sm:$0xff] %vm1082_vm12, %v1065_v20  ;;  %v1067_v21 = vpop.permute.xlu1 %1066 }
 0x1f5   : > { %1090 = vst.msk [vmem:[#allocation3 + $0x38] sm:$0xff] %vm1082_vm12, %v1067_v21 }
 0x1f7   : > { %v1146_v16 = vpop.permute.xlu0 %1145 }
 0x1f8   : > { %1170 = vst.msk [vmem:[#allocation3 + $0x30] sm:$0xff] %vm1163_vm13, %v1146_v16  ;;  %v577_v22 = vpop.permute.xlu1 %576 }
 0x1f9   : > { %599 = vst.msk [vmem:[#allocation3 + $0x40] sm:$0xff] %vm590_vm6, %v577_v22 }
 0x1fb   : > { %v1148_v23 = vpop.permute.xlu0 %1147 }
 0x1fc   : > { %1171 = vst.msk [vmem:[#allocation3 + $0x38] sm:$0xff] %vm1163_vm13, %v1148_v23  ;;  %v579_v24 = vpop.permute.xlu1 %578 }
 0x1fd   : > { %600 = vst.msk [vmem:[#allocation3 + $0x48] sm:$0xff] %vm590_vm6, %v579_v24 }
 0x1ff   : > { %v658_v25 = vpop.permute.xlu0 %657  ;;  %v1180_v26 = vld [vmem:[#allocation3 + $0x30] sm:$0xff] }
 0x200   : > { %680 = vst.msk [vmem:[#allocation3 + $0x40] sm:$0xff] %vm671_vm7, %v658_v25  ;;  %v660_v27 = vpop.permute.xlu1 %659  ;;  %2559 = vmatprep.mubr.msk.bf16.mxu0 %vm1211_vm14, %v1180_v26 }
 0x201   : > { %681 = vst.msk [vmem:[#allocation3 + $0x48] sm:$0xff] %vm671_vm7, %v660_v27 }
 0x203   : > { %v742_v28 = vpop.permute.xlu0 %741  ;;  %v1181_v29 = vld [vmem:[#allocation3 + $0x38] sm:$0xff] }
 0x204   : > { %764 = vst.msk [vmem:[#allocation3 + $0x40] sm:$0xff] %vm755_vm8, %v742_v28  ;;  %v744_v30 = vpop.permute.xlu1 %743  ;;  %2560 = vmatmul.mubr.msk.bf16.gmra.mrb[12].mxu0 %vm1211_vm14, %v1181_v29 }
 0x205   : > { %765 = vst.msk [vmem:[#allocation3 + $0x48] sm:$0xff] %vm755_vm8, %v744_v30 }
 0x207   : > { %v823_v31 = vpop.permute.xlu0 %822 }
 0x208   : > { %845 = vst.msk [vmem:[#allocation3 + $0x40] sm:$0xff] %vm836_vm9, %v823_v31  ;;  %v825_v32 = vpop.permute.xlu1 %824 }
 0x209   : > { %846 = vst.msk [vmem:[#allocation3 + $0x48] sm:$0xff] %vm836_vm9, %v825_v32 }
 0x20b   : > { %v904_v33 = vpop.permute.xlu0 %903 }
 0x20c   : > { %926 = vst.msk [vmem:[#allocation3 + $0x40] sm:$0xff] %vm917_vm10, %v904_v33  ;;  %v906_v34 = vpop.permute.xlu1 %905 }
 0x20d   : > { %927 = vst.msk [vmem:[#allocation3 + $0x48] sm:$0xff] %vm917_vm10, %v906_v34 }
 0x20f   : > { %v988_v35 = vpop.permute.xlu0 %987 }
 0x210   : > { %1010 = vst.msk [vmem:[#allocation3 + $0x40] sm:$0xff] %vm1001_vm11, %v988_v35  ;;  %v990_v36 = vpop.permute.xlu1 %989 }
 0x211   : > { %1011 = vst.msk [vmem:[#allocation3 + $0x48] sm:$0xff] %vm1001_vm11, %v990_v36 }
 0x213   : > { %v1069_v37 = vpop.permute.xlu0 %1068 }
 0x214   : > { %1091 = vst.msk [vmem:[#allocation3 + $0x40] sm:$0xff] %vm1082_vm12, %v1069_v37  ;;  %v1071_v38 = vpop.permute.xlu1 %1070 }
 0x215   : > { %1092 = vst.msk [vmem:[#allocation3 + $0x48] sm:$0xff] %vm1082_vm12, %v1071_v38 }
 0x217   : > { %v1150_v39 = vpop.permute.xlu0 %1149 }
 0x218   : > { %1172 = vst.msk [vmem:[#allocation3 + $0x40] sm:$0xff] %vm1163_vm13, %v1150_v39  ;;  %v1152_v40 = vpop.permute.xlu1 %1151 }
 0x219   : > { %1173 = vst.msk [vmem:[#allocation3 + $0x48] sm:$0xff] %vm1163_vm13, %v1152_v40  ;;  %v3058_v40 = vmov (!%p2349_p3), 0.0  }
 0x21f   : > { %v1182_v41 = vld [vmem:[#allocation3 + $0x40] sm:$0xff] }
 0x220   : > { %2563 = vmatprep.mubr.msk.bf16.mxu0 %vm1211_vm14, %v1182_v41  ;;  %v1183_v42 = vld [vmem:[#allocation3 + $0x48] sm:$0xff] }
 0x221   : > { %2564 = vmatmul.mubr.msk.bf16.gmra.mrb[16].mxu0 %vm1211_vm14, %v1183_v42 }
 0x277   : > { %v2549_v44 = vpop.f32.mrb[0].mxu0 }
 0x278   : > { %v1289_v45 = vadd.f32 %v2549_v44, %v3900_v43  ;;  %v1280_v46 = vpop.f32.mrb[1].mxu0 }
 0x279   : > { %v1281_v47 = vadd.f32 %v3900_v43, %v1280_v46  ;;  %v2550_v48 = vpop.f32.mrb[2].mxu0 }
 0x27a   : > { %v1361_v49 = vmax.f32 %v1289_v45, 0.0  ;;  %v1292_v50 = vadd.f32 %v2550_v48, %v3900_v43  ;;  %v1283_v51 = vpop.f32.mrb[3].mxu0 }
 0x27b   : > { %v1359_v52 = vmax.f32 %v1281_v47, 0.0  ;;  %v1284_v53 = vadd.f32 %v3900_v43, %v1283_v51 }
 0x27c   : > { %1382 = vst.msk [vmem:[#allocation4 + $0x19] sm:$0xff] %vm1379_vm15, %v1361_v49  ;;  %v1362_v54 = vmax.f32 %v1292_v50, 0.0 }
 0x27d   : > { %1380 = vst.msk [vmem:[#allocation4 + $0x1] sm:$0xff] %vm1379_vm15, %v1359_v52  ;;  %v1360_v55 = vmax.f32 %v1284_v53, 0.0 }
 0x27e   : > { %1383 = vst.msk [vmem:[#allocation4 + $0x21] sm:$0xff] %vm1379_vm15, %v1362_v54  ;;  %1403 = vst.msk [vmem:[#allocation4] sm:$0xff] (!%p2349_p3), %vm1379_vm15, %v3058_v40 }
 0x27f   : > { %1381 = vst.msk [vmem:[#allocation4 + $0x9] sm:$0xff] %vm1379_vm15, %v1360_v55 }
 0x280   : > { %1404 = vst.msk [vmem:[#allocation4 + $0x8] sm:$0xff] (!%p2349_p3), %vm1379_vm15, %v3058_v40 }
 0x281   : > { %1406 = vst.msk [vmem:[#allocation4 + $0x10] sm:$0x3] (!%p2349_p3), %vm1405_vm0, %v3058_v40 }
 0x297   : > { %v2553_v56 = vpop.f32.mrb[4].mxu0 }
 0x298   : > { %v1305_v57 = vadd.f32 %v2553_v56, %v3900_v43  ;;  %v1296_v58 = vpop.f32.mrb[5].mxu0 }
 0x299   : > { %v1297_v59 = vadd.f32 %v3900_v43, %v1296_v58  ;;  %v2554_v60 = vpop.f32.mrb[6].mxu0 }
 0x29a   : > { %v1365_v61 = vmax.f32 %v1305_v57, 0.0  ;;  %v1308_v62 = vadd.f32 %v2554_v60, %v3900_v43  ;;  %v1299_v63 = vpop.f32.mrb[7].mxu0 }
 0x29b   : > { %v1363_v0 = vmax.f32 %v1297_v59, 0.0  ;;  %v1300_v1 = vadd.f32 %v3900_v43, %v1299_v63 }
 0x29c   : > { %1386 = vst.msk [vmem:[#allocation4 + $0x49] sm:$0xff] %vm1379_vm15, %v1365_v61  ;;  %v1366_v2 = vmax.f32 %v1308_v62, 0.0 }
 0x29d   : > { %1384 = vst.msk [vmem:[#allocation4 + $0x31] sm:$0xff] %vm1379_vm15, %v1363_v0  ;;  %v1364_v3 = vmax.f32 %v1300_v1, 0.0 }
 0x29e   : > { %1387 = vst.msk [vmem:[#allocation4 + $0x51] sm:$0xff] %vm1379_vm15, %v1366_v2 }
 0x29f   : > { %1385 = vst.msk [vmem:[#allocation4 + $0x39] sm:$0xff] %vm1379_vm15, %v1364_v3 }
 0x2b7   : > { %v2557_v4 = vpop.f32.mrb[8].mxu0 }
 0x2b8   : > { %v1321_v5 = vadd.f32 %v2557_v4, %v3900_v43  ;;  %v1312_v6 = vpop.f32.mrb[9].mxu0 }
 0x2b9   : > { %v1313_v7 = vadd.f32 %v3900_v43, %v1312_v6  ;;  %v2558_v8 = vpop.f32.mrb[10].mxu0 }
 0x2ba   : > { %v1369_v9 = vmax.f32 %v1321_v5, 0.0  ;;  %v1324_v10 = vadd.f32 %v2558_v8, %v3900_v43  ;;  %v1315_v11 = vpop.f32.mrb[11].mxu0 }
 0x2bb   : > { %v1367_v12 = vmax.f32 %v1313_v7, 0.0  ;;  %v1316_v13 = vadd.f32 %v3900_v43, %v1315_v11 }
 0x2bc   : > { %1390 = vst.msk [vmem:[#allocation4 + $0x79] sm:$0xff] %vm1379_vm15, %v1369_v9  ;;  %v1370_v14 = vmax.f32 %v1324_v10, 0.0 }
 0x2bd   : > { %1388 = vst.msk [vmem:[#allocation4 + $0x61] sm:$0xff] %vm1379_vm15, %v1367_v12  ;;  %v1368_v15 = vmax.f32 %v1316_v13, 0.0 }
 0x2be   : > { %1391 = vst.msk [vmem:[#allocation4 + $0x81] sm:$0xff] %vm1379_vm15, %v1370_v14 }
 0x2bf   : > { %1389 = vst.msk [vmem:[#allocation4 + $0x69] sm:$0xff] %vm1379_vm15, %v1368_v15 }
 0x2d7   : > { %v2561_v17 = vpop.f32.mrb[12].mxu0 }
 0x2d8   : > { %v1337_v18 = vadd.f32 %v2561_v17, %v3900_v43  ;;  %v1328_v19 = vpop.f32.mrb[13].mxu0 }
 0x2d9   : > { %v1329_v20 = vadd.f32 %v3900_v43, %v1328_v19  ;;  %v2562_v21 = vpop.f32.mrb[14].mxu0 }
 0x2da   : > { %v1373_v16 = vmax.f32 %v1337_v18, 0.0  ;;  %v1340_v22 = vadd.f32 %v2562_v21, %v3900_v43  ;;  %v1331_v23 = vpop.f32.mrb[15].mxu0 }
 0x2db   : > { %v1371_v24 = vmax.f32 %v1329_v20, 0.0  ;;  %v1332_v25 = vadd.f32 %v3900_v43, %v1331_v23 }
 0x2dc   : > { %1394 = vst.msk [vmem:[#allocation4 + $0xa9] sm:$0xff] %vm1379_vm15, %v1373_v16  ;;  %v1374_v26 = vmax.f32 %v1340_v22, 0.0 }
 0x2dd   : > { %1392 = vst.msk [vmem:[#allocation4 + $0x91] sm:$0xff] %vm1379_vm15, %v1371_v24  ;;  %v1372_v27 = vmax.f32 %v1332_v25, 0.0 }
 0x2de   : > { %1395 = vst.msk [vmem:[#allocation4 + $0xb1] sm:$0xff] %vm1379_vm15, %v1374_v26 }
 0x2df   : > { %1393 = vst.msk [vmem:[#allocation4 + $0x99] sm:$0xff] %vm1379_vm15, %v1372_v27 }
 0x2f4   : > { %v2565_v28 = vpop.f32.mrb[16].mxu0 }
 0x2f5   : > { %v1353_v29 = vadd.f32 %v2565_v28, %v3900_v43  ;;  %v1344_v30 = vpop.f32.mrb[17].mxu0 }
 0x2f6   : > { %v1345_v31 = vadd.f32 %v3900_v43, %v1344_v30  ;;  %v2566_v32 = vpop.f32.mrb[18].mxu0  ;;  %1402 = sbr.rel (%p2349_p3) target bundleno = 765 (0x2fd), region = 68 }
 0x2f7   : > { %v1377_v33 = vmax.f32 %v1353_v29, 0.0  ;;  %v1356_v34 = vadd.f32 %v2566_v32, %v3900_v43  ;;  %v1347_v35 = vpop.f32.mrb[19].mxu0 }
 0x2f8   : > { %v1375_v36 = vmax.f32 %v1345_v31, 0.0  ;;  %v1348_v37 = vadd.f32 %v3900_v43, %v1347_v35 }
 0x2f9   : > { %1398 = vst.msk [vmem:[#allocation4 + $0xd9] sm:$0xff] %vm1379_vm15, %v1377_v33  ;;  %v1378_v38 = vmax.f32 %v1356_v34, 0.0 }
 0x2fa   : > { %1396 = vst.msk [vmem:[#allocation4 + $0xc1] sm:$0xff] %vm1379_vm15, %v1375_v36  ;;  %v1376_v39 = vmax.f32 %v1348_v37, 0.0 }
 0x2fb   : > { %1399 = vst.msk [vmem:[#allocation4 + $0xe1] sm:$0xff] %vm1379_vm15, %v1378_v38 }
 0x2fc   : > { %1397 = vst.msk [vmem:[#allocation4 + $0xc9] sm:$0xff] %vm1379_vm15, %v1376_v39 }
 0x2fd PF: > { %s4284_s9 = sld [smem:[#allocation21_spill]] }
 0x303   : > { %p2491_p1 = scmp.ne.s32.totalorder %s4284_s9, 1 }
 0x304   : > { %vm1414_vm1 = vcmask (!%p2491_p1), 58368   ;;  %v3059_v41 = vmov (!%p2491_p1), 0.0  }
 0x305   : > { %1410 = sbr.rel (%p2491_p1) target bundleno = 780 (0x30c), region = 72  ;;  %1412 = vst.msk [vmem:[#allocation4 + $0xd8] sm:$0xff] (!%p2491_p1), %vm1379_vm15, %v3059_v41  ;;  %1413 = vst.msk [vmem:[#allocation4 + $0xe0] sm:$0xff] (!%p2491_p1), %vm1379_vm15, %v3059_v41 }
 0x306   : > { %1415 = vst.msk [vmem:[#allocation4 + $0xe8] sm:$0x3] (!%p2491_p1), %vm1414_vm1, %v3059_v41 }
 0x30c PF: > { %v1448_v42 = vld [vmem:[#allocation4 + $0x1] sm:$0xff]  ;;  %v1449_v43 = vld [vmem:[#allocation4 + $0x9] sm:$0xff]  ;;  %v1450_v47 = vld [vmem:[#allocation4 + $0x19] sm:$0xff]  ;;  %s3060_s30 = smov 40   ;;  %s3061_s10 = smov 48   ;;  %vm2046_vm2 = vcmask 1043456  }
 0x30d   : > { %v1513_v44 = vld [vmem:[#allocation4 + $0x2] sm:$0xff]  ;;  %v1464_v45 = vpack.c.bf16 %v1449_v43, %v1448_v42  ;;  %v1514_v46 = vld [vmem:[#allocation4 + $0xa] sm:$0xff]  ;;  %v1515_v50 = vld [vmem:[#allocation4 + $0x1a] sm:$0xff]  ;;  %s3062_s7 = smov 56   ;;  %s3063_s6 = smov 64   ;;  %vm1504_vm3 = vcmask 130112  }
 0x30e   : > { %v1451_v48 = vld [vmem:[#allocation4 + $0x21] sm:$0xff]  ;;  %v1529_v49 = vpack.c.bf16 %v1514_v46, %v1513_v44  ;;  %v1579_v52 = vld [vmem:[#allocation4 + $0x18] sm:$0xff]  ;;  %v1581_v55 = vld [vmem:[#allocation4 + $0x30] sm:$0xff]  ;;  %vm1569_vm4 = vcmask 195712   ;;  %vm1635_vm5 = vcmask 261312   ;;  %vm1700_vm6 = vcmask 326912  }
 0x30f   : > { %v1516_v51 = vld [vmem:[#allocation4 + $0x22] sm:$0xff]  ;;  %1480 = vrot.lane.b32.xlu0 %v1464_v45, %s3051_s12  ;;  %v1465_v53 = vpack.c.bf16 %v1451_v48, %v1450_v47  ;;  %v1582_v56 = vld [vmem:[#allocation4 + $0x38] sm:$0xff]  ;;  %v1778_v61 = vld [vmem:[#allocation4 + $0x50] sm:$0xff]  ;;  %vm1765_vm7 = vcmask 392512   ;;  %vm1831_vm8 = vcmask 458112   ;;  %vm1896_vm9 = vcmask 523712  }
 0x310   : > { %v1580_v54 = vld [vmem:[#allocation4 + $0x20] sm:$0xff]  ;;  %1545 = vrot.lane.b32.xlu1 %v1529_v49, %s3053_s15  ;;  %v1530_v57 = vpack.c.bf16 %v1516_v51, %v1515_v50  ;;  %v1596_v59 = vpack.c.bf16 %v1582_v56, %v1581_v55  ;;  %v1777_v60 = vld [vmem:[#allocation4 + $0x48] sm:$0xff]  ;;  %v1646_v1 = vld [vmem:[#allocation4 + $0x31] sm:$0xff]  ;;  %vm1961_vm10 = vcmask 589312   ;;  %vm2021_vm11 = vcmask 588800   ;;  %s4285_s1 = sld [smem:[#allocation21_spill]] }
 0x311   : > { %v1595_v58 = vpack.c.bf16 %v1580_v54, %v1579_v52  ;;  %v3951_v62 = vpack.c.bf16 %v1778_v61, %v1777_v60  ;;  %v1585_v63 = vld [vmem:[#allocation4 + $0x60] sm:$0xff]  ;;  %v1586_v0 = vld [vmem:[#allocation4 + $0x68] sm:$0xff]  ;;  %v1781_v4 = vld [vmem:[#allocation4 + $0x78] sm:$0xff]  ;;  %s4286_s17 = sld [smem:[#allocation22_spill]]  ;;  %s2196_s18 = sshll.u32 %s3365_s5, 4  ;;  %s4172_s18 = int_to_ptr.vmem [resolvable:$true] %s2196_s18 }
 0x312   : > { %1442 = vst.msk [vmem:[#allocation5 + $0x10] sm:$0xff] %vm1379_vm15, %v1596_v59  ;;  %v3957_v2 = vpack.c.bf16 %v1586_v0, %v1585_v63  ;;  %v1647_v3 = vld [vmem:[#allocation4 + $0x39] sm:$0xff]  ;;  %v1589_v7 = vld [vmem:[#allocation4 + $0x90] sm:$0xff]  ;;  %v1785_v13 = vld [vmem:[#allocation4 + $0xa8] sm:$0xff] }
 0x313   : > { %1441 = vst.msk [vmem:[#allocation5 + $0x8] sm:$0xff] %vm1379_vm15, %v1595_v58  ;;  %1482 = vrot.lane.b32.xlu0 %v1465_v53, %s3051_s12  ;;  %1443 = vst.msk [vmem:[#allocation5 + $0x18] sm:$0xff] %vm1379_vm15, %v3951_v62  ;;  %v1782_v5 = vld [vmem:[#allocation4 + $0x80] sm:$0xff]  ;;  %v1590_v8 = vld [vmem:[#allocation4 + $0x98] sm:$0xff]  ;;  %v1661_v9 = vpack.c.bf16 %v1647_v3, %v1646_v1 }
 0x314   : > { %1547 = vrot.lane.b32.xlu1 %v1530_v57, %s3053_s15  ;;  %v3961_v6 = vpack.c.bf16 %v1782_v5, %v1781_v4  ;;  %1444 = vst.msk [vmem:[#allocation5 + $0x20] sm:$0xff] %vm1379_vm15, %v3957_v2  ;;  %v1711_v10 = vld [vmem:[#allocation4 + $0x32] sm:$0xff]  ;;  %v3967_v11 = vpack.c.bf16 %v1590_v8, %v1589_v7  ;;  %v1712_v12 = vld [vmem:[#allocation4 + $0x3a] sm:$0xff]  ;;  %v1417_v19 = vld [vmem:[#allocation4 + $0x8] sm:$0xff] }
 0x315   : > { %v1786_v14 = vld [vmem:[#allocation4 + $0xb0] sm:$0xff]  ;;  %v1726_v17 = vpack.c.bf16 %v1712_v12, %v1711_v10  ;;  %v1416_v18 = vld [vmem:[#allocation4] sm:$0xff]  ;;  %v1789_v1 = vld [vmem:[#allocation4 + $0xd8] sm:$0xff] }
 0x316   : > { %1445 = vst.msk [vmem:[#allocation5 + $0x28] sm:$0xff] %vm1379_vm15, %v3961_v6  ;;  %v3971_v15 = vpack.c.bf16 %v1786_v14, %v1785_v13  ;;  %1446 = vst.msk [vmem:[#allocation5 + $0x30] sm:$0xff] %vm1379_vm15, %v3967_v11  ;;  %v1432_v20 = vpack.c.bf16 %v1417_v19, %v1416_v18  ;;  %v1842_v21 = vld [vmem:[#allocation4 + $0x49] sm:$0xff]  ;;  %v1843_v16 = vld [vmem:[#allocation4 + $0x51] sm:$0xff]  ;;  %s2514_s24 = sshll.u32 %s4285_s1, 4  ;;  %s3064_s1 = smov [#allocation15]  }
 0x317   : > { %1611 = vrot.lane.b32.xlu0 %v1595_v58, %s3055_s21  ;;  %v2761_v22 = vld [vmem:[#allocation12] sm:$0xff]   ;;  %v2762_v23 = vld [vmem:[#allocation12 + $0x8] sm:$0xff]   ;;  %v1857_v24 = vpack.c.bf16 %v1843_v16, %v1842_v21  ;;  %v2763_v25 = vld [vmem:[#allocation12 + $0x10] sm:$0xff]   ;;  %s2509_s8 = sshll.u32 %s4286_s17, 5  ;;  %s2912_s17 = sshll.u32 %s3064_s1, 4  ;;  %s2913_s17 = int_to_ptr.vmem [resolvable:$false] %s2912_s17 }
 0x318   : > { %1613 = vrot.lane.b32.xlu1 %v1596_v59, %s3055_s21  ;;  %1447 = vst.msk [vmem:[#allocation5 + $0x38] sm:$0xff] %vm1379_vm15, %v3971_v15  ;;  %1440 = vst.msk [vmem:[#allocation5] sm:$0xff] %vm1379_vm15, %v1432_v20  ;;  %2567 = vmatprep.subr.bf16.mxu1 %v2761_v22  ;;  %v1907_v26 = vld [vmem:[#allocation4 + $0x4a] sm:$0xff]  ;;  %v1908_v27 = vld [vmem:[#allocation4 + $0x52] sm:$0xff]  ;;  %p2915_p11 = scmp.lt.s32.totalorder %s4172_s18, %s2913_s17 }
 0x319   : > { %2568 = vmatpush3.bf16.msra.mxu1 %v2761_v22  ;;  %v2764_v28 = vld [vmem:[#allocation12 + $0x18] sm:$0xff]   ;;  %v1922_v29 = vpack.c.bf16 %v1908_v27, %v1907_v26  ;;  %v2765_v30 = vld [vmem:[#allocation12 + $0x20] ss:$0 sps:$4 sm:$0xff]   ;;  %v1651_v33 = vld [vmem:[#allocation4 + $0x69] sm:$0xff] }
 0x31a   : > { %2569 = vmatprep.subr.bf16.mxu1 %v2762_v23  ;;  %v2048_v31 = vsel %vm2046_vm2, %v2765_v30, 0  ;;  %v1650_v32 = vld [vmem:[#allocation4 + $0x61] sm:$0xff]  ;;  %v1716_v36 = vld [vmem:[#allocation4 + $0x6a] sm:$0xff]  ;;  %v1846_v38 = vld [vmem:[#allocation4 + $0x79] sm:$0xff] }
 0x31b   : > { %1676 = vrot.lane.b32.xlu0 %v1465_v53, %s3057_s25  ;;  %v1663_v34 = vpack.c.bf16 %v1651_v33, %v1650_v32  ;;  %v1715_v35 = vld [vmem:[#allocation4 + $0x62] sm:$0xff]  ;;  %v1911_v41 = vld [vmem:[#allocation4 + $0x7a] sm:$0xff]  ;;  %v1654_v44 = vld [vmem:[#allocation4 + $0x91] sm:$0xff] }
 0x31c   : > { %1678 = vrot.lane.b32.xlu1 %v1661_v9, %s3057_s25  ;;  %v1728_v37 = vpack.c.bf16 %v1716_v36, %v1715_v35  ;;  %v1847_v39 = vld [vmem:[#allocation4 + $0x81] sm:$0xff]  ;;  %v1655_v45 = vld [vmem:[#allocation4 + $0x99] sm:$0xff]  ;;  %v1850_v50 = vld [vmem:[#allocation4 + $0xa9] sm:$0xff] }
 0x31d   : > { %2570 = vmatpush3.bf16.msra.mxu1 %v2762_v23  ;;  %v1859_v40 = vpack.c.bf16 %v1847_v39, %v1846_v38  ;;  %v1912_v42 = vld [vmem:[#allocation4 + $0x82] sm:$0xff]  ;;  %v1665_v46 = vpack.c.bf16 %v1655_v45, %v1654_v44  ;;  %v1719_v47 = vld [vmem:[#allocation4 + $0x92] sm:$0xff]  ;;  %v1720_v48 = vld [vmem:[#allocation4 + $0x9a] sm:$0xff] }
 0x31e   : > { %2571 = vmatprep.subr.bf16.mxu1 %v2763_v25  ;;  %v1924_v43 = vpack.c.bf16 %v1912_v42, %v1911_v41  ;;  %v1730_v49 = vpack.c.bf16 %v1720_v48, %v1719_v47  ;;  %v1851_v51 = vld [vmem:[#allocation4 + $0xb1] sm:$0xff]  ;;  %v1593_v56 = vld [vmem:[#allocation4 + $0xc0] sm:$0xff]  ;;  %v1659_v60 = vld [vmem:[#allocation4 + $0xc9] sm:$0xff] }
 0x31f   : > { %1741 = vrot.lane.b32.xlu0 %v1530_v57, %s3060_s30  ;;  %v1861_v52 = vpack.c.bf16 %v1851_v51, %v1850_v50  ;;  %v1915_v53 = vld [vmem:[#allocation4 + $0xaa] sm:$0xff]  ;;  %v1916_v54 = vld [vmem:[#allocation4 + $0xb2] sm:$0xff]  ;;  %v1919_v10 = vld [vmem:[#allocation4 + $0xda] sm:$0xff] }
 0x320   : > { %1743 = vrot.lane.b32.xlu1 %v1726_v17, %s3060_s30  ;;  %v1926_v55 = vpack.c.bf16 %v1916_v54, %v1915_v53  ;;  %v1594_v57 = vld [vmem:[#allocation4 + $0xc8] sm:$0xff]  ;;  %v1854_v5 = vld [vmem:[#allocation4 + $0xd9] sm:$0xff] }
 0x321   : > { %2572 = vmatpush3.bf16.msra.mxu1 %v2763_v25  ;;  %v1602_v58 = vpack.c.bf16 %v1594_v57, %v1593_v56  ;;  %v1724_v63 = vld [vmem:[#allocation4 + $0xca] sm:$0xff] }
 0x322   : > { %2573 = vmatprep.subr.bf16.mxu1 %v2764_v28 }
 0x323   : > { %1807 = vrot.lane.b32.xlu0 %v1596_v59, %s3061_s10  ;;  %v1658_v59 = vld [vmem:[#allocation4 + $0xc1] sm:$0xff] }
 0x324   : > { %1809 = vrot.lane.b32.xlu1 %v3951_v62, %s3061_s10  ;;  %v1667_v61 = vpack.c.bf16 %v1659_v60, %v1658_v59 }
 0x325   : > { %2574 = vmatpush3.bf16.msra.mxu1 %v2764_v28 }
 0x326   : > { %2594 = vmatprep.subr.msk.bf16.mxu1 %vm2046_vm2, %v2765_v30 }
 0x327   : > { %1872 = vrot.lane.b32.xlu0 %v1661_v9, %s3062_s7 }
 0x328   : > { %1874 = vrot.lane.b32.xlu1 %v1857_v24, %s3062_s7 }
 0x329   : > { %2576 = vmatpush3.bf16.msra.mxu1 %v2048_v31 }
 0x32b   : > { %1937 = vrot.lane.b32.xlu0 %v1726_v17, %s3063_s6 }
 0x32c   : > { %1484 = vrot.lane.b32.xlu1 %v1661_v9, %s3051_s12 }
 0x32f   : > { %1939 = vrot.lane.b32.xlu0 %v1922_v29, %s3063_s6 }
 0x330   : > { %1486 = vrot.lane.b32.xlu1 %v1857_v24, %s3051_s12 }
 0x333   : > { %1549 = vrot.lane.b32.xlu0 %v1726_v17, %s3053_s15 }
 0x334   : > { %1551 = vrot.lane.b32.xlu1 %v1922_v29, %s3053_s15 }
 0x337   : > { %1615 = vrot.lane.b32.xlu0 %v3951_v62, %s3055_s21  ;;  %v1723_v62 = vld [vmem:[#allocation4 + $0xc2] sm:$0xff] }
 0x338   : > { %1617 = vrot.lane.b32.xlu1 %v3957_v2, %s3055_s21  ;;  %v1732_v0 = vpack.c.bf16 %v1724_v63, %v1723_v62 }
 0x33b   : > { %1680 = vrot.lane.b32.xlu0 %v1857_v24, %s3057_s25 }
 0x33c   : > { %1682 = vrot.lane.b32.xlu1 %v1663_v34, %s3057_s25 }
 0x33f   : > { %1745 = vrot.lane.b32.xlu0 %v1922_v29, %s3060_s30 }
 0x340   : > { %1747 = vrot.lane.b32.xlu1 %v1728_v37, %s3060_s30 }
 0x343   : > { %1811 = vrot.lane.b32.xlu0 %v3957_v2, %s3061_s10  ;;  %v1790_v2 = vld [vmem:[#allocation4 + $0xe0] sm:$0xff] }
 0x344   : > { %1813 = vrot.lane.b32.xlu1 %v3961_v6, %s3061_s10  ;;  %v1798_v3 = vpack.c.bf16 %v1790_v2, %v1789_v1 }
 0x347   : > { %1876 = vrot.lane.b32.xlu0 %v1663_v34, %s3062_s7 }
 0x348   : > { %1878 = vrot.lane.b32.xlu1 %v1859_v40, %s3062_s7 }
 0x34b   : > { %1941 = vrot.lane.b32.xlu0 %v1728_v37, %s3063_s6 }
 0x34c   : > { %1488 = vrot.lane.b32.xlu1 %v1663_v34, %s3051_s12 }
 0x34f   : > { %1943 = vrot.lane.b32.xlu0 %v1924_v43, %s3063_s6 }
 0x350   : > { %1490 = vrot.lane.b32.xlu1 %v1859_v40, %s3051_s12 }
 0x353   : > { %1553 = vrot.lane.b32.xlu0 %v1728_v37, %s3053_s15 }
 0x354   : > { %1555 = vrot.lane.b32.xlu1 %v1924_v43, %s3053_s15 }
 0x357   : > { %1619 = vrot.lane.b32.xlu0 %v3961_v6, %s3055_s21  ;;  %v1855_v6 = vld [vmem:[#allocation4 + $0xe1] sm:$0xff] }
 0x358   : > { %1621 = vrot.lane.b32.xlu1 %v3967_v11, %s3055_s21  ;;  %v1863_v8 = vpack.c.bf16 %v1855_v6, %v1854_v5 }
 0x35b   : > { %1684 = vrot.lane.b32.xlu0 %v1859_v40, %s3057_s25 }
 0x35c   : > { %1686 = vrot.lane.b32.xlu1 %v1665_v46, %s3057_s25 }
 0x35f   : > { %1749 = vrot.lane.b32.xlu0 %v1924_v43, %s3060_s30 }
 0x360   : > { %1751 = vrot.lane.b32.xlu1 %v1730_v49, %s3060_s30 }
 0x363   : > { %1815 = vrot.lane.b32.xlu0 %v3967_v11, %s3061_s10  ;;  %v1920_v11 = vld [vmem:[#allocation4 + $0xe2] sm:$0xff] }
 0x364   : > { %1817 = vrot.lane.b32.xlu1 %v3971_v15, %s3061_s10  ;;  %v1928_v13 = vpack.c.bf16 %v1920_v11, %v1919_v10 }
 0x367   : > { %1880 = vrot.lane.b32.xlu0 %v1665_v46, %s3062_s7 }
 0x368   : > { %1882 = vrot.lane.b32.xlu1 %v1861_v52, %s3062_s7 }
 0x36b   : > { %1945 = vrot.lane.b32.xlu0 %v1730_v49, %s3063_s6 }
 0x36c   : > { %1492 = vrot.lane.b32.xlu1 %v1665_v46, %s3051_s12 }
 0x36f   : > { %1947 = vrot.lane.b32.xlu0 %v1926_v55, %s3063_s6 }
 0x370   : > { %1494 = vrot.lane.b32.xlu1 %v1861_v52, %s3051_s12 }
 0x373   : > { %1557 = vrot.lane.b32.xlu0 %v1730_v49, %s3053_s15 }
 0x374   : > { %1559 = vrot.lane.b32.xlu1 %v1926_v55, %s3053_s15  ;;  %s2193_s15 = sadd.s32 %s2514_s24, %s2509_s8  ;;  %s2914_s24 = scalar_lea.vmem %s2913_s17, 4096 }
 0x375   : > { %s2510_s29 = sshll.u32 %s2193_s15, 7 }
 0x377   : > { %1623 = vrot.lane.b32.xlu0 %v3971_v15, %s3055_s21 }
 0x378   : > { %1625 = vrot.lane.b32.xlu1 %v1602_v58, %s3055_s21  ;;  %s4287_s21 = sld [smem:[#allocation23_spill]] }
 0x37b   : > { %1688 = vrot.lane.b32.xlu0 %v1861_v52, %s3057_s25 }
 0x37c   : > { %1690 = vrot.lane.b32.xlu1 %v1667_v61, %s3057_s25 }
 0x37e   : > { %p4289_p6 = scmp.ne.s32.totalorder %s4287_s21, 0 }
 0x37f   : > { %1753 = vrot.lane.b32.xlu0 %v1926_v55, %s3060_s30 }
 0x380   : > { %1755 = vrot.lane.b32.xlu1 %v1732_v0, %s3060_s30  ;;  %s4288_s30 = sld [smem:[#allocation27_spill]] }
 0x381   : > { %v1481_v4 = vpop.permute.xlu0 %1480 }
 0x382   : > { %1505 = vst.msk [vmem:[#allocation5] sm:$0xff] %vm1504_vm3, %v1481_v4  ;;  %v1546_v7 = vpop.permute.xlu1 %1545 }
 0x383   : > { %1570 = vst.msk [vmem:[#allocation5] sm:$0xff] %vm1569_vm4, %v1546_v7  ;;  %1819 = vrot.lane.b32.xlu0 %v1602_v58, %s3061_s10 }
 0x384   : > { %1821 = vrot.lane.b32.xlu1 %v1798_v3, %s3061_s10 }
 0x385   : > { %v1483_v9 = vpop.permute.xlu0 %1482 }
 0x386   : > { %1506 = vst.msk [vmem:[#allocation5 + $0x8] sm:$0xff] %vm1504_vm3, %v1483_v9  ;;  %v1548_v12 = vpop.permute.xlu1 %1547  ;;  %s4168_s10 = scalar_lea.hbm %s4288_s30, %s2510_s29 }
 0x387   : > { %1571 = vst.msk [vmem:[#allocation5 + $0x8] sm:$0xff] %vm1569_vm4, %v1548_v12  ;;  %1884 = vrot.lane.b32.xlu0 %v1667_v61, %s3062_s7 }
 0x388   : > { %1886 = vrot.lane.b32.xlu1 %v1863_v8, %s3062_s7  ;;  %s4180_s7 = scalar_lea.sflag [#allocation8], %s308_s2 }
 0x389   : > { %v1612_v14 = vpop.permute.xlu0 %1611 }
 0x38a   : > { %1636 = vst.msk [vmem:[#allocation5] sm:$0xff] %vm1635_vm5, %v1612_v14  ;;  %v1614_v15 = vpop.permute.xlu1 %1613 }
 0x38b   : > { %1637 = vst.msk [vmem:[#allocation5 + $0x8] sm:$0xff] %vm1635_vm5, %v1614_v15  ;;  %1949 = vrot.lane.b32.xlu0 %v1732_v0, %s3063_s6 }
 0x38c   : > { %1951 = vrot.lane.b32.xlu1 %v1928_v13, %s3063_s6  ;;  %s2908_s6 = scalar_lea.vmem %s4172_s18, 2048 }
 0x38d   : > { %v1677_v17 = vpop.permute.xlu0 %1676  ;;  %p2909_p4 = scmp.ne.s32.totalorder %s4172_s18, %s2908_s6  ;;  %p2916_p5 = scmp.lt.s32.totalorder %s2914_s24, %s2908_s6 }
 0x38e   : > { %1701 = vst.msk [vmem:[#allocation5] sm:$0xff] %vm1700_vm6, %v1677_v17  ;;  %v1679_v18 = vpop.permute.xlu1 %1678 }
 0x38f   : > { %1702 = vst.msk [vmem:[#allocation5 + $0x8] sm:$0xff] %vm1700_vm6, %v1679_v18  ;;  %p2910_p13 = pnand %p2909_p4, %p4289_p6  ;;  %p2917_p8 = por %p2916_p5, %p2915_p11 }
 0x391   : > { %v1742_v19 = vpop.permute.xlu0 %1741  ;;  %p2911_p10 = pneg %p2910_p13 }
 0x392   : > { %1766 = vst.msk [vmem:[#allocation5] sm:$0xff] %vm1765_vm7, %v1742_v19  ;;  %v1744_v20 = vpop.permute.xlu1 %1743  ;;  %v4118_v19 = vld [vmem:[#allocation14] ss:$0 sm:$0xff] }
 0x393   : > { %1767 = vst.msk [vmem:[#allocation5 + $0x8] sm:$0xff] %vm1765_vm7, %v1744_v20  ;;  %p2918_p12 = pnand %p2917_p8, %p2911_p10 }
 0x395   : > { %v1808_v21 = vpop.permute.xlu0 %1807 }
 0x396   : > { %1832 = vst.msk [vmem:[#allocation5] sm:$0xff] %vm1831_vm8, %v1808_v21  ;;  %v1810_v16 = vpop.permute.xlu1 %1809 }
 0x397   : > { %1833 = vst.msk [vmem:[#allocation5 + $0x8] sm:$0xff] %vm1831_vm8, %v1810_v16 }
 0x399   : > { %v1873_v22 = vpop.permute.xlu0 %1872 }
 0x39a   : > { %1897 = vst.msk [vmem:[#allocation5] sm:$0xff] %vm1896_vm9, %v1873_v22  ;;  %v1875_v23 = vpop.permute.xlu1 %1874 }
 0x39b   : > { %1898 = vst.msk [vmem:[#allocation5 + $0x8] sm:$0xff] %vm1896_vm9, %v1875_v23 }
 0x39d   : > { %v1938_v24 = vpop.permute.xlu0 %1937 }
 0x39e   : > { %1962 = vst.msk [vmem:[#allocation5] sm:$0xff] %vm1961_vm10, %v1938_v24  ;;  %v1485_v25 = vpop.permute.xlu1 %1484 }
 0x39f   : > { %1507 = vst.msk [vmem:[#allocation5 + $0x10] sm:$0xff] %vm1504_vm3, %v1485_v25 }
 0x3a1   : > { %v1940_v26 = vpop.permute.xlu0 %1939 }
 0x3a2   : > { %1963 = vst.msk [vmem:[#allocation5 + $0x8] sm:$0xff] %vm1961_vm10, %v1940_v26  ;;  %v1487_v27 = vpop.permute.xlu1 %1486 }
 0x3a3   : > { %1508 = vst.msk [vmem:[#allocation5 + $0x18] sm:$0xff] %vm1504_vm3, %v1487_v27 }
 0x3a5   : > { %v1550_v28 = vpop.permute.xlu0 %1549  ;;  %v1970_v29 = vld [vmem:[#allocation5] sm:$0xff] }
 0x3a6   : > { %1572 = vst.msk [vmem:[#allocation5 + $0x10] sm:$0xff] %vm1569_vm4, %v1550_v28  ;;  %v1552_v30 = vpop.permute.xlu1 %1551  ;;  %2577 = vmatprep.mubr.msk.bf16.mxu1 %vm2021_vm11, %v1970_v29 }
 0x3a7   : > { %1573 = vst.msk [vmem:[#allocation5 + $0x18] sm:$0xff] %vm1569_vm4, %v1552_v30 }
 0x3a9   : > { %v1616_v31 = vpop.permute.xlu0 %1615  ;;  %v1971_v32 = vld [vmem:[#allocation5 + $0x8] sm:$0xff] }
 0x3aa   : > { %1638 = vst.msk [vmem:[#allocation5 + $0x10] sm:$0xff] %vm1635_vm5, %v1616_v31  ;;  %v1618_v33 = vpop.permute.xlu1 %1617  ;;  %2578 = vmatmul.mubr.msk.bf16.vlgmr.msra.gmra.mrb[0].mxu1 %vm2021_vm11, %v1971_v32 }
 0x3ab   : > { %1639 = vst.msk [vmem:[#allocation5 + $0x18] sm:$0xff] %vm1635_vm5, %v1618_v33 }
 0x3ad   : > { %v1681_v34 = vpop.permute.xlu0 %1680 }
 0x3ae   : > { %1703 = vst.msk [vmem:[#allocation5 + $0x10] sm:$0xff] %vm1700_vm6, %v1681_v34  ;;  %v1683_v35 = vpop.permute.xlu1 %1682 }
 0x3af   : > { %1704 = vst.msk [vmem:[#allocation5 + $0x18] sm:$0xff] %vm1700_vm6, %v1683_v35 }
 0x3b1   : > { %v1746_v36 = vpop.permute.xlu0 %1745 }
 0x3b2   : > { %1768 = vst.msk [vmem:[#allocation5 + $0x10] sm:$0xff] %vm1765_vm7, %v1746_v36  ;;  %v1748_v37 = vpop.permute.xlu1 %1747 }
 0x3b3   : > { %1769 = vst.msk [vmem:[#allocation5 + $0x18] sm:$0xff] %vm1765_vm7, %v1748_v37 }
 0x3b5   : > { %v1812_v38 = vpop.permute.xlu0 %1811 }
 0x3b6   : > { %1834 = vst.msk [vmem:[#allocation5 + $0x10] sm:$0xff] %vm1831_vm8, %v1812_v38  ;;  %v1814_v39 = vpop.permute.xlu1 %1813 }
 0x3b7   : > { %1835 = vst.msk [vmem:[#allocation5 + $0x18] sm:$0xff] %vm1831_vm8, %v1814_v39 }
 0x3b9   : > { %v1877_v40 = vpop.permute.xlu0 %1876 }
 0x3ba   : > { %1899 = vst.msk [vmem:[#allocation5 + $0x10] sm:$0xff] %vm1896_vm9, %v1877_v40  ;;  %v1879_v41 = vpop.permute.xlu1 %1878 }
 0x3bb   : > { %1900 = vst.msk [vmem:[#allocation5 + $0x18] sm:$0xff] %vm1896_vm9, %v1879_v41 }
 0x3bd   : > { %v1942_v42 = vpop.permute.xlu0 %1941 }
 0x3be   : > { %1964 = vst.msk [vmem:[#allocation5 + $0x10] sm:$0xff] %vm1961_vm10, %v1942_v42  ;;  %v1489_v43 = vpop.permute.xlu1 %1488 }
 0x3bf   : > { %1509 = vst.msk [vmem:[#allocation5 + $0x20] sm:$0xff] %vm1504_vm3, %v1489_v43 }
 0x3c1   : > { %v1944_v44 = vpop.permute.xlu0 %1943 }
 0x3c2   : > { %1965 = vst.msk [vmem:[#allocation5 + $0x18] sm:$0xff] %vm1961_vm10, %v1944_v44  ;;  %v1491_v45 = vpop.permute.xlu1 %1490 }
 0x3c3   : > { %1510 = vst.msk [vmem:[#allocation5 + $0x28] sm:$0xff] %vm1504_vm3, %v1491_v45 }
 0x3c5   : > { %v1554_v46 = vpop.permute.xlu0 %1553  ;;  %v1972_v47 = vld [vmem:[#allocation5 + $0x10] sm:$0xff] }
 0x3c6   : > { %1574 = vst.msk [vmem:[#allocation5 + $0x20] sm:$0xff] %vm1569_vm4, %v1554_v46  ;;  %v1556_v48 = vpop.permute.xlu1 %1555  ;;  %2581 = vmatprep.mubr.msk.bf16.mxu1 %vm2021_vm11, %v1972_v47 }
 0x3c7   : > { %1575 = vst.msk [vmem:[#allocation5 + $0x28] sm:$0xff] %vm1569_vm4, %v1556_v48 }
 0x3c9   : > { %v1620_v49 = vpop.permute.xlu0 %1619  ;;  %v1973_v50 = vld [vmem:[#allocation5 + $0x18] sm:$0xff] }
 0x3ca   : > { %1640 = vst.msk [vmem:[#allocation5 + $0x20] sm:$0xff] %vm1635_vm5, %v1620_v49  ;;  %v1622_v51 = vpop.permute.xlu1 %1621  ;;  %2582 = vmatmul.mubr.msk.bf16.gmra.mrb[4].mxu1 %vm2021_vm11, %v1973_v50 }
 0x3cb   : > { %1641 = vst.msk [vmem:[#allocation5 + $0x28] sm:$0xff] %vm1635_vm5, %v1622_v51 }
 0x3cd   : > { %v1685_v52 = vpop.permute.xlu0 %1684 }
 0x3ce   : > { %1705 = vst.msk [vmem:[#allocation5 + $0x20] sm:$0xff] %vm1700_vm6, %v1685_v52  ;;  %v1687_v53 = vpop.permute.xlu1 %1686 }
 0x3cf   : > { %1706 = vst.msk [vmem:[#allocation5 + $0x28] sm:$0xff] %vm1700_vm6, %v1687_v53 }
 0x3d1   : > { %v1750_v54 = vpop.permute.xlu0 %1749 }
 0x3d2   : > { %1770 = vst.msk [vmem:[#allocation5 + $0x20] sm:$0xff] %vm1765_vm7, %v1750_v54  ;;  %v1752_v55 = vpop.permute.xlu1 %1751 }
 0x3d3   : > { %1771 = vst.msk [vmem:[#allocation5 + $0x28] sm:$0xff] %vm1765_vm7, %v1752_v55 }
 0x3d5   : > { %v1816_v56 = vpop.permute.xlu0 %1815 }
 0x3d6   : > { %1836 = vst.msk [vmem:[#allocation5 + $0x20] sm:$0xff] %vm1831_vm8, %v1816_v56  ;;  %v1818_v57 = vpop.permute.xlu1 %1817 }
 0x3d7   : > { %1837 = vst.msk [vmem:[#allocation5 + $0x28] sm:$0xff] %vm1831_vm8, %v1818_v57 }
 0x3d9   : > { %v1881_v58 = vpop.permute.xlu0 %1880 }
 0x3da   : > { %1901 = vst.msk [vmem:[#allocation5 + $0x20] sm:$0xff] %vm1896_vm9, %v1881_v58  ;;  %v1883_v59 = vpop.permute.xlu1 %1882 }
 0x3db   : > { %1902 = vst.msk [vmem:[#allocation5 + $0x28] sm:$0xff] %vm1896_vm9, %v1883_v59 }
 0x3dd   : > { %v1946_v60 = vpop.permute.xlu0 %1945 }
 0x3de   : > { %1966 = vst.msk [vmem:[#allocation5 + $0x20] sm:$0xff] %vm1961_vm10, %v1946_v60  ;;  %v1493_v61 = vpop.permute.xlu1 %1492 }
 0x3df   : > { %1511 = vst.msk [vmem:[#allocation5 + $0x30] sm:$0xff] %vm1504_vm3, %v1493_v61 }
 0x3e1   : > { %v1948_v62 = vpop.permute.xlu0 %1947 }
 0x3e2   : > { %1967 = vst.msk [vmem:[#allocation5 + $0x28] sm:$0xff] %vm1961_vm10, %v1948_v62  ;;  %v1495_v63 = vpop.permute.xlu1 %1494 }
 0x3e3   : > { %1512 = vst.msk [vmem:[#allocation5 + $0x38] sm:$0xff] %vm1504_vm3, %v1495_v63 }
 0x3e5   : > { %v1558_v0 = vpop.permute.xlu0 %1557  ;;  %v1974_v1 = vld [vmem:[#allocation5 + $0x20] sm:$0xff] }
 0x3e6   : > { %1576 = vst.msk [vmem:[#allocation5 + $0x30] sm:$0xff] %vm1569_vm4, %v1558_v0  ;;  %v1560_v2 = vpop.permute.xlu1 %1559  ;;  %2585 = vmatprep.mubr.msk.bf16.mxu1 %vm2021_vm11, %v1974_v1 }
 0x3e7   : > { %1577 = vst.msk [vmem:[#allocation5 + $0x38] sm:$0xff] %vm1569_vm4, %v1560_v2 }
 0x3e9   : > { %v1624_v3 = vpop.permute.xlu0 %1623  ;;  %v1975_v4 = vld [vmem:[#allocation5 + $0x28] sm:$0xff] }
 0x3ea   : > { %1642 = vst.msk [vmem:[#allocation5 + $0x30] sm:$0xff] %vm1635_vm5, %v1624_v3  ;;  %v1626_v5 = vpop.permute.xlu1 %1625  ;;  %2586 = vmatmul.mubr.msk.bf16.gmra.mrb[8].mxu1 %vm2021_vm11, %v1975_v4 }
 0x3eb   : > { %1643 = vst.msk [vmem:[#allocation5 + $0x38] sm:$0xff] %vm1635_vm5, %v1626_v5 }
 0x3ed   : > { %v1689_v6 = vpop.permute.xlu0 %1688 }
 0x3ee   : > { %1707 = vst.msk [vmem:[#allocation5 + $0x30] sm:$0xff] %vm1700_vm6, %v1689_v6  ;;  %v1691_v7 = vpop.permute.xlu1 %1690 }
 0x3ef   : > { %1708 = vst.msk [vmem:[#allocation5 + $0x38] sm:$0xff] %vm1700_vm6, %v1691_v7 }
 0x3f1   : > { %v1754_v8 = vpop.permute.xlu0 %1753 }
 0x3f2   : > { %1772 = vst.msk [vmem:[#allocation5 + $0x30] sm:$0xff] %vm1765_vm7, %v1754_v8  ;;  %v1756_v9 = vpop.permute.xlu1 %1755 }
 0x3f3   : > { %1773 = vst.msk [vmem:[#allocation5 + $0x38] sm:$0xff] %vm1765_vm7, %v1756_v9 }
 0x3f5   : > { %v1820_v10 = vpop.permute.xlu0 %1819 }
 0x3f6   : > { %1838 = vst.msk [vmem:[#allocation5 + $0x30] sm:$0xff] %vm1831_vm8, %v1820_v10  ;;  %v1822_v11 = vpop.permute.xlu1 %1821 }
 0x3f7   : > { %1839 = vst.msk [vmem:[#allocation5 + $0x38] sm:$0xff] %vm1831_vm8, %v1822_v11 }
 0x3f9   : > { %v1885_v12 = vpop.permute.xlu0 %1884 }
 0x3fa   : > { %1903 = vst.msk [vmem:[#allocation5 + $0x30] sm:$0xff] %vm1896_vm9, %v1885_v12  ;;  %v1887_v13 = vpop.permute.xlu1 %1886 }
 0x3fb   : > { %1904 = vst.msk [vmem:[#allocation5 + $0x38] sm:$0xff] %vm1896_vm9, %v1887_v13 }
 0x3fd   : > { %v1950_v14 = vpop.permute.xlu0 %1949 }
 0x3fe   : > { %1968 = vst.msk [vmem:[#allocation5 + $0x30] sm:$0xff] %vm1961_vm10, %v1950_v14  ;;  %v1952_v15 = vpop.permute.xlu1 %1951 }
 0x3ff   : > { %1969 = vst.msk [vmem:[#allocation5 + $0x38] sm:$0xff] %vm1961_vm10, %v1952_v15 }
 0x405   : > { %v1976_v17 = vld [vmem:[#allocation5 + $0x30] sm:$0xff] }
 0x406   : > { %2589 = vmatprep.mubr.msk.bf16.mxu1 %vm2021_vm11, %v1976_v17  ;;  %v1977_v18 = vld [vmem:[#allocation5 + $0x38] sm:$0xff] }
 0x407   : > { %2590 = vmatmul.mubr.msk.bf16.gmra.mrb[12].mxu1 %vm2021_vm11, %v1977_v18 }
 0x47d   : > { %v2579_v20 = vpop.f32.mrb[0].mxu1 }
 0x47e   : > { %v2093_v21 = vadd.f32 %v2579_v20, %v4118_v19  ;;  %v2084_v16 = vpop.f32.mrb[1].mxu1 }
 0x47f   : > { %v2085_v22 = vadd.f32 %v4118_v19, %v2084_v16  ;;  %v2580_v23 = vpop.f32.mrb[2].mxu1 }
 0x480   : > { %v2149_v24 = vmax.f32 %v2093_v21, 0.0  ;;  %v2096_v25 = vadd.f32 %v2580_v23, %v4118_v19  ;;  %v2087_v26 = vpop.f32.mrb[3].mxu1 }
 0x481   : > { %v2147_v27 = vmax.f32 %v2085_v22, 0.0  ;;  %v2088_v28 = vadd.f32 %v4118_v19, %v2087_v26 }
 0x482   : > { %2165 = vst.msk [vmem:[%s3365_s5 + $0x10] sm:$0xff] %vm1379_vm15, %v2149_v24  ;;  %v2150_v29 = vmax.f32 %v2096_v25, 0.0 }
 0x483   : > { %2163 = vst.msk [vmem:[%s3365_s5] sm:$0xff] %vm1379_vm15, %v2147_v27  ;;  %v2148_v30 = vmax.f32 %v2088_v28, 0.0 }
 0x484   : > { %2166 = vst.msk [vmem:[%s3365_s5 + $0x18] sm:$0xff] %vm1379_vm15, %v2150_v29 }
 0x485   : > { %2164 = vst.msk [vmem:[%s3365_s5 + $0x8] sm:$0xff] %vm1379_vm15, %v2148_v30 }
 0x49d   : > { %v2583_v31 = vpop.f32.mrb[4].mxu1 }
 0x49e   : > { %v2109_v32 = vadd.f32 %v2583_v31, %v4118_v19  ;;  %v2100_v33 = vpop.f32.mrb[5].mxu1 }
 0x49f   : > { %v2101_v34 = vadd.f32 %v4118_v19, %v2100_v33  ;;  %v2584_v35 = vpop.f32.mrb[6].mxu1 }
 0x4a0   : > { %v2153_v36 = vmax.f32 %v2109_v32, 0.0  ;;  %v2112_v37 = vadd.f32 %v2584_v35, %v4118_v19  ;;  %v2103_v38 = vpop.f32.mrb[7].mxu1 }
 0x4a1   : > { %v2151_v39 = vmax.f32 %v2101_v34, 0.0  ;;  %v2104_v40 = vadd.f32 %v4118_v19, %v2103_v38 }
 0x4a2   : > { %2169 = vst.msk [vmem:[%s3365_s5 + $0x30] sm:$0xff] %vm1379_vm15, %v2153_v36  ;;  %v2154_v41 = vmax.f32 %v2112_v37, 0.0 }
 0x4a3   : > { %2167 = vst.msk [vmem:[%s3365_s5 + $0x20] sm:$0xff] %vm1379_vm15, %v2151_v39  ;;  %v2152_v42 = vmax.f32 %v2104_v40, 0.0 }
 0x4a4   : > { %2170 = vst.msk [vmem:[%s3365_s5 + $0x38] sm:$0xff] %vm1379_vm15, %v2154_v41 }
 0x4a5   : > { %2168 = vst.msk [vmem:[%s3365_s5 + $0x28] sm:$0xff] %vm1379_vm15, %v2152_v42 }
 0x4bd   : > { %v2587_v43 = vpop.f32.mrb[8].mxu1 }
 0x4be   : > { %v2125_v44 = vadd.f32 %v2587_v43, %v4118_v19  ;;  %v2116_v45 = vpop.f32.mrb[9].mxu1 }
 0x4bf   : > { %v2117_v46 = vadd.f32 %v4118_v19, %v2116_v45  ;;  %v2588_v47 = vpop.f32.mrb[10].mxu1 }
 0x4c0   : > { %v2157_v48 = vmax.f32 %v2125_v44, 0.0  ;;  %v2128_v49 = vadd.f32 %v2588_v47, %v4118_v19  ;;  %v2119_v50 = vpop.f32.mrb[11].mxu1 }
 0x4c1   : > { %v2155_v51 = vmax.f32 %v2117_v46, 0.0  ;;  %v2120_v52 = vadd.f32 %v4118_v19, %v2119_v50 }
 0x4c2   : > { %2173 = vst.msk [vmem:[%s3365_s5 + $0x50] sm:$0xff] %vm1379_vm15, %v2157_v48  ;;  %v2158_v53 = vmax.f32 %v2128_v49, 0.0 }
 0x4c3   : > { %2171 = vst.msk [vmem:[%s3365_s5 + $0x40] sm:$0xff] %vm1379_vm15, %v2155_v51  ;;  %v2156_v54 = vmax.f32 %v2120_v52, 0.0 }
 0x4c4   : > { %2174 = vst.msk [vmem:[%s3365_s5 + $0x58] sm:$0xff] %vm1379_vm15, %v2158_v53 }
 0x4c5   : > { %2172 = vst.msk [vmem:[%s3365_s5 + $0x48] sm:$0xff] %vm1379_vm15, %v2156_v54 }
 0x4da   : > { %v2591_v55 = vpop.f32.mrb[12].mxu1 }
 0x4db   : > { %v2141_v56 = vadd.f32 %v2591_v55, %v4118_v19  ;;  %v2132_v57 = vpop.f32.mrb[13].mxu1 }
 0x4dc   : > { %v2133_v58 = vadd.f32 %v4118_v19, %v2132_v57  ;;  %v2592_v59 = vpop.f32.mrb[14].mxu1 }
 0x4dd   : > { %v2161_v60 = vmax.f32 %v2141_v56, 0.0  ;;  %v2144_v61 = vadd.f32 %v2592_v59, %v4118_v19  ;;  %v2135_v62 = vpop.f32.mrb[15].mxu1 }
 0x4de   : > { %v2159_v63 = vmax.f32 %v2133_v58, 0.0  ;;  %v2136_v0 = vadd.f32 %v4118_v19, %v2135_v62 }
 0x4df   : > { %2177 = vst.msk [vmem:[%s3365_s5 + $0x70] sm:$0xff] %vm1379_vm15, %v2161_v60  ;;  %v2162_v1 = vmax.f32 %v2144_v61, 0.0 }
 0x4e0   : > { %2175 = vst.msk [vmem:[%s3365_s5 + $0x60] sm:$0xff] %vm1379_vm15, %v2159_v63  ;;  %v2160_v2 = vmax.f32 %v2136_v0, 0.0 }
 0x4e1   : > { %2178 = vst.msk [vmem:[%s3365_s5 + $0x78] sm:$0xff] %vm1379_vm15, %v2162_v1 }
 0x4e2   : > { %2176 = vst.msk [vmem:[%s3365_s5 + $0x68] sm:$0xff] %vm1379_vm15, %v2160_v2 }
 0x4e3   : > { %2921 = shalt.err (!%p2918_p12)
}
 0x4e4   : > { %s2922_s2 = scalar_lea.hbm %s4168_s10, 2048  ;;  %s2926_s15 = scalar_lea.hbm %s4288_s30, 24576 }
 0x4e5   : > { %p2923_p2 = scmp.ne.s32.totalorder %s4168_s10, %s2922_s2  ;;  %p2927_p0 = scmp.lt.u32.totalorder %s4168_s10, %s4288_s30 }
 0x4e6   : > { %p2928_p3 = scmp.lt.u32.totalorder %s2926_s15, %s2922_s2  ;;  %p2930_p4 = scmp.lt.u32.totalorder %s2922_s2, %s4168_s10 }
 0x4e7   : > { %p2924_p7 = pnand %p2923_p2, %p4289_p6 }
 0x4e8   : > { %p2929_p1 = por %p2928_p3, %p2927_p0 }
 0x4e9   : > { %p2925_p9 = pneg %p2924_p7 }
 0x4ea   : > { %p2931_p13 = por %p2930_p4, %p2929_p1 }
 0x4ec   : > { %p2932_p10 = pnand %p2931_p13, %p2925_p9 }
 0x4ee   : > { %2935 = shalt.err (!%p2932_p10)
}
 0x4ef   : > { %s3065_s9 = smov 128  }
 0x4f0   : > { %2613 = dma.vmem_to_hbm [thread:$0]  (%p4289_p6), %s4172_s18, 2048, %s4168_s10, %s4180_s7, %s3065_s9, %s3065_s9, %s3051_s12  }
 0x4f1 PF: > { %s4290_s6 = sld [smem:[#allocation20_spill]]  ;;  %s4291_s1 = sld [smem:[#allocation24_spill]] }
 0x4f2   : > { %p2645_p11 = scmp.ge.s32.totalorder %s3038_s28, 2 }
 0x4f7   : > { %s2211_s17 = sand.u32 1, %s4290_s6   ;;  %p4292_p5 = scmp.ne.s32.totalorder %s4291_s1, 0 }
 0x4f8   : > { %s2212_s24 = scalar_lea.sflag [#allocation8], %s2211_s17 }
 0x4f9   : > { %p2633_p8 = pnand %p2645_p11, %p4292_p5 }
 0x4fb   : > { %2993 = dma.done.wait (!%p2633_p8), %s2212_s24, 2048  }
 0x4fc   : > { %2995 = vsyncadd (!%p2633_p8), %s2212_s24, 4294965248  ;;  %s23_s28 = sadd.s32 1, %s3038_s28   ;;  %s4293_s18 = smov %s3002_s19 }
 0x4fd   : > { %p20_p12 = scmp.ge.s32.totalorder %s23_s28, 14   ;;  %s4294_s19 = smov %s3006_s20 }
 0x4fe   : > { %s4295_s20 = smov %s3300_s16  ;;  %s4296_s21 = smov %s3014_s22 }
 0x4ff   : > { %s4297_s22 = smov %s3018_s23  ;;  %s4298_s23 = smov %s3297_s14 }
 0x500   : > { %s4299_s24 = smov %s3030_s26  ;;  %s4300_s25 = smov %s3034_s27 }
 0x501   : > { %s4301_s26 = smov %s4304_s11  ;;  %s4302_s27 = smov %s4308_s13 }
 0x502   :  { %22 = sbr.rel (!%p20_p12) target bundleno = 15 (0xf), region = 120 }
 0x509   :  { %2217 = vsyncpa [#allocation7], 1 }
 0x50a   :  { %2219 = vsyncpa [#allocation7 + $0x1], 1 }
 0x50b   :  { %2220 = vsyncpa [#allocation10], 1 }
 0x50c   :  { %2221 = vsyncpa [#allocation13], 1 }
 0x50d   :  { %2222 = vsyncpa [#allocation8], 1 }
 0x50e   :  { %2224 = vsyncpa [#allocation8 + $0x1], 1 }

</bundles_post_ra>
